<compile_context>
chip_gen: v5e
topology: v5e:2x2
jax: 0.10.0
libtpu: 0.0.40
codegen_flags: <defaults>
</compile_context>

<pallas_src>
import functools

import jax
import jax.numpy as jnp
from jax import lax
from jax.experimental import pallas as pl
from jax.experimental.pallas import tpu as pltpu


# ------------------------------- Pallas kernel --------------------------------

def _mha_kernel(xq_ref, xk_ref, xv_ref,
                wq_ref, wk_ref, wv_ref,
                bq_ref, bk_ref, bv_ref,
                wm_ref, bm_ref,
                o_ref,
                qs_ref, ks_ref, vs_ref, os_ref,
                *, num_heads, head_dim):
    """One batch per grid step: full-width QKV projections, per-head attention,
    single full-width merge matmul."""
    # --- Full-width projections: (L, C) @ (C, C); softmax scale folded into wq/bq.
    qs_ref[...] = (jnp.dot(xq_ref[0], wq_ref[...],
                           preferred_element_type=jnp.float32)
                   + bq_ref[...]).astype(qs_ref.dtype)
    ks_ref[...] = (jnp.dot(xk_ref[0], wk_ref[...],
                           preferred_element_type=jnp.float32)
                   + bk_ref[...]).astype(ks_ref.dtype)
    vs_ref[...] = (jnp.dot(xv_ref[0], wv_ref[...],
                           preferred_element_type=jnp.float32)
                   + bv_ref[...]).astype(vs_ref.dtype)

    # --- Per-head attention (static, unrolled; D-wide matmuls are inherent to MHA).
    for h in range(num_heads):
        sl = pl.ds(h * head_dim, head_dim)
        q_h = qs_ref[:, sl]                       # (Lq, D) bf16
        k_h = ks_ref[:, sl]                       # (Lk, D) bf16
        v_h = vs_ref[:, sl]                       # (Lk, D) bf16

        # scores[n, m] = <q_n, k_m> (scale already folded into q).
        s = lax.dot_general(q_h, k_h, (((1,), (1,)), ((), ())),
                            preferred_element_type=jnp.float32)        # (Lq, Lk)
        s = s - jnp.max(s, axis=-1, keepdims=True)
        p = jnp.exp(s)
        p = p * pl.reciprocal(jnp.sum(p, axis=-1, keepdims=True), approx=True)

        o_h = jnp.dot(p.astype(jnp.bfloat16), v_h,
                      preferred_element_type=jnp.float32)              # (Lq, D)
        os_ref[:, sl] = o_h.astype(os_ref.dtype)

    # --- Single merge matmul (K = C, full MXU depth) + bias; lane-dense store.
    o_ref[0] = (jnp.dot(os_ref[...], wm_ref[...],
                        preferred_element_type=jnp.float32)
                + bm_ref[...]).astype(o_ref.dtype)


# ----------------------------- pallas_call wrapper -----------------------------

def multi_headed_attention(params, query, key, value, *, compute_dtype=jnp.bfloat16):
    """query/key/value: (B, d_model, L) in the PyTorch Conv1d (NCL) layout."""
    H = params["num_heads"]
    B, C, N = query.shape
    M = key.shape[2]
    D = C // H
    scale = 1.0 / float(D) ** 0.5

    # NCL -> NLC boundary transposes, done in bf16 (half the bytes of f32).
    # TODO(synk): keep the surrounding model in NLC layout to drop these entirely.
    xq = jnp.transpose(query.astype(compute_dtype), (0, 2, 1))
    xk = jnp.transpose(key.astype(compute_dtype), (0, 2, 1))
    xv = jnp.transpose(value.astype(compute_dtype), (0, 2, 1))

    # PyTorch .view(B, D, H, L): projected channel c = d*H + h. Re-order columns
    # so head h owns the contiguous column block [h*D, (h+1)*D).
    def w_in(w):   # (C_out, C_in) -> (C_in, C) with new col h*D+d = old col d*H+h
        return w.T.reshape(C, D, H).transpose(0, 2, 1).reshape(C, C)

    def b_in(b):   # (C_out,) -> (1, C) head-blocked
        return b.reshape(D, H).T.reshape(1, C)

    wq = (w_in(params["wq"]) * scale).astype(compute_dtype)   # softmax scale folded in
    wk = w_in(params["wk"]).astype(compute_dtype)
    wv = w_in(params["wv"]).astype(compute_dtype)
    bq = (b_in(params["bq"]) * scale).astype(jnp.float32)
    bk = b_in(params["bk"]).astype(jnp.float32)
    bv = b_in(params["bv"]).astype(jnp.float32)
    # Merge conv input channel c = d*H + h -> re-order ROWS to the same
    # head-blocked order; output channel order unchanged.
    wm = (params["wm"].T.reshape(D, H, C).transpose(1, 0, 2)
          .reshape(C, C).astype(compute_dtype))
    bm = params["bm"].reshape(1, C).astype(jnp.float32)

    kernel = functools.partial(_mha_kernel, num_heads=H, head_dim=D)

    flops = 2 * B * (N * C * C + 2 * M * C * C + N * C * C + 2 * H * N * M * D)
    transcendentals = B * H * N * (M + 1)
    bytes_accessed = (B * (N + 2 * M) * C * 2          # bf16 activations in
                      + 4 * C * C * 2 + 4 * C * 4      # weights + biases
                      + B * N * C * 4)                 # f32 output

    # TODO(synk): for long sequences, add a flash-style KV grid axis (online
    # softmax m/l scratch) and an N-tile "parallel" axis so B=1 still feeds both
    # v7x TensorCores; size tiles against 64 MiB VMEM via vmem_limit_bytes.
    out_nlc = pl.pallas_call(
        kernel,
        out_shape=jax.ShapeDtypeStruct((B, N, C), jnp.float32),
        grid_spec=pltpu.PrefetchScalarGridSpec(
            num_scalar_prefetch=0,
            grid=(B,),
            in_specs=[
                pl.BlockSpec((1, N, C), lambda b: (b, 0, 0)),   # xq
                pl.BlockSpec((1, M, C), lambda b: (b, 0, 0)),   # xk
                pl.BlockSpec((1, M, C), lambda b: (b, 0, 0)),   # xv
                pl.BlockSpec((C, C), lambda b: (0, 0)),         # Wq (resident)
                pl.BlockSpec((C, C), lambda b: (0, 0)),         # Wk
                pl.BlockSpec((C, C), lambda b: (0, 0)),         # Wv
                pl.BlockSpec((1, C), lambda b: (0, 0)),         # bq
                pl.BlockSpec((1, C), lambda b: (0, 0)),         # bk
                pl.BlockSpec((1, C), lambda b: (0, 0)),         # bv
                pl.BlockSpec((C, C), lambda b: (0, 0)),         # Wm
                pl.BlockSpec((1, C), lambda b: (0, 0)),         # bm
            ],
            out_specs=pl.BlockSpec((1, N, C), lambda b: (b, 0, 0)),
            scratch_shapes=[
                pltpu.VMEM((N, C), compute_dtype),   # Q staging (head-blocked cols)
                pltpu.VMEM((M, C), compute_dtype),   # K staging
                pltpu.VMEM((M, C), compute_dtype),   # V staging
                pltpu.VMEM((N, C), compute_dtype),   # per-head attention outputs
            ],
        ),
        compiler_params=pltpu.CompilerParams(dimension_semantics=("parallel",)),
        cost_estimate=pl.CostEstimate(flops=flops,
                                      transcendentals=transcendentals,
                                      bytes_accessed=bytes_accessed),
    )(xq, xk, xv, wq, wk, wv, bq, bk, bv, wm, bm)

    return jnp.transpose(out_nlc, (0, 2, 1))           # back to (B, C, L)


# ------------------------------- pure-JAX reference ----------------------------

def mha_reference(params, query, key, value):
    """Direct translation of the PyTorch forward, f32, highest matmul precision."""
    H = params["num_heads"]
    B, C, _ = query.shape
    D = C // H
    hp = jax.lax.Precision.HIGHEST

    def conv1d(x, w, b):
        return jnp.einsum("oc,bcn->bon", w, x, precision=hp) + b[None, :, None]

    q = conv1d(query, params["wq"], params["bq"]).reshape(B, D, H, -1)
    k = conv1d(key, params["wk"], params["bk"]).reshape(B, D, H, -1)
    v = conv1d(value, params["wv"], params["bv"]).reshape(B, D, H, -1)
    scores = jnp.einsum("bdhn,bdhm->bhnm", q, k, precision=hp) / (D ** 0.5)
    prob = jax.nn.softmax(scores, axis=-1)
    x = jnp.einsum("bhnm,bdhm->bdhn", prob, v, precision=hp)
    x = x.reshape(B, D * H, -1)
    return conv1d(x, params["wm"], params["bm"])


# --------------------------------- parameter init ------------------------------

def init_params(key, d_model, num_heads):
    """PyTorch Conv1d(k=1) default init; proj = [deepcopy(merge)]*3 => same values."""
    kw, kb = jax.random.split(key)
    bound = 1.0 / (d_model ** 0.5)                       # fan_in = d_model * 1
    w = jax.random.uniform(kw, (d_model, d_model), jnp.float32, -bound, bound)
    b = jax.random.uniform(kb, (d_model,), jnp.float32, -bound, bound)
    return {"num_heads": num_heads,
            "wq": w, "bq": b,         # proj[0] (deepcopy of merge at init)
            "wk": w, "bk": b,         # proj[1]
            "wv": w, "bv": b,         # proj[2]
            "wm": w, "bm": b}         # merge


# -------------------------------------- main -----------------------------------

if __name__ == "__main__":
    root = jax.random.PRNGKey(0)
    kp, kq, kk, kv = jax.random.split(root, 4)

    B, d_model, num_heads, Lq, Lkv = 2, 128, 4, 128, 128
    params = init_params(kp, d_model, num_heads)

    query = jax.random.normal(kq, (B, d_model, Lq), jnp.float32)
    key_t = jax.random.normal(kk, (B, d_model, Lkv), jnp.float32)
    value = jax.random.normal(kv, (B, d_model, Lkv), jnp.float32)

    fwd = jax.jit(functools.partial(multi_headed_attention, params))
    out = fwd(query, key_t, value)
    jax.block_until_ready(out)

    assert out.shape == (B, d_model, Lq), out.shape
    assert bool(jnp.isfinite(out).all())

    ref = mha_reference(params, query, key_t, value)
    max_err = float(jnp.max(jnp.abs(out - ref)))
    assert max_err < 1e-2, f"max abs error {max_err}"

    print("KERNEL_OK")
</pallas_src>

<mosaic_0001>
module attributes {stable_mosaic.version = 11 : i64} {
  func.func @_mha_kernel(%arg0: i32, %arg1: memref<1x128x128xbf16, #tpu.memory_space<vmem>>, %arg2: memref<1x128x128xbf16, #tpu.memory_space<vmem>>, %arg3: memref<1x128x128xbf16, #tpu.memory_space<vmem>>, %arg4: memref<128x128xbf16, #tpu.memory_space<vmem>>, %arg5: memref<128x128xbf16, #tpu.memory_space<vmem>>, %arg6: memref<128x128xbf16, #tpu.memory_space<vmem>>, %arg7: memref<1x128xf32, #tpu.memory_space<vmem>>, %arg8: memref<1x128xf32, #tpu.memory_space<vmem>>, %arg9: memref<1x128xf32, #tpu.memory_space<vmem>>, %arg10: memref<128x128xbf16, #tpu.memory_space<vmem>>, %arg11: memref<1x128xf32, #tpu.memory_space<vmem>>, %arg12: memref<1x128x128xf32, #tpu.memory_space<vmem>>, %arg13: memref<128x128xbf16, #tpu.memory_space<vmem>>, %arg14: memref<128x128xbf16, #tpu.memory_space<vmem>>, %arg15: memref<128x128xbf16, #tpu.memory_space<vmem>>, %arg16: memref<128x128xbf16, #tpu.memory_space<vmem>>) attributes {dimension_semantics = [#tpu.dimension_semantics<parallel>], iteration_bounds = array<i64: 2>, scalar_prefetch = 0 : i64, scratch_operands = 4 : i64, tpu.core_type = #tpu.core_type<tc>, window_params = [{transform_indices = @transform_0, window_bounds = array<i64: 1, 128, 128>}, {transform_indices = @transform_1, window_bounds = array<i64: 1, 128, 128>}, {transform_indices = @transform_2, window_bounds = array<i64: 1, 128, 128>}, {pipeline_mode = #tpu.pipeline_mode<synchronous>, transform_indices = @transform_3, window_bounds = array<i64: 128, 128>}, {pipeline_mode = #tpu.pipeline_mode<synchronous>, transform_indices = @transform_4, window_bounds = array<i64: 128, 128>}, {pipeline_mode = #tpu.pipeline_mode<synchronous>, transform_indices = @transform_5, window_bounds = array<i64: 128, 128>}, {pipeline_mode = #tpu.pipeline_mode<synchronous>, transform_indices = @transform_6, window_bounds = array<i64: 1, 128>}, {pipeline_mode = #tpu.pipeline_mode<synchronous>, transform_indices = @transform_7, window_bounds = array<i64: 1, 128>}, {pipeline_mode = #tpu.pipeline_mode<synchronous>, transform_indices = @transform_8, window_bounds = array<i64: 1, 128>}, {pipeline_mode = #tpu.pipeline_mode<synchronous>, transform_indices = @transform_9, window_bounds = array<i64: 128, 128>}, {pipeline_mode = #tpu.pipeline_mode<synchronous>, transform_indices = @transform_10, window_bounds = array<i64: 1, 128>}, {transform_indices = @transform_11, window_bounds = array<i64: 1, 128, 128>}]} {
    %c0 = arith.constant 0 : index
    %c0_0 = arith.constant 0 : index
    %c0_1 = arith.constant 0 : index
    %0 = vector.load %arg1[%c0, %c0_0, %c0_1] : memref<1x128x128xbf16, #tpu.memory_space<vmem>>, vector<1x128x128xbf16>
    %1 = vector.shape_cast %0 : vector<1x128x128xbf16> to vector<128x128xbf16>
    %c0_2 = arith.constant 0 : index
    %c0_3 = arith.constant 0 : index
    %2 = vector.load %arg4[%c0_2, %c0_3] : memref<128x128xbf16, #tpu.memory_space<vmem>>, vector<128x128xbf16>
    %cst = arith.constant dense<0.000000e+00> : vector<128x128xf32>
    %3 = tpu.matmul %1, %2, %cst {dimension_numbers = #tpu.dot_dimension_numbers<[1], [0], [0], [1], [0, 0, 1, 1], [], []>} : vector<128x128xbf16>, vector<128x128xbf16>, vector<128x128xf32> -> vector<128x128xf32>
    %c0_4 = arith.constant 0 : index
    %c0_5 = arith.constant 0 : index
    %4 = vector.load %arg7[%c0_4, %c0_5] : memref<1x128xf32, #tpu.memory_space<vmem>>, vector<1x128xf32>
    %5 = vector.broadcast %4 : vector<1x128xf32> to vector<128x128xf32>
    %6 = arith.addf %3, %5 : vector<128x128xf32>
    %7 = arith.truncf %6 : vector<128x128xf32> to vector<128x128xbf16>
    %c0_6 = arith.constant 0 : index
    %c0_7 = arith.constant 0 : index
    %8 = vector.load %arg13[%c0_6, %c0_7] : memref<128x128xbf16, #tpu.memory_space<vmem>>, vector<128x128xbf16>
    tpu.vector_store %arg13[%c0_6, %c0_7], %7 {strides = array<i32>} : memref<128x128xbf16, #tpu.memory_space<vmem>>, vector<128x128xbf16>,
    %c0_8 = arith.constant 0 : index
    %c0_9 = arith.constant 0 : index
    %c0_10 = arith.constant 0 : index
    %9 = vector.load %arg2[%c0_8, %c0_9, %c0_10] : memref<1x128x128xbf16, #tpu.memory_space<vmem>>, vector<1x128x128xbf16>
    %10 = vector.shape_cast %9 : vector<1x128x128xbf16> to vector<128x128xbf16>
    %c0_11 = arith.constant 0 : index
    %c0_12 = arith.constant 0 : index
    %11 = vector.load %arg5[%c0_11, %c0_12] : memref<128x128xbf16, #tpu.memory_space<vmem>>, vector<128x128xbf16>
    %cst_13 = arith.constant dense<0.000000e+00> : vector<128x128xf32>
    %12 = tpu.matmul %10, %11, %cst_13 {dimension_numbers = #tpu.dot_dimension_numbers<[1], [0], [0], [1], [0, 0, 1, 1], [], []>} : vector<128x128xbf16>, vector<128x128xbf16>, vector<128x128xf32> -> vector<128x128xf32>
    %c0_14 = arith.constant 0 : index
    %c0_15 = arith.constant 0 : index
    %13 = vector.load %arg8[%c0_14, %c0_15] : memref<1x128xf32, #tpu.memory_space<vmem>>, vector<1x128xf32>
    %14 = vector.broadcast %13 : vector<1x128xf32> to vector<128x128xf32>
    %15 = arith.addf %12, %14 : vector<128x128xf32>
    %16 = arith.truncf %15 : vector<128x128xf32> to vector<128x128xbf16>
    %c0_16 = arith.constant 0 : index
    %c0_17 = arith.constant 0 : index
    %17 = vector.load %arg14[%c0_16, %c0_17] : memref<128x128xbf16, #tpu.memory_space<vmem>>, vector<128x128xbf16>
    tpu.vector_store %arg14[%c0_16, %c0_17], %16 {strides = array<i32>} : memref<128x128xbf16, #tpu.memory_space<vmem>>, vector<128x128xbf16>,
    %c0_18 = arith.constant 0 : index
    %c0_19 = arith.constant 0 : index
    %c0_20 = arith.constant 0 : index
    %18 = vector.load %arg3[%c0_18, %c0_19, %c0_20] : memref<1x128x128xbf16, #tpu.memory_space<vmem>>, vector<1x128x128xbf16>
    %19 = vector.shape_cast %18 : vector<1x128x128xbf16> to vector<128x128xbf16>
    %c0_21 = arith.constant 0 : index
    %c0_22 = arith.constant 0 : index
    %20 = vector.load %arg6[%c0_21, %c0_22] : memref<128x128xbf16, #tpu.memory_space<vmem>>, vector<128x128xbf16>
    %cst_23 = arith.constant dense<0.000000e+00> : vector<128x128xf32>
    %21 = tpu.matmul %19, %20, %cst_23 {dimension_numbers = #tpu.dot_dimension_numbers<[1], [0], [0], [1], [0, 0, 1, 1], [], []>} : vector<128x128xbf16>, vector<128x128xbf16>, vector<128x128xf32> -> vector<128x128xf32>
    %c0_24 = arith.constant 0 : index
    %c0_25 = arith.constant 0 : index
    %22 = vector.load %arg9[%c0_24, %c0_25] : memref<1x128xf32, #tpu.memory_space<vmem>>, vector<1x128xf32>
    %23 = vector.broadcast %22 : vector<1x128xf32> to vector<128x128xf32>
    %24 = arith.addf %21, %23 : vector<128x128xf32>
    %25 = arith.truncf %24 : vector<128x128xf32> to vector<128x128xbf16>
    %c0_26 = arith.constant 0 : index
    %c0_27 = arith.constant 0 : index
    %26 = vector.load %arg15[%c0_26, %c0_27] : memref<128x128xbf16, #tpu.memory_space<vmem>>, vector<128x128xbf16>
    tpu.vector_store %arg15[%c0_26, %c0_27], %25 {strides = array<i32>} : memref<128x128xbf16, #tpu.memory_space<vmem>>, vector<128x128xbf16>,
    %c0_28 = arith.constant 0 : index
    %c0_29 = arith.constant 0 : index
    %27 = vector.load %arg13[%c0_28, %c0_29] : memref<128x128xbf16, #tpu.memory_space<vmem>>, vector<128x32xbf16>
    %c0_30 = arith.constant 0 : index
    %c0_31 = arith.constant 0 : index
    %28 = vector.load %arg14[%c0_30, %c0_31] : memref<128x128xbf16, #tpu.memory_space<vmem>>, vector<128x32xbf16>
    %c0_32 = arith.constant 0 : index
    %c0_33 = arith.constant 0 : index
    %29 = vector.load %arg15[%c0_32, %c0_33] : memref<128x128xbf16, #tpu.memory_space<vmem>>, vector<128x32xbf16>
    %cst_34 = arith.constant dense<0.000000e+00> : vector<128x128xf32>
    %30 = tpu.matmul %27, %28, %cst_34 {dimension_numbers = #tpu.dot_dimension_numbers<[1], [1], [0], [0], [0, 0, 1, 0], [], []>} : vector<128x32xbf16>, vector<128x32xbf16>, vector<128x128xf32> -> vector<128x128xf32>
    %cst_35 = arith.constant dense<0xFF800000> : vector<128xf32>
    %31 = vector.multi_reduction <maximumf>, %30, %cst_35 [1] : vector<128x128xf32> to vector<128xf32>
    %32 = vector.shape_cast %31 : vector<128xf32> to vector<128x1xf32>
    %33 = vector.broadcast %32 : vector<128x1xf32> to vector<128x128xf32>
    %34 = arith.subf %30, %33 : vector<128x128xf32>
    %35 = math.exp %34 : vector<128x128xf32>
    %cst_36 = arith.constant dense<0.000000e+00> : vector<128xf32>
    %36 = vector.multi_reduction <add>, %35, %cst_36 [1] : vector<128x128xf32> to vector<128xf32>
    %37 = vector.shape_cast %36 : vector<128xf32> to vector<128x1xf32>
    %38 = tpu.reciprocal %37 {approx = true} : vector<128x1xf32> -> vector<128x1xf32>
    %39 = vector.broadcast %38 : vector<128x1xf32> to vector<128x128xf32>
    %40 = arith.mulf %35, %39 : vector<128x128xf32>
    %41 = arith.truncf %40 : vector<128x128xf32> to vector<128x128xbf16>
    %cst_37 = arith.constant dense<0.000000e+00> : vector<128x32xf32>
    %42 = tpu.matmul %41, %29, %cst_37 {dimension_numbers = #tpu.dot_dimension_numbers<[1], [0], [0], [1], [0, 0, 1, 1], [], []>} : vector<128x128xbf16>, vector<128x32xbf16>, vector<128x32xf32> -> vector<128x32xf32>
    %43 = arith.truncf %42 : vector<128x32xf32> to vector<128x32xbf16>
    %c0_38 = arith.constant 0 : index
    %c0_39 = arith.constant 0 : index
    %44 = vector.load %arg16[%c0_38, %c0_39] : memref<128x128xbf16, #tpu.memory_space<vmem>>, vector<128x32xbf16>
    tpu.vector_store %arg16[%c0_38, %c0_39], %43 {strides = array<i32>} : memref<128x128xbf16, #tpu.memory_space<vmem>>, vector<128x32xbf16>,
    %c0_40 = arith.constant 0 : index
    %c32 = arith.constant 32 : index
    %45 = vector.load %arg13[%c0_40, %c32] : memref<128x128xbf16, #tpu.memory_space<vmem>>, vector<128x32xbf16>
    %c0_41 = arith.constant 0 : index
    %c32_42 = arith.constant 32 : index
    %46 = vector.load %arg14[%c0_41, %c32_42] : memref<128x128xbf16, #tpu.memory_space<vmem>>, vector<128x32xbf16>
    %c0_43 = arith.constant 0 : index
    %c32_44 = arith.constant 32 : index
    %47 = vector.load %arg15[%c0_43, %c32_44] : memref<128x128xbf16, #tpu.memory_space<vmem>>, vector<128x32xbf16>
    %cst_45 = arith.constant dense<0.000000e+00> : vector<128x128xf32>
    %48 = tpu.matmul %45, %46, %cst_45 {dimension_numbers = #tpu.dot_dimension_numbers<[1], [1], [0], [0], [0, 0, 1, 0], [], []>} : vector<128x32xbf16>, vector<128x32xbf16>, vector<128x128xf32> -> vector<128x128xf32>
    %cst_46 = arith.constant dense<0xFF800000> : vector<128xf32>
    %49 = vector.multi_reduction <maximumf>, %48, %cst_46 [1] : vector<128x128xf32> to vector<128xf32>
    %50 = vector.shape_cast %49 : vector<128xf32> to vector<128x1xf32>
    %51 = vector.broadcast %50 : vector<128x1xf32> to vector<128x128xf32>
    %52 = arith.subf %48, %51 : vector<128x128xf32>
    %53 = math.exp %52 : vector<128x128xf32>
    %cst_47 = arith.constant dense<0.000000e+00> : vector<128xf32>
    %54 = vector.multi_reduction <add>, %53, %cst_47 [1] : vector<128x128xf32> to vector<128xf32>
    %55 = vector.shape_cast %54 : vector<128xf32> to vector<128x1xf32>
    %56 = tpu.reciprocal %55 {approx = true} : vector<128x1xf32> -> vector<128x1xf32>
    %57 = vector.broadcast %56 : vector<128x1xf32> to vector<128x128xf32>
    %58 = arith.mulf %53, %57 : vector<128x128xf32>
    %59 = arith.truncf %58 : vector<128x128xf32> to vector<128x128xbf16>
    %cst_48 = arith.constant dense<0.000000e+00> : vector<128x32xf32>
    %60 = tpu.matmul %59, %47, %cst_48 {dimension_numbers = #tpu.dot_dimension_numbers<[1], [0], [0], [1], [0, 0, 1, 1], [], []>} : vector<128x128xbf16>, vector<128x32xbf16>, vector<128x32xf32> -> vector<128x32xf32>
    %61 = arith.truncf %60 : vector<128x32xf32> to vector<128x32xbf16>
    %c0_49 = arith.constant 0 : index
    %c32_50 = arith.constant 32 : index
    %62 = vector.load %arg16[%c0_49, %c32_50] : memref<128x128xbf16, #tpu.memory_space<vmem>>, vector<128x32xbf16>
    tpu.vector_store %arg16[%c0_49, %c32_50], %61 {strides = array<i32>} : memref<128x128xbf16, #tpu.memory_space<vmem>>, vector<128x32xbf16>,
    %c0_51 = arith.constant 0 : index
    %c64 = arith.constant 64 : index
    %63 = vector.load %arg13[%c0_51, %c64] : memref<128x128xbf16, #tpu.memory_space<vmem>>, vector<128x32xbf16>
    %c0_52 = arith.constant 0 : index
    %c64_53 = arith.constant 64 : index
    %64 = vector.load %arg14[%c0_52, %c64_53] : memref<128x128xbf16, #tpu.memory_space<vmem>>, vector<128x32xbf16>
    %c0_54 = arith.constant 0 : index
    %c64_55 = arith.constant 64 : index
    %65 = vector.load %arg15[%c0_54, %c64_55] : memref<128x128xbf16, #tpu.memory_space<vmem>>, vector<128x32xbf16>
    %cst_56 = arith.constant dense<0.000000e+00> : vector<128x128xf32>
    %66 = tpu.matmul %63, %64, %cst_56 {dimension_numbers = #tpu.dot_dimension_numbers<[1], [1], [0], [0], [0, 0, 1, 0], [], []>} : vector<128x32xbf16>, vector<128x32xbf16>, vector<128x128xf32> -> vector<128x128xf32>
    %cst_57 = arith.constant dense<0xFF800000> : vector<128xf32>
    %67 = vector.multi_reduction <maximumf>, %66, %cst_57 [1] : vector<128x128xf32> to vector<128xf32>
    %68 = vector.shape_cast %67 : vector<128xf32> to vector<128x1xf32>
    %69 = vector.broadcast %68 : vector<128x1xf32> to vector<128x128xf32>
    %70 = arith.subf %66, %69 : vector<128x128xf32>
    %71 = math.exp %70 : vector<128x128xf32>
    %cst_58 = arith.constant dense<0.000000e+00> : vector<128xf32>
    %72 = vector.multi_reduction <add>, %71, %cst_58 [1] : vector<128x128xf32> to vector<128xf32>
    %73 = vector.shape_cast %72 : vector<128xf32> to vector<128x1xf32>
    %74 = tpu.reciprocal %73 {approx = true} : vector<128x1xf32> -> vector<128x1xf32>
    %75 = vector.broadcast %74 : vector<128x1xf32> to vector<128x128xf32>
    %76 = arith.mulf %71, %75 : vector<128x128xf32>
    %77 = arith.truncf %76 : vector<128x128xf32> to vector<128x128xbf16>
    %cst_59 = arith.constant dense<0.000000e+00> : vector<128x32xf32>
    %78 = tpu.matmul %77, %65, %cst_59 {dimension_numbers = #tpu.dot_dimension_numbers<[1], [0], [0], [1], [0, 0, 1, 1], [], []>} : vector<128x128xbf16>, vector<128x32xbf16>, vector<128x32xf32> -> vector<128x32xf32>
    %79 = arith.truncf %78 : vector<128x32xf32> to vector<128x32xbf16>
    %c0_60 = arith.constant 0 : index
    %c64_61 = arith.constant 64 : index
    %80 = vector.load %arg16[%c0_60, %c64_61] : memref<128x128xbf16, #tpu.memory_space<vmem>>, vector<128x32xbf16>
    tpu.vector_store %arg16[%c0_60, %c64_61], %79 {strides = array<i32>} : memref<128x128xbf16, #tpu.memory_space<vmem>>, vector<128x32xbf16>,
    %c0_62 = arith.constant 0 : index
    %c96 = arith.constant 96 : index
    %81 = vector.load %arg13[%c0_62, %c96] : memref<128x128xbf16, #tpu.memory_space<vmem>>, vector<128x32xbf16>
    %c0_63 = arith.constant 0 : index
    %c96_64 = arith.constant 96 : index
    %82 = vector.load %arg14[%c0_63, %c96_64] : memref<128x128xbf16, #tpu.memory_space<vmem>>, vector<128x32xbf16>
    %c0_65 = arith.constant 0 : index
    %c96_66 = arith.constant 96 : index
    %83 = vector.load %arg15[%c0_65, %c96_66] : memref<128x128xbf16, #tpu.memory_space<vmem>>, vector<128x32xbf16>
    %cst_67 = arith.constant dense<0.000000e+00> : vector<128x128xf32>
    %84 = tpu.matmul %81, %82, %cst_67 {dimension_numbers = #tpu.dot_dimension_numbers<[1], [1], [0], [0], [0, 0, 1, 0], [], []>} : vector<128x32xbf16>, vector<128x32xbf16>, vector<128x128xf32> -> vector<128x128xf32>
    %cst_68 = arith.constant dense<0xFF800000> : vector<128xf32>
    %85 = vector.multi_reduction <maximumf>, %84, %cst_68 [1] : vector<128x128xf32> to vector<128xf32>
    %86 = vector.shape_cast %85 : vector<128xf32> to vector<128x1xf32>
    %87 = vector.broadcast %86 : vector<128x1xf32> to vector<128x128xf32>
    %88 = arith.subf %84, %87 : vector<128x128xf32>
    %89 = math.exp %88 : vector<128x128xf32>
    %cst_69 = arith.constant dense<0.000000e+00> : vector<128xf32>
    %90 = vector.multi_reduction <add>, %89, %cst_69 [1] : vector<128x128xf32> to vector<128xf32>
    %91 = vector.shape_cast %90 : vector<128xf32> to vector<128x1xf32>
    %92 = tpu.reciprocal %91 {approx = true} : vector<128x1xf32> -> vector<128x1xf32>
    %93 = vector.broadcast %92 : vector<128x1xf32> to vector<128x128xf32>
    %94 = arith.mulf %89, %93 : vector<128x128xf32>
    %95 = arith.truncf %94 : vector<128x128xf32> to vector<128x128xbf16>
    %cst_70 = arith.constant dense<0.000000e+00> : vector<128x32xf32>
    %96 = tpu.matmul %95, %83, %cst_70 {dimension_numbers = #tpu.dot_dimension_numbers<[1], [0], [0], [1], [0, 0, 1, 1], [], []>} : vector<128x128xbf16>, vector<128x32xbf16>, vector<128x32xf32> -> vector<128x32xf32>
    %97 = arith.truncf %96 : vector<128x32xf32> to vector<128x32xbf16>
    %c0_71 = arith.constant 0 : index
    %c96_72 = arith.constant 96 : index
    %98 = vector.load %arg16[%c0_71, %c96_72] : memref<128x128xbf16, #tpu.memory_space<vmem>>, vector<128x32xbf16>
    tpu.vector_store %arg16[%c0_71, %c96_72], %97 {strides = array<i32>} : memref<128x128xbf16, #tpu.memory_space<vmem>>, vector<128x32xbf16>,
    %c0_73 = arith.constant 0 : index
    %c0_74 = arith.constant 0 : index
    %99 = vector.load %arg16[%c0_73, %c0_74] : memref<128x128xbf16, #tpu.memory_space<vmem>>, vector<128x128xbf16>
    %c0_75 = arith.constant 0 : index
    %c0_76 = arith.constant 0 : index
    %100 = vector.load %arg10[%c0_75, %c0_76] : memref<128x128xbf16, #tpu.memory_space<vmem>>, vector<128x128xbf16>
    %cst_77 = arith.constant dense<0.000000e+00> : vector<128x128xf32>
    %101 = tpu.matmul %99, %100, %cst_77 {dimension_numbers = #tpu.dot_dimension_numbers<[1], [0], [0], [1], [0, 0, 1, 1], [], []>} : vector<128x128xbf16>, vector<128x128xbf16>, vector<128x128xf32> -> vector<128x128xf32>
    %c0_78 = arith.constant 0 : index
    %c0_79 = arith.constant 0 : index
    %102 = vector.load %arg11[%c0_78, %c0_79] : memref<1x128xf32, #tpu.memory_space<vmem>>, vector<1x128xf32>
    %103 = vector.broadcast %102 : vector<1x128xf32> to vector<128x128xf32>
    %104 = arith.addf %101, %103 : vector<128x128xf32>
    %c0_80 = arith.constant 0 : index
    %c0_81 = arith.constant 0 : index
    %c0_82 = arith.constant 0 : index
    %105 = vector.load %arg12[%c0_80, %c0_81, %c0_82] : memref<1x128x128xf32, #tpu.memory_space<vmem>>, vector<1x128x128xf32>
    %106 = vector.shape_cast %105 : vector<1x128x128xf32> to vector<128x128xf32>
    %107 = vector.shape_cast %104 : vector<128x128xf32> to vector<1x128x128xf32>
    tpu.vector_store %arg12[%c0_80, %c0_81, %c0_82], %107 {strides = array<i32>} : memref<1x128x128xf32, #tpu.memory_space<vmem>>, vector<1x128x128xf32>,
    return
  }
  func.func @transform_0(%arg0: i32) -> (i32, i32, i32) {
    %c0_i32 = arith.constant 0 : i32
    %c0_i32_0 = arith.constant 0 : i32
    %c0_i32_1 = arith.constant 0 : i32
    return %arg0, %c0_i32, %c0_i32_0 : i32, i32, i32
  }
  func.func @transform_1(%arg0: i32) -> (i32, i32, i32) {
    %c0_i32 = arith.constant 0 : i32
    %c0_i32_0 = arith.constant 0 : i32
    %c0_i32_1 = arith.constant 0 : i32
    return %arg0, %c0_i32, %c0_i32_0 : i32, i32, i32
  }
  func.func @transform_2(%arg0: i32) -> (i32, i32, i32) {
    %c0_i32 = arith.constant 0 : i32
    %c0_i32_0 = arith.constant 0 : i32
    %c0_i32_1 = arith.constant 0 : i32
    return %arg0, %c0_i32, %c0_i32_0 : i32, i32, i32
  }
  func.func @transform_3(%arg0: i32) -> (i32, i32) {
    %c0_i32 = arith.constant 0 : i32
    %c0_i32_0 = arith.constant 0 : i32
    %c0_i32_1 = arith.constant 0 : i32
    return %c0_i32, %c0_i32_0 : i32, i32
  }
  func.func @transform_4(%arg0: i32) -> (i32, i32) {
    %c0_i32 = arith.constant 0 : i32
    %c0_i32_0 = arith.constant 0 : i32
    %c0_i32_1 = arith.constant 0 : i32
    return %c0_i32, %c0_i32_0 : i32, i32
  }
  func.func @transform_5(%arg0: i32) -> (i32, i32) {
    %c0_i32 = arith.constant 0 : i32
    %c0_i32_0 = arith.constant 0 : i32
    %c0_i32_1 = arith.constant 0 : i32
    return %c0_i32, %c0_i32_0 : i32, i32
  }
  func.func @transform_6(%arg0: i32) -> (i32, i32) {
    %c0_i32 = arith.constant 0 : i32
    %c0_i32_0 = arith.constant 0 : i32
    %c0_i32_1 = arith.constant 0 : i32
    return %c0_i32, %c0_i32_0 : i32, i32
  }
  func.func @transform_7(%arg0: i32) -> (i32, i32) {
    %c0_i32 = arith.constant 0 : i32
    %c0_i32_0 = arith.constant 0 : i32
    %c0_i32_1 = arith.constant 0 : i32
    return %c0_i32, %c0_i32_0 : i32, i32
  }
  func.func @transform_8(%arg0: i32) -> (i32, i32) {
    %c0_i32 = arith.constant 0 : i32
    %c0_i32_0 = arith.constant 0 : i32
    %c0_i32_1 = arith.constant 0 : i32
    return %c0_i32, %c0_i32_0 : i32, i32
  }
  func.func @transform_9(%arg0: i32) -> (i32, i32) {
    %c0_i32 = arith.constant 0 : i32
    %c0_i32_0 = arith.constant 0 : i32
    %c0_i32_1 = arith.constant 0 : i32
    return %c0_i32, %c0_i32_0 : i32, i32
  }
  func.func @transform_10(%arg0: i32) -> (i32, i32) {
    %c0_i32 = arith.constant 0 : i32
    %c0_i32_0 = arith.constant 0 : i32
    %c0_i32_1 = arith.constant 0 : i32
    return %c0_i32, %c0_i32_0 : i32, i32
  }
  func.func @transform_11(%arg0: i32) -> (i32, i32, i32) {
    %c0_i32 = arith.constant 0 : i32
    %c0_i32_0 = arith.constant 0 : i32
    %c0_i32_1 = arith.constant 0 : i32
    return %arg0, %c0_i32, %c0_i32_0 : i32, i32, i32
  }
}

</mosaic_0001>

<bundles_post_ra>
// kernel: multi_headed_attention.1
= control target key start
LH: loop header
LB: loop body
LE: loop exit
PB: predicated region body
PF: predicated region fallthrough
CT: control target
= control target key end

     0   :  { %s5049_s17 = smov 0   ;;  %s6396_s0 = inlined_call_operand.vmem [shape: bf16[2,128,128], index: 0, kind: input, shape index: {}]   ;;  %s6397_s1 = inlined_call_operand.vmem [shape: bf16[2,128,128], index: 1, kind: input, shape index: {}]   ;;  %s6398_s2 = inlined_call_operand.vmem [shape: bf16[2,128,128], index: 2, kind: input, shape index: {}]   ;;  %s6399_s3 = inlined_call_operand.vmem [shape: bf16[128,128], index: 3, kind: input, shape index: {}]   ;;  %s6400_s4 = inlined_call_operand.vmem [shape: bf16[128,128], index: 4, kind: input, shape index: {}, may-alias: {4,5}]   ;;  %s6401_s5 = inlined_call_operand.vmem [shape: bf16[128,128], index: 5, kind: input, shape index: {}, may-alias: {4,5}]   ;;  %s6402_s6 = inlined_call_operand.vmem [shape: f32[1,128], index: 6, kind: input, shape index: {}]   ;;  %s6403_s7 = inlined_call_operand.vmem [shape: f32[1,128], index: 7, kind: input, shape index: {}, may-alias: {7,8}]   ;;  %s6404_s8 = inlined_call_operand.vmem [shape: f32[1,128], index: 8, kind: input, shape index: {}, may-alias: {7,8}]   ;;  %s6405_s9 = inlined_call_operand.vmem [shape: bf16[128,128], index: 9, kind: input, shape index: {}]   ;;  %s6406_s10 = inlined_call_operand.vmem [shape: f32[1,128], index: 10, kind: input, shape index: {}]   ;;  %s6407_s11 = inlined_call_operand.vmem [shape: f32[2,128,128], index: 11, kind: output, shape index: {}]  }
   0x1 LB: > { %s3707_s18 = sadd.s32 4294967295, %s4984_s17   ;;  %p3711_p0 = scmp.ge.s32.totalorder %s4984_s17, 1  ;;  %s4984_s17 = sphi %s5049_s17, %s21_s17  }
   0x2   : > { %p357_p1 = scmp.lt.s32.totalorder %s4984_s17, 3 }
   0x4   : > { %p358_p2 = pnand %p3711_p0, %p357_p1 }
   0x6   : > { %361 = sbr.rel (%p358_p2) target bundleno = 1818 (0x71a), region = 64 }
   0xb   : > { %v4413_v0 = vld [vmem:[%s6399_s3 + $0x38] sm:$0xff]  ;;  %v4412_v3 = vld [vmem:[%s6399_s3 + $0x30] sm:$0xff]  ;;  %v4411_v6 = vld [vmem:[%s6399_s3 + $0x28] sm:$0xff]  ;;  %p407_p3 = scmp.lt.s32.totalorder %s3707_s18, 1  ;;  %s4986_s13 = smov 96   ;;  %vm1194_vm0 = vcmask 261120  }
   0xc   : > { %v4429_v1 = vld [vmem:[%s6400_s4 + $0x38] sm:$0xff]  ;;  %559 = vmatpush.bf16.msra.mxu0 %v4413_v0  ;;  %v4428_v4 = vld [vmem:[%s6400_s4 + $0x30] sm:$0xff]  ;;  %v4427_v7 = vld [vmem:[%s6400_s4 + $0x28] sm:$0xff]  ;;  %s4987_s14 = smov 64   ;;  %vm1557_vm1 = vcmask 257024   ;;  %vm2176_vm2 = vcmask 519424  }
   0xd   : > { %v4445_v2 = vld [vmem:[%s6401_s5 + $0x38] sm:$0xff]  ;;  %772 = vmatpush.bf16.msra.mxu1 %v4429_v1  ;;  %v4444_v5 = vld [vmem:[%s6401_s5 + $0x30] sm:$0xff]  ;;  %v4443_v8 = vld [vmem:[%s6401_s5 + $0x28] sm:$0xff]  ;;  %s6418_s18 = smov (!%p407_p3, %s3707_s18), 1  ;;  %vm2795_vm3 = vcmask 781824   ;;  %vm3414_vm4 = vcmask 1044224  }
   0xe   : > { %985 = vmatpush.bf16.msra.mxu2 %v4445_v2  ;;  %v4410_v9 = vld [vmem:[%s6399_s3 + $0x20] sm:$0xff]  ;;  %v4409_v12 = vld [vmem:[%s6399_s3 + $0x18] sm:$0xff]  ;;  %v4408_v15 = vld [vmem:[%s6399_s3 + $0x10] sm:$0xff]  ;;  %s4394_s27 = sshll.u32 %s6418_s18, 6 }
   0xf   : > { %v4426_v10 = vld [vmem:[%s6400_s4 + $0x20] sm:$0xff]  ;;  %v4425_v13 = vld [vmem:[%s6400_s4 + $0x18] sm:$0xff]  ;;  %v4424_v16 = vld [vmem:[%s6400_s4 + $0x10] sm:$0xff]  ;;  %s5136_s15 = scalar_lea.vmem %s6396_s0, %s4394_s27  ;;  %s5141_s20 = scalar_lea.vmem %s6397_s1, %s4394_s27 }
  0x10   : > { %560 = vmatpush.bf16.msra.mxu0 %v4412_v3  ;;  %v4442_v11 = vld [vmem:[%s6401_s5 + $0x20] sm:$0xff]  ;;  %v4441_v14 = vld [vmem:[%s6401_s5 + $0x18] sm:$0xff]  ;;  %v4440_v17 = vld [vmem:[%s6401_s5 + $0x10] sm:$0xff]  ;;  %s5149_s25 = scalar_lea.vmem %s6398_s2, %s4394_s27 }
  0x11   : > { %773 = vmatpush.bf16.msra.mxu1 %v4428_v4  ;;  %v4407_v18 = vld [vmem:[%s6399_s3 + $0x8] sm:$0xff]  ;;  %v4406_v21 = vld [vmem:[%s6399_s3] sm:$0xff]  ;;  %v4400_v30 = vld [vmem:[%s5136_s15 + $0x10] sm:$0xff] }
  0x12   : > { %986 = vmatpush.bf16.msra.mxu2 %v4444_v5  ;;  %v4423_v19 = vld [vmem:[%s6400_s4 + $0x8] sm:$0xff]  ;;  %v4422_v22 = vld [vmem:[%s6400_s4] sm:$0xff]  ;;  %v4416_v31 = vld [vmem:[%s5141_s20 + $0x10] sm:$0xff] }
  0x13   : > { %v4439_v20 = vld [vmem:[%s6401_s5 + $0x8] sm:$0xff]  ;;  %v4438_v23 = vld [vmem:[%s6401_s5] sm:$0xff]  ;;  %v4432_v32 = vld [vmem:[%s5149_s25 + $0x10] sm:$0xff] }
  0x14   : > { %561 = vmatpush.bf16.msra.mxu0 %v4411_v6  ;;  %v4398_v24 = vld [vmem:[%s5136_s15] sm:$0xff]  ;;  %v4399_v27 = vld [vmem:[%s5136_s15 + $0x8] sm:$0xff]  ;;  %v4401_v33 = vld [vmem:[%s5136_s15 + $0x18] sm:$0xff] }
  0x15   : > { %774 = vmatpush.bf16.msra.mxu1 %v4427_v7  ;;  %v4414_v25 = vld [vmem:[%s5141_s20] sm:$0xff]  ;;  %v4415_v28 = vld [vmem:[%s5141_s20 + $0x8] sm:$0xff]  ;;  %v4417_v34 = vld [vmem:[%s5141_s20 + $0x18] sm:$0xff] }
  0x16   : > { %987 = vmatpush.bf16.msra.mxu2 %v4443_v8  ;;  %v4430_v26 = vld [vmem:[%s5149_s25] sm:$0xff]  ;;  %v4431_v29 = vld [vmem:[%s5149_s25 + $0x8] sm:$0xff]  ;;  %v4433_v35 = vld [vmem:[%s5149_s25 + $0x18] sm:$0xff] }
  0x17   : > { %v4402_v36 = vld [vmem:[%s5136_s15 + $0x20] sm:$0xff]  ;;  %v4403_v39 = vld [vmem:[%s5136_s15 + $0x28] sm:$0xff]  ;;  %v4404_v42 = vld [vmem:[%s5136_s15 + $0x30] sm:$0xff] }
  0x18   : > { %562 = vmatpush.bf16.msra.mxu0 %v4410_v9  ;;  %v4418_v37 = vld [vmem:[%s5141_s20 + $0x20] sm:$0xff]  ;;  %v4419_v40 = vld [vmem:[%s5141_s20 + $0x28] sm:$0xff]  ;;  %v4420_v43 = vld [vmem:[%s5141_s20 + $0x30] sm:$0xff] }
  0x19   : > { %775 = vmatpush.bf16.msra.mxu1 %v4426_v10  ;;  %v4434_v38 = vld [vmem:[%s5149_s25 + $0x20] sm:$0xff]  ;;  %v4435_v41 = vld [vmem:[%s5149_s25 + $0x28] sm:$0xff]  ;;  %v4436_v44 = vld [vmem:[%s5149_s25 + $0x30] sm:$0xff] }
  0x1a   : > { %988 = vmatpush.bf16.msra.mxu2 %v4442_v11  ;;  %v4421_v45 = vld [vmem:[%s5141_s20 + $0x38] sm:$0xff]  ;;  %v5177_v49 = vld [vmem:[%s6402_s6] ss:$0 sm:$0xff] }
  0x1b   : > { %v4437_v46 = vld [vmem:[%s5149_s25 + $0x38] sm:$0xff]  ;;  %v5182_v50 = vld [vmem:[%s6403_s7] ss:$0 sm:$0xff] }
  0x1c   : > { %563 = vmatpush.bf16.msra.mxu0 %v4409_v12  ;;  %v5191_v58 = vld [vmem:[%s6404_s8] ss:$0 sm:$0xff]  ;;  %v4405_v3 = vld [vmem:[%s5136_s15 + $0x38] sm:$0xff]  ;;  %s4988_s15 = smov 32  }
  0x1d   : > { %776 = vmatpush.bf16.msra.mxu1 %v4425_v13 }
  0x1e   : > { %989 = vmatpush.bf16.msra.mxu2 %v4441_v14 }
  0x20   : > { %564 = vmatpush.bf16.msra.mxu0 %v4408_v15 }
  0x21   : > { %777 = vmatpush.bf16.msra.mxu1 %v4424_v16 }
  0x22   : > { %990 = vmatpush.bf16.msra.mxu2 %v4440_v17 }
  0x24   : > { %565 = vmatpush.bf16.msra.mxu0 %v4407_v18 }
  0x25   : > { %778 = vmatpush.bf16.msra.mxu1 %v4423_v19 }
  0x26   : > { %991 = vmatpush.bf16.msra.mxu2 %v4439_v20 }
  0x28   : > { %566 = vmatpush.bf16.msra.mxu0 %v4406_v21 }
  0x29   : > { %779 = vmatpush.bf16.msra.mxu1 %v4422_v22 }
  0x2a   : > { %992 = vmatpush.bf16.msra.mxu2 %v4438_v23 }
  0x2b   : > { %567 = vmatmul.bf16.vlgmr.msra.gmra.mxu0 %v4398_v24 }
  0x2c   : > { %780 = vmatmul.bf16.vlgmr.msra.gmra.mxu1 %v4414_v25 }
  0x2d   : > { %993 = vmatmul.bf16.vlgmr.msra.gmra.mxu2 %v4430_v26 }
  0x3b   : > { %572 = vmatmul.bf16.gmra.mxu0 %v4399_v27 }
  0x3c   : > { %785 = vmatmul.bf16.gmra.mxu1 %v4415_v28 }
  0x3d   : > { %998 = vmatmul.bf16.gmra.mxu2 %v4431_v29 }
  0x4b   : > { %577 = vmatmul.bf16.gmra.mxu0 %v4400_v30 }
  0x4c   : > { %790 = vmatmul.bf16.gmra.mxu1 %v4416_v31 }
  0x4d   : > { %1003 = vmatmul.bf16.gmra.mxu2 %v4432_v32 }
  0x5b   : > { %582 = vmatmul.bf16.gmra.mxu0 %v4401_v33 }
  0x5c   : > { %795 = vmatmul.bf16.gmra.mxu1 %v4417_v34 }
  0x5d   : > { %1008 = vmatmul.bf16.gmra.mxu2 %v4433_v35 }
  0x6b   : > { %587 = vmatmul.bf16.gmra.mxu0 %v4402_v36 }
  0x6c   : > { %800 = vmatmul.bf16.gmra.mxu1 %v4418_v37 }
  0x6d   : > { %1013 = vmatmul.bf16.gmra.mxu2 %v4434_v38 }
  0x7b   : > { %592 = vmatmul.bf16.gmra.mxu0 %v4403_v39 }
  0x7c   : > { %805 = vmatmul.bf16.gmra.mxu1 %v4419_v40 }
  0x7d   : > { %1018 = vmatmul.bf16.gmra.mxu2 %v4435_v41 }
  0x8b   : > { %597 = vmatmul.bf16.gmra.mxu0 %v4404_v42 }
  0x8c   : > { %810 = vmatmul.bf16.gmra.mxu1 %v4420_v43 }
  0x8d   : > { %1023 = vmatmul.bf16.gmra.mxu2 %v4436_v44 }
  0x9b   : > { %602 = vmatmul.bf16.gmra.mxu0 %v4405_v3 }
  0x9c   : > { %815 = vmatmul.bf16.gmra.mxu1 %v4421_v45 }
  0x9d   : > { %1028 = vmatmul.bf16.gmra.mxu2 %v4437_v46 }
  0xa8   : > { %v568_v47 = vpop.f32.mrf.mxu0 }
  0xa9   : > { %v781_v48 = vpop.f32.mrf.mxu1  ;;  %v569_v51 = vadd.f32 %v5177_v49, %v568_v47 }
  0xaa   : > { %v782_v55 = vadd.f32 %v5182_v50, %v781_v48 }
  0xb0   : > { %v994_v52 = vpop.f32.mrf.mxu2  ;;  %v570_v53 = vpop.f32.mrf.mxu0 }
  0xb1   : > { %v783_v54 = vpop.f32.mrf.mxu1  ;;  %v571_v56 = vadd.f32 %v5177_v49, %v570_v53  ;;  %v995_v61 = vadd.f32 %v5191_v58, %v994_v52 }
  0xb2   : > { %v784_v57 = vadd.f32 %v5182_v50, %v783_v54 }
  0xb3   : > { %v4561_v59 = vpack.c.bf16 %v571_v56, %v569_v51 }
  0xb4   : > { %v4601_v60 = vpack.c.bf16 %v784_v57, %v782_v55 }
  0xb5   : > { %4562 = vst [vmem:[#allocation2 + $0x30] sm:$0xff] %v4561_v59  }
  0xb6   : > { %4602 = vst [vmem:[#allocation3] sm:$0xff] %v4601_v60  }
  0xb8   : > { %v996_v62 = vpop.f32.mrf.mxu2  ;;  %v573_v0 = vpop.f32.mrf.mxu0 }
  0xb9   : > { %v997_v63 = vadd.f32 %v5191_v58, %v996_v62  ;;  %v786_v1 = vpop.f32.mrf.mxu1  ;;  %v574_v7 = vadd.f32 %v5177_v49, %v573_v0 }
  0xba   : > { %v787_v11 = vadd.f32 %v5182_v50, %v786_v1 }
  0xbb   : > { %v4641_v2 = vpack.c.bf16 %v997_v63, %v995_v61 }
  0xbc   : > { %v4470_v4 = vld [vmem:[#allocation2 + $0x30] sm:$0xff] }
  0xbd   : > { %4642 = vst [vmem:[#allocation4 + $0x28] sm:$0xff] %v4641_v2   ;;  %v4502_v5 = vld [vmem:[#allocation3] sm:$0xff]  ;;  %1662 = vrot.lane.b32.xlu2 %v4470_v4, %s4986_s13  ;;  %v4494_v16 = vld [vmem:[#allocation2 + $0x30] sm:$0xff] }
  0xbe   : > { %v4478_v6 = vld [vmem:[#allocation3] sm:$0xff]  ;;  %2337 = vrot.lane.b32.xlu0 %v4502_v5, %s4987_s14  ;;  %v4518_v18 = vld [vmem:[#allocation2 + $0x30] sm:$0xff] }
  0xbf   : > { %1718 = vrot.lane.b32.xlu1 %v4478_v6, %s4986_s13  ;;  %v4526_v17 = vld [vmem:[#allocation3] sm:$0xff] }
  0xc0   : > { %v999_v8 = vpop.f32.mrf.mxu2  ;;  %v575_v9 = vpop.f32.mrf.mxu0 }
  0xc1   : > { %v788_v10 = vpop.f32.mrf.mxu1  ;;  %v576_v12 = vadd.f32 %v5177_v49, %v575_v9  ;;  %v1000_v19 = vadd.f32 %v5191_v58, %v999_v8 }
  0xc2   : > { %v789_v13 = vadd.f32 %v5182_v50, %v788_v10 }
  0xc3   : > { %v4566_v14 = vpack.c.bf16 %v576_v12, %v574_v7 }
  0xc4   : > { %v4606_v15 = vpack.c.bf16 %v789_v13, %v787_v11 }
  0xc5   : > { %4678 = vst [vmem:[#allocation2] sm:$0xff] %v4566_v14   ;;  %2281 = vrot.lane.b32.xlu2 %v4494_v16, %s4987_s14 }
  0xc6   : > { %4685 = vst [vmem:[#allocation3 + $0x18] sm:$0xff] %v4606_v15   ;;  %2900 = vrot.lane.b32.xlu0 %v4518_v18, %s4988_s15 }
  0xc7   : > { %2956 = vrot.lane.b32.xlu1 %v4526_v17, %s4988_s15 }
  0xc8   : > { %v1001_v20 = vpop.f32.mrf.mxu2  ;;  %v578_v22 = vpop.f32.mrf.mxu0 }
  0xc9   : > { %v1002_v21 = vadd.f32 %v5191_v58, %v1001_v20  ;;  %v791_v23 = vpop.f32.mrf.mxu1  ;;  %v579_v28 = vadd.f32 %v5177_v49, %v578_v22 }
  0xca   : > { %v792_v32 = vadd.f32 %v5182_v50, %v791_v23 }
  0xcb   : > { %v4646_v24 = vpack.c.bf16 %v1002_v21, %v1000_v19 }
  0xcc   : > { %v4495_v25 = vld [vmem:[#allocation2] sm:$0xff] }
  0xcd   : > { %4692 = vst [vmem:[#allocation4 + $0x20] sm:$0xff] %v4646_v24   ;;  %v4479_v26 = vld [vmem:[#allocation3 + $0x18] sm:$0xff]  ;;  %v4471_v37 = vld [vmem:[#allocation2] sm:$0xff] }
  0xce   : > { %v4527_v27 = vld [vmem:[#allocation3 + $0x18] sm:$0xff]  ;;  %1720 = vrot.lane.b32.xlu0 %v4479_v26, %s4986_s13  ;;  %v4519_v39 = vld [vmem:[#allocation2] sm:$0xff] }
  0xcf   : > { %2283 = vrot.lane.b32.xlu1 %v4495_v25, %s4987_s14  ;;  %2958 = vrot.lane.b32.xlu2 %v4527_v27, %s4988_s15  ;;  %v4503_v46 = vld [vmem:[#allocation3 + $0x18] sm:$0xff] }
  0xd0   : > { %v1004_v29 = vpop.f32.mrf.mxu2  ;;  %v580_v30 = vpop.f32.mrf.mxu0 }
  0xd1   : > { %v793_v31 = vpop.f32.mrf.mxu1  ;;  %v581_v33 = vadd.f32 %v5177_v49, %v580_v30  ;;  %v1005_v38 = vadd.f32 %v5191_v58, %v1004_v29 }
  0xd2   : > { %v794_v34 = vadd.f32 %v5182_v50, %v793_v31 }
  0xd3   : > { %v4571_v35 = vpack.c.bf16 %v581_v33, %v579_v28 }
  0xd4   : > { %v4611_v36 = vpack.c.bf16 %v794_v34, %v792_v32 }
  0xd5   : > { %4679 = vst [vmem:[#allocation2 + $0x18] sm:$0xff] %v4571_v35  }
  0xd6   : > { %4686 = vst [vmem:[#allocation3 + $0x10] sm:$0xff] %v4611_v36   ;;  %1664 = vrot.lane.b32.xlu0 %v4471_v37, %s4986_s13 }
  0xd7   : > { %2902 = vrot.lane.b32.xlu2 %v4519_v39, %s4988_s15 }
  0xd8   : > { %v1006_v40 = vpop.f32.mrf.mxu2  ;;  %v583_v42 = vpop.f32.mrf.mxu0 }
  0xd9   : > { %v1007_v41 = vadd.f32 %v5191_v58, %v1006_v40  ;;  %v796_v43 = vpop.f32.mrf.mxu1  ;;  %v584_v48 = vadd.f32 %v5177_v49, %v583_v42 }
  0xda   : > { %v797_v54 = vadd.f32 %v5182_v50, %v796_v43 }
  0xdb   : > { %v4651_v44 = vpack.c.bf16 %v1007_v41, %v1005_v38 }
  0xdc   : > { %v4472_v45 = vld [vmem:[#allocation2 + $0x18] sm:$0xff] }
  0xdd   : > { %4693 = vst [vmem:[#allocation4 + $0x38] sm:$0xff] %v4651_v44   ;;  %v4480_v47 = vld [vmem:[#allocation3 + $0x10] sm:$0xff]  ;;  %1666 = vrot.lane.b32.xlu1 %v4472_v45, %s4986_s13 }
  0xde   : > { %2339 = vrot.lane.b32.xlu0 %v4503_v46, %s4987_s14  ;;  %v4504_v60 = vld [vmem:[#allocation3 + $0x10] sm:$0xff] }
  0xdf   : > { %1722 = vrot.lane.b32.xlu2 %v4480_v47, %s4986_s13  ;;  %v4528_v62 = vld [vmem:[#allocation3 + $0x10] sm:$0xff] }
  0xe0   : > { %v1009_v51 = vpop.f32.mrf.mxu2  ;;  %v585_v52 = vpop.f32.mrf.mxu0 }
  0xe1   : > { %v798_v53 = vpop.f32.mrf.mxu1  ;;  %v586_v55 = vadd.f32 %v5177_v49, %v585_v52  ;;  %v1010_v61 = vadd.f32 %v5191_v58, %v1009_v51 }
  0xe2   : > { %v799_v56 = vadd.f32 %v5182_v50, %v798_v53 }
  0xe3   : > { %v4576_v57 = vpack.c.bf16 %v586_v55, %v584_v48 }
  0xe4   : > { %v4616_v59 = vpack.c.bf16 %v799_v56, %v797_v54 }
  0xe5   : > { %4680 = vst [vmem:[#allocation2 + $0x10] sm:$0xff] %v4576_v57   ;;  %2341 = vrot.lane.b32.xlu1 %v4504_v60, %s4987_s14 }
  0xe6   : > { %4687 = vst [vmem:[#allocation3 + $0x20] sm:$0xff] %v4616_v59  }
  0xe7   : > { %2960 = vrot.lane.b32.xlu2 %v4528_v62, %s4988_s15 }
  0xe8   : > { %v1011_v63 = vpop.f32.mrf.mxu2  ;;  %v588_v1 = vpop.f32.mrf.mxu0 }
  0xe9   : > { %v1012_v0 = vadd.f32 %v5191_v58, %v1011_v63  ;;  %v801_v2 = vpop.f32.mrf.mxu1  ;;  %v589_v7 = vadd.f32 %v5177_v49, %v588_v1 }
  0xea   : > { %v802_v11 = vadd.f32 %v5182_v50, %v801_v2 }
  0xeb   : > { %v4656_v3 = vpack.c.bf16 %v1012_v0, %v1010_v61 }
  0xec   : > { %v4473_v17 = vld [vmem:[#allocation2 + $0x10] sm:$0xff] }
  0xed   : > { %4694 = vst [vmem:[#allocation4 + $0x10] sm:$0xff] %v4656_v3   ;;  %v4505_v4 = vld [vmem:[#allocation3 + $0x20] sm:$0xff] }
  0xee   : > { %v4529_v5 = vld [vmem:[#allocation3 + $0x20] sm:$0xff]  ;;  %2343 = vrot.lane.b32.xlu1 %v4505_v4, %s4987_s14 }
  0xef   : > { %v4481_v6 = vld [vmem:[#allocation3 + $0x20] sm:$0xff]  ;;  %2962 = vrot.lane.b32.xlu0 %v4529_v5, %s4988_s15 }
  0xf0   : > { %v1014_v8 = vpop.f32.mrf.mxu2  ;;  %1724 = vrot.lane.b32.xlu2 %v4481_v6, %s4986_s13  ;;  %v590_v9 = vpop.f32.mrf.mxu0 }
  0xf1   : > { %v803_v10 = vpop.f32.mrf.mxu1  ;;  %v591_v12 = vadd.f32 %v5177_v49, %v590_v9  ;;  %v1015_v16 = vadd.f32 %v5191_v58, %v1014_v8  ;;  %v4520_v8 = vld [vmem:[#allocation2 + $0x18] sm:$0xff] }
  0xf2   : > { %v804_v13 = vadd.f32 %v5182_v50, %v803_v10 }
  0xf3   : > { %v4581_v14 = vpack.c.bf16 %v591_v12, %v589_v7  ;;  %v4497_v7 = vld [vmem:[#allocation2 + $0x10] sm:$0xff] }
  0xf4   : > { %v4621_v15 = vpack.c.bf16 %v804_v13, %v802_v11 }
  0xf5   : > { %4681 = vst [vmem:[#allocation2 + $0x8] sm:$0xff] %v4581_v14  }
  0xf6   : > { %4688 = vst [vmem:[#allocation3 + $0x28] sm:$0xff] %v4621_v15  }
  0xf8   : > { %v1016_v18 = vpop.f32.mrf.mxu2  ;;  %1668 = vrot.lane.b32.xlu2 %v4473_v17, %s4986_s13  ;;  %v593_v20 = vpop.f32.mrf.mxu0 }
  0xf9   : > { %v1017_v19 = vadd.f32 %v5191_v58, %v1016_v18  ;;  %v806_v21 = vpop.f32.mrf.mxu1  ;;  %v594_v26 = vadd.f32 %v5177_v49, %v593_v20 }
  0xfa   : > { %v807_v30 = vadd.f32 %v5182_v50, %v806_v21 }
  0xfb   : > { %v4661_v22 = vpack.c.bf16 %v1017_v19, %v1015_v16 }
  0xfc   : > { %v4474_v35 = vld [vmem:[#allocation2 + $0x8] sm:$0xff] }
  0xfd   : > { %4695 = vst [vmem:[#allocation4 + $0x8] sm:$0xff] %v4661_v22   ;;  %v4482_v23 = vld [vmem:[#allocation3 + $0x28] sm:$0xff] }
  0xfe   : > { %v4530_v24 = vld [vmem:[#allocation3 + $0x28] sm:$0xff]  ;;  %1726 = vrot.lane.b32.xlu1 %v4482_v23, %s4986_s13  ;;  %v4496_v23 = vld [vmem:[#allocation2 + $0x18] sm:$0xff] }
  0xff   : > { %v4506_v25 = vld [vmem:[#allocation3 + $0x28] sm:$0xff]  ;;  %2964 = vrot.lane.b32.xlu0 %v4530_v24, %s4988_s15 }
 0x100   : > { %v1019_v27 = vpop.f32.mrf.mxu2  ;;  %2345 = vrot.lane.b32.xlu2 %v4506_v25, %s4987_s14  ;;  %v595_v28 = vpop.f32.mrf.mxu0  ;;  %v4498_v17 = vld [vmem:[#allocation2 + $0x8] sm:$0xff] }
 0x101   : > { %v808_v29 = vpop.f32.mrf.mxu1  ;;  %v596_v31 = vadd.f32 %v5177_v49, %v595_v28  ;;  %v1020_v36 = vadd.f32 %v5191_v58, %v1019_v27 }
 0x102   : > { %v809_v32 = vadd.f32 %v5182_v50, %v808_v29 }
 0x103   : > { %v4586_v33 = vpack.c.bf16 %v596_v31, %v594_v26 }
 0x104   : > { %v4626_v34 = vpack.c.bf16 %v809_v32, %v807_v30 }
 0x105   : > { %4682 = vst [vmem:[#allocation2 + $0x20] sm:$0xff] %v4586_v33   ;;  %v4521_v33 = vld [vmem:[#allocation2 + $0x10] sm:$0xff] }
 0x106   : > { %4689 = vst [vmem:[#allocation3 + $0x8] sm:$0xff] %v4626_v34   ;;  %1670 = vrot.lane.b32.xlu1 %v4474_v35, %s4986_s13  ;;  %v4466_v35 = vld [vmem:[#allocation4 + $0x8] sm:$0xff] }
 0x108   : > { %v1021_v37 = vpop.f32.mrf.mxu2  ;;  %v598_v39 = vpop.f32.mrf.mxu0 }
 0x109   : > { %v1022_v38 = vadd.f32 %v5191_v58, %v1021_v37  ;;  %v811_v40 = vpop.f32.mrf.mxu1  ;;  %v599_v45 = vadd.f32 %v5177_v49, %v598_v39  ;;  %v4465_v39 = vld [vmem:[#allocation4 + $0x10] sm:$0xff] }
 0x10a   : > { %v812_v51 = vadd.f32 %v5182_v50, %v811_v40  ;;  %v4458_v40 = vld [vmem:[#allocation3 + $0x28] sm:$0xff] }
 0x10b   : > { %v4666_v41 = vpack.c.bf16 %v1022_v38, %v1020_v36 }
 0x10c   : > { %v4475_v42 = vld [vmem:[#allocation2 + $0x20] sm:$0xff] }
 0x10d   : > { %4696 = vst [vmem:[#allocation4 + $0x30] sm:$0xff] %v4666_v41   ;;  %v4483_v43 = vld [vmem:[#allocation3 + $0x8] sm:$0xff]  ;;  %1672 = vrot.lane.b32.xlu0 %v4475_v42, %s4986_s13  ;;  %v4499_v15 = vld [vmem:[#allocation2 + $0x20] sm:$0xff] }
 0x10e   : > { %v4507_v44 = vld [vmem:[#allocation3 + $0x8] sm:$0xff]  ;;  %1728 = vrot.lane.b32.xlu1 %v4483_v43, %s4986_s13  ;;  %v4523_v22 = vld [vmem:[#allocation2 + $0x20] sm:$0xff] }
 0x10f   : > { %2347 = vrot.lane.b32.xlu2 %v4507_v44, %s4987_s14  ;;  %v4531_v56 = vld [vmem:[#allocation3 + $0x8] sm:$0xff] }
 0x110   : > { %v1024_v46 = vpop.f32.mrf.mxu2  ;;  %v600_v47 = vpop.f32.mrf.mxu0  ;;  %v4459_v30 = vld [vmem:[#allocation3 + $0x8] sm:$0xff] }
 0x111   : > { %v813_v48 = vpop.f32.mrf.mxu1  ;;  %v601_v52 = vadd.f32 %v5177_v49, %v600_v47  ;;  %v1025_v57 = vadd.f32 %v5191_v58, %v1024_v46  ;;  %v1235_v34 = vsel %vm1194_vm0, %v4459_v30, 0  ;;  %v4486_v42 = vld [vmem:[#allocation4 + $0x28] sm:$0xff]  ;;  %v1232_v47 = vsel %vm1194_vm0, %v4458_v40, 0 }
 0x112   : > { %v814_v53 = vadd.f32 %v5182_v50, %v813_v48  ;;  %v4490_v43 = vld [vmem:[#allocation4 + $0x8] sm:$0xff]  ;;  %v4464_v48 = vld [vmem:[#allocation4 + $0x38] sm:$0xff] }
 0x113   : > { %v4591_v54 = vpack.c.bf16 %v601_v52, %v599_v45  ;;  %v4522_v44 = vld [vmem:[#allocation2 + $0x8] sm:$0xff]  ;;  %v4457_v52 = vld [vmem:[#allocation3 + $0x20] sm:$0xff] }
 0x114   : > { %v4631_v55 = vpack.c.bf16 %v814_v53, %v812_v51  ;;  %v4467_v29 = vld [vmem:[#allocation4 + $0x30] sm:$0xff] }
 0x115   : > { %4683 = vst [vmem:[#allocation2 + $0x28] sm:$0xff] %v4591_v54   ;;  %v4491_v32 = vld [vmem:[#allocation4 + $0x30] sm:$0xff] }
 0x116   : > { %4690 = vst [vmem:[#allocation3 + $0x30] sm:$0xff] %v4631_v55   ;;  %2966 = vrot.lane.b32.xlu1 %v4531_v56, %s4988_s15  ;;  %v4488_v55 = vld [vmem:[#allocation4 + $0x38] sm:$0xff] }
 0x117   : > { %v5269_v12 = vpop.permute.xlu2 %1662 }
 0x118   : > { %v1026_v59 = vpop.f32.mrf.mxu2  ;;  %v603_v28 = vpop.f32.mrf.mxu0 }
 0x119   : > { %v1027_v60 = vadd.f32 %v5191_v58, %v1026_v59  ;;  %v816_v61 = vpop.f32.mrf.mxu1  ;;  %v604_v36 = vadd.f32 %v5177_v49, %v603_v28  ;;  %v4462_v59 = vld [vmem:[#allocation4 + $0x28] sm:$0xff] }
 0x11a   : > { %v817_v4 = vadd.f32 %v5182_v50, %v816_v61 }
 0x11b   : > { %v4671_v62 = vpack.c.bf16 %v1027_v60, %v1025_v57  ;;  %v1229_v57 = vsel %vm1194_vm0, %v4457_v52, 0 }
 0x11c   : > { %v4476_v63 = vld [vmem:[#allocation2 + $0x28] sm:$0xff] }
 0x11d   : > { %4697 = vst [vmem:[#allocation4 + $0x18] sm:$0xff] %v4671_v62   ;;  %v4532_v0 = vld [vmem:[#allocation3 + $0x30] sm:$0xff]  ;;  %1674 = vrot.lane.b32.xlu2 %v4476_v63, %s4986_s13  ;;  %v4500_v20 = vld [vmem:[#allocation2 + $0x28] sm:$0xff] }
 0x11e   : > { %v4484_v1 = vld [vmem:[#allocation3 + $0x30] sm:$0xff]  ;;  %2968 = vrot.lane.b32.xlu1 %v4532_v0, %s4988_s15  ;;  %v4524_v27 = vld [vmem:[#allocation2 + $0x28] sm:$0xff] }
 0x11f   : > { %1730 = vrot.lane.b32.xlu0 %v4484_v1, %s4986_s13  ;;  %v4508_v9 = vld [vmem:[#allocation3 + $0x30] sm:$0xff]  ;;  %v5276_v19 = vpop.permute.xlu2 %2281 }
 0x120   : > { %v1029_v2 = vpop.f32.mrf.mxu2  ;;  %v4460_v21 = vld [vmem:[#allocation3 + $0x30] sm:$0xff]  ;;  %v605_v37 = vpop.f32.mrf.mxu0 }
 0x121   : > { %v818_v3 = vpop.f32.mrf.mxu1  ;;  %v1030_v10 = vadd.f32 %v5191_v58, %v1029_v2  ;;  %v1238_v25 = vsel %vm1194_vm0, %v4460_v21, 0  ;;  %v606_v41 = vadd.f32 %v5177_v49, %v605_v37  ;;  %v4463_v49 = vld [vmem:[#allocation4 + $0x20] sm:$0xff]  ;;  %v4456_v62 = vld [vmem:[#allocation3 + $0x10] sm:$0xff] }
 0x122   : > { %v819_v5 = vadd.f32 %v5182_v50, %v818_v3  ;;  %v4515_v1 = vld [vmem:[#allocation4 + $0x30] sm:$0xff]  ;;  %v1226_v3 = vsel %vm1194_vm0, %v4456_v62, 0 }
 0x123   : > { %v4596_v45 = vpack.c.bf16 %v606_v41, %v604_v36  ;;  %v4489_v2 = vld [vmem:[#allocation4 + $0x10] sm:$0xff] }
 0x124   : > { %v4636_v6 = vpack.c.bf16 %v819_v5, %v817_v4  ;;  %v4468_v24 = vld [vmem:[#allocation4 + $0x18] sm:$0xff] }
 0x125   : > { %2287 = vrot.lane.b32.xlu2 %v4497_v7, %s4987_s14  ;;  %4684 = vst [vmem:[#allocation2 + $0x38] sm:$0xff] %v4596_v45   ;;  %v4540_v53 = vld [vmem:[#allocation4 + $0x18] sm:$0xff] }
 0x126   : > { %4691 = vst [vmem:[#allocation3 + $0x38] sm:$0xff] %v4636_v6   ;;  %2904 = vrot.lane.b32.xlu1 %v4520_v8, %s4988_s15  ;;  %v4492_v56 = vld [vmem:[#allocation4 + $0x18] sm:$0xff]  ;;  %v4537_v8 = vld [vmem:[#allocation4 + $0x10] sm:$0xff] }
 0x127   : > { %2349 = vrot.lane.b32.xlu0 %v4508_v9, %s4987_s14  ;;  %v4516_v63 = vld [vmem:[#allocation4 + $0x18] sm:$0xff]  ;;  %v4487_v9 = vld [vmem:[#allocation4 + $0x20] sm:$0xff] }
 0x128   : > { %v1031_v11 = vpop.f32.mrf.mxu2  ;;  %v4455_v5 = vld [vmem:[#allocation3 + $0x18] sm:$0xff] }
 0x129   : > { %v1032_v13 = vadd.f32 %v5191_v58, %v1031_v11  ;;  %v5284_v31 = vpop.permute.xlu2 %2958  ;;  %v1223_v11 = vsel %vm1194_vm0, %v4455_v5, 0 }
 0x12b   : > { %v4676_v14 = vpack.c.bf16 %v1032_v13, %v1030_v10  ;;  %v4454_v13 = vld [vmem:[#allocation3] sm:$0xff] }
 0x12d   : > { %4698 = vst [vmem:[#allocation4] sm:$0xff] %v4676_v14   ;;  %v4485_v50 = vld [vmem:[#allocation3 + $0x38] sm:$0xff]  ;;  %2291 = vrot.lane.b32.xlu2 %v4499_v15, %s4987_s14  ;;  %v4539_v15 = vld [vmem:[#allocation4 + $0x30] sm:$0xff] }
 0x12e   : > { %v4461_v16 = vld [vmem:[#allocation3 + $0x38] sm:$0xff]  ;;  %2289 = vrot.lane.b32.xlu1 %v4498_v17, %s4987_s14  ;;  %v1220_v17 = vsel %vm1194_vm0, %v4454_v13, 0 }
 0x12f   : > { %v1241_v18 = vsel %vm1194_vm0, %v4461_v16, 0  ;;  %1732 = vrot.lane.b32.xlu0 %v4485_v50, %s4986_s13  ;;  %v4533_v6 = vld [vmem:[#allocation3 + $0x38] sm:$0xff]  ;;  %v4514_v50 = vld [vmem:[#allocation4 + $0x8] sm:$0xff] }
 0x130   : > { %1243 = vmatpush.bf16.xpose.msra.mxu3 %v1241_v18  ;;  %v5300_v51 = vpop.permute.xlu0 %2337 }
 0x131   : > { %v5282_v26 = vpop.permute.xlu1 %1718  ;;  %v5294_v46 = vpop.permute.xlu2 %2902 }
 0x134   : > { %v4469_v58 = vld [vmem:[#allocation4] sm:$0xff] }
 0x135   : > { %1492 = vmatpush.bf16.msrb.mxu0 %v4469_v58  ;;  %2293 = vrot.lane.b32.xlu2 %v4500_v20, %s4987_s14  ;;  %v4477_v20 = vld [vmem:[#allocation2 + $0x38] sm:$0xff]  ;;  %v4538_v58 = vld [vmem:[#allocation4 + $0x8] sm:$0xff] }
 0x136   : > { %2910 = vrot.lane.b32.xlu1 %v4523_v22, %s4988_s15  ;;  %v4446_v22 = vld [vmem:[#allocation2 + $0x30] sm:$0xff] }
 0x137   : > { %2285 = vrot.lane.b32.xlu0 %v4496_v23, %s4987_s14 }
 0x138   : > { %1244 = vmatpush.bf16.xpose.msra.mxu3 %v1238_v25  ;;  %v5310_v61 = vpop.permute.xlu0 %2900  ;;  %v4525_v25 = vld [vmem:[#allocation2 + $0x38] sm:$0xff] }
 0x139   : > { %1493 = vmatpush.bf16.msrb.mxu0 %v4468_v24  ;;  %v5291_v38 = vpop.permute.xlu1 %2956  ;;  %v5308_v60 = vpop.permute.xlu2 %1722 }
 0x13d   : > { %1494 = vmatpush.bf16.msrb.mxu0 %v4467_v29  ;;  %2912 = vrot.lane.b32.xlu2 %v4524_v27, %s4988_s15  ;;  %v4509_v27 = vld [vmem:[#allocation3 + $0x38] sm:$0xff] }
 0x13e   : > { %2033 = vrot.lane.b32.xlu1 %v4491_v32, %s4986_s13  ;;  %v4517_v32 = vld [vmem:[#allocation4] sm:$0xff] }
 0x13f   : > { %2906 = vrot.lane.b32.xlu0 %v4521_v33, %s4988_s15  ;;  %v4493_v33 = vld [vmem:[#allocation4] sm:$0xff] }
 0x140   : > { %1245 = vmatpush.bf16.xpose.msra.mxu3 %v1235_v34  ;;  %v5320_v7 = vpop.permute.xlu0 %1720  ;;  %v4447_v34 = vld [vmem:[#allocation2] sm:$0xff] }
 0x141   : > { %1495 = vmatpush.bf16.msrb.mxu0 %v4466_v35  ;;  %v5302_v54 = vpop.permute.xlu1 %2283  ;;  %v5318_v4 = vpop.permute.xlu2 %2960 }
 0x145   : > { %1496 = vmatpush.bf16.msrb.mxu0 %v4465_v39  ;;  %2023 = vrot.lane.b32.xlu2 %v4486_v42, %s4986_s13  ;;  %v4541_v39 = vld [vmem:[#allocation4] sm:$0xff] }
 0x146   : > { %2031 = vrot.lane.b32.xlu1 %v4490_v43, %s4986_s13  ;;  %v4448_v43 = vld [vmem:[#allocation2 + $0x18] sm:$0xff] }
 0x147   : > { %2908 = vrot.lane.b32.xlu0 %v4522_v44, %s4988_s15 }
 0x148   : > { %1246 = vmatpush.bf16.xpose.msra.mxu3 %v1232_v47  ;;  %v5330_v16 = vpop.permute.xlu0 %1664 }
 0x149   : > { %1497 = vmatpush.bf16.msrb.mxu0 %v4464_v48 }
 0x14a   : > { %v5328_v14 = vpop.permute.xlu2 %1724 }
 0x14d   : > { %1498 = vmatpush.bf16.msrb.mxu0 %v4463_v49  ;;  %3273 = vrot.lane.b32.xlu2 %v4540_v53, %s4988_s15  ;;  %v4449_v53 = vld [vmem:[#allocation2 + $0x10] sm:$0xff] }
 0x14e   : > { %2027 = vrot.lane.b32.xlu1 %v4488_v55, %s4986_s13 }
 0x14f   : > { %2035 = vrot.lane.b32.xlu0 %v4492_v56, %s4986_s13  ;;  %v5312_v0 = vpop.permute.xlu1 %1666 }
 0x150   : > { %1247 = vmatpush.bf16.xpose.msra.mxu3 %v1229_v57  ;;  %v5342_v23 = vpop.permute.xlu0 %2339 }
 0x151   : > { %1499 = vmatpush.bf16.msrb.mxu0 %v4462_v59 }
 0x152   : > { %v5337_v21 = vpop.permute.xlu2 %1668 }
 0x155   : > { %2654 = vrot.lane.b32.xlu2 %v4516_v63, %s4987_s14 }
 0x156   : > { %2652 = vrot.lane.b32.xlu1 %v4515_v1, %s4987_s14  ;;  %v4501_v1 = vld [vmem:[#allocation2 + $0x38] sm:$0xff] }
 0x157   : > { %2029 = vrot.lane.b32.xlu0 %v4489_v2, %s4986_s13  ;;  %v5323_v10 = vpop.permute.xlu1 %2341 }
 0x158   : > { %1248 = vmatpush.bf16.xpose.msra.mxu3 %v1226_v3  ;;  %v4450_v3 = vld [vmem:[#allocation2 + $0x8] sm:$0xff] }
 0x15a   : > { %v5346_v28 = vpop.permute.xlu2 %2345 }
 0x15d   : > { %2970 = vrot.lane.b32.xlu2 %v4533_v6, %s4988_s15 }
 0x15e   : > { %3267 = vrot.lane.b32.xlu1 %v4537_v8, %s4988_s15 }
 0x15f   : > { %2025 = vrot.lane.b32.xlu0 %v4487_v9, %s4986_s13 }
 0x160   : > { %1249 = vmatpush.bf16.xpose.msra.mxu3 %v1223_v11  ;;  %v5335_v18 = vpop.permute.xlu1 %2343 }
 0x161   : > { %v5348_v29 = vpop.permute.xlu0 %2962 }
 0x165   : > { %2295 = vrot.lane.b32.xlu2 %v4501_v1, %s4987_s14 }
 0x166   : > { %2650 = vrot.lane.b32.xlu1 %v4514_v50, %s4987_s14 }
 0x167   : > { %3271 = vrot.lane.b32.xlu0 %v4539_v15, %s4988_s15 }
 0x168   : > { %1250 = vmatpush.bf16.xpose.msra.mxu3 %v1220_v17  ;;  %v4451_v17 = vld [vmem:[#allocation2 + $0x20] sm:$0xff] }
 0x169   : > { %v5354_v35 = vpop.permute.xlu2 %2347 }
 0x16e   : > { %1676 = vrot.lane.b32.xlu1 %v4477_v20, %s4986_s13 }
 0x16f   : > { %3269 = vrot.lane.b32.xlu0 %v4538_v58, %s4988_s15  ;;  %3976 = vmatmul.msk.bf16.vlgmr.msra.gmra.mxu3 %vm1194_vm0, %v4446_v22  ;;  %v1768_v22 = vsel %vm1194_vm0, %v5328_v14, 0 }
 0x170   : > { %v1727_v24 = vpop.permute.xlu1 %1726 }
 0x171   : > { %v5357_v36 = vpop.permute.xlu0 %2964  ;;  %v1771_v15 = vsel %vm1194_vm0, %v1727_v24, 0 }
 0x176   : > { %2914 = vrot.lane.b32.xlu1 %v4525_v25, %s4988_s15 }
 0x177   : > { %2351 = vrot.lane.b32.xlu0 %v4509_v27, %s4987_s14  ;;  %v5360_v40 = vpop.permute.xlu2 %1674 }
 0x178   : > { %v5350_v30 = vpop.permute.xlu1 %1670 }
 0x17e   : > { %2656 = vrot.lane.b32.xlu1 %v4517_v32, %s4987_s14 }
 0x17f   : > { %2037 = vrot.lane.b32.xlu0 %v4493_v33, %s4986_s13  ;;  %3977 = vmatmul.msk.bf16.gmra.mxu3 %vm1194_vm0, %v4447_v34  ;;  %v5362_v41 = vpop.permute.xlu0 %1672  ;;  %v5367_v47 = vpop.permute.xlu2 %2287  ;;  %v1765_v33 = vsel %vm1194_vm0, %v5308_v60, 0  ;;  %v4452_v34 = vld [vmem:[#allocation2 + $0x28] sm:$0xff] }
 0x180   : > { %v1729_v37 = vpop.permute.xlu1 %1728 }
 0x181   : > { %v1774_v9 = vsel %vm1194_vm0, %v1729_v37, 0 }
 0x187   : > { %3275 = vrot.lane.b32.xlu0 %v4541_v39, %s4988_s15  ;;  %v5373_v52 = vpop.permute.xlu2 %2291 }
 0x188   : > { %v5364_v42 = vpop.permute.xlu1 %2966 }
 0x18f   : > { %3978 = vmatmul.msk.bf16.gmra.mxu3 %vm1194_vm0, %v4448_v43  ;;  %v5379_v59 = vpop.permute.xlu2 %2293  ;;  %v1762_v43 = vsel %vm1194_vm0, %v5320_v7, 0 }
 0x190   : > { %v2969_v44 = vpop.permute.xlu1 %2968 }
 0x191   : > { %v1731_v45 = vpop.permute.xlu0 %1730  ;;  %v3015_v7 = vsel %vm1194_vm0, %v2969_v44, 0 }
 0x192   : > { %v1777_v2 = vsel %vm1194_vm0, %v1731_v45, 0 }
 0x197   : > { %v5387_v5 = vpop.permute.xlu2 %2912 }
 0x198   : > { %v5369_v48 = vpop.permute.xlu1 %2904 }
 0x199   : > { %v5371_v49 = vpop.permute.xlu0 %2349 }
 0x19f   : > { %3979 = vmatmul.msk.bf16.gmra.mxu3 %vm1194_vm0, %v4449_v53  ;;  %v5397_v50 = vpop.permute.xlu2 %2023 }
 0x1a0   : > { %v5376_v55 = vpop.permute.xlu1 %2289 }
 0x1a1   : > { %v1733_v56 = vpop.permute.xlu0 %1732 }
 0x1a2   : > { %v1780_v57 = vsel %vm1194_vm0, %v1733_v56, 0  ;;  %v1759_v56 = vsel %vm1194_vm0, %v5282_v26, 0 }
 0x1a3   : > { %1782 = vmatpush.bf16.xpose.msrb.mxu1 %v1780_v57  ;;  %v4453_v57 = vld [vmem:[#allocation2 + $0x38] sm:$0xff] }
 0x1a7   : > { %v5405_v25 = vpop.permute.xlu2 %3273 }
 0x1a8   : > { %v5381_v62 = vpop.permute.xlu1 %2910 }
 0x1a9   : > { %v5383_v63 = vpop.permute.xlu0 %2285 }
 0x1ab   : > { %1783 = vmatpush.bf16.xpose.msrb.mxu1 %v1777_v2 }
 0x1af   : > { %3980 = vmatmul.msk.bf16.gmra.mxu3 %vm1194_vm0, %v4450_v3  ;;  %v2655_v24 = vpop.permute.xlu2 %2654 }
 0x1b0   : > { %v2034_v6 = vpop.permute.xlu1 %2033 }
 0x1b1   : > { %v5390_v8 = vpop.permute.xlu0 %2906 }
 0x1b3   : > { %1784 = vmatpush.bf16.xpose.msrb.mxu1 %v1774_v9 }
 0x1b7   : > { %v2971_v14 = vpop.permute.xlu2 %2970 }
 0x1b8   : > { %v5393_v11 = vpop.permute.xlu1 %2031  ;;  %v3018_v60 = vsel %vm1194_vm0, %v2971_v14, 0 }
 0x1b9   : > { %v5395_v13 = vpop.permute.xlu0 %2908 }
 0x1bb   : > { %1785 = vmatpush.bf16.xpose.msrb.mxu1 %v1771_v15  ;;  %v3012_v15 = vsel %vm1194_vm0, %v5364_v42, 0 }
 0x1bf   : > { %3981 = vmatmul.msk.bf16.gmra.mxu3 %vm1194_vm0, %v4451_v17 }
 0x1c0   : > { %v5401_v20 = vpop.permute.xlu1 %2027 }
 0x1c1   : > { %v2036_v58 = vpop.permute.xlu0 %2035 }
 0x1c3   : > { %1786 = vmatpush.bf16.xpose.msrb.mxu1 %v1768_v22 }
 0x1c8   : > { %v2653_v27 = vpop.permute.xlu1 %2652 }
 0x1c9   : > { %v2030_v32 = vpop.permute.xlu0 %2029 }
 0x1cb   : > { %1787 = vmatpush.bf16.xpose.msrb.mxu1 %v1765_v33  ;;  %v3009_v33 = vsel %vm1194_vm0, %v5357_v36, 0 }
 0x1cf   : > { %3982 = vmatmul.msk.bf16.gmra.mxu3 %vm1194_vm0, %v4452_v34 }
 0x1d0   : > { %v5410_v37 = vpop.permute.xlu1 %3267 }
 0x1d1   : > { %v2026_v39 = vpop.permute.xlu0 %2025 }
 0x1d3   : > { %1788 = vmatpush.bf16.xpose.msrb.mxu1 %v1762_v43 }
 0x1d8   : > { %v2651_v45 = vpop.permute.xlu1 %2650 }
 0x1d9   : > { %v5414_v53 = vpop.permute.xlu0 %3271 }
 0x1db   : > { %1789 = vmatpush.bf16.xpose.msrb.mxu1 %v1759_v56 }
 0x1df   : > { %3983 = vmatmul.msk.bf16.gmra.mxu3 %vm1194_vm0, %v4453_v57 }
 0x1e0   : > { %v5420_v1 = vpop.permute.xlu1 %1676 }
 0x1e1   : > { %v5422_v2 = vpop.permute.xlu0 %3269 }
 0x1e2   : > { %4080 = vmatmul.msk.bf16.vlgmr.msrb.gmra.mxu1 %vm1194_vm0, %v5269_v12  ;;  %v2396_v12 = vsel %vm1194_vm0, %v5371_v49, 0  ;;  %v3006_v49 = vsel %vm1194_vm0, %v5348_v29, 0  ;;  %v2387_v29 = vsel %vm1194_vm0, %v5335_v18, 0 }
 0x1e3   : > { %3020 = vmatpush.bf16.xpose.msra.mxu1 %v3018_v60 }
 0x1e8   : > { %v5427_v3 = vpop.permute.xlu1 %2914 }
 0x1e9   : > { %v2352_v26 = vpop.permute.xlu0 %2351 }
 0x1ea   : > { %v2399_v9 = vsel %vm1194_vm0, %v2352_v26, 0 }
 0x1eb   : > { %3021 = vmatpush.bf16.xpose.msra.mxu1 %v3015_v7  ;;  %2401 = vmatpush.bf16.xpose.msrb.mxu3 %v2399_v9 }
 0x1f0   : > { %v2657_v17 = vpop.permute.xlu1 %2656 }
 0x1f1   : > { %v2038_v22 = vpop.permute.xlu0 %2037  ;;  %2666 = vmatpush.bf16.msra.mxu0 %v2657_v17 }
 0x1f2   : > { %4081 = vmatmul.msk.bf16.gmra.mxu1 %vm1194_vm0, %v5330_v16  ;;  %2047 = vmatpush.bf16.msrb.mxu2 %v2038_v22  ;;  %v5436_v44 = vpop.f32.mrf.mxu3  ;;  %v2393_v16 = vsel %vm1194_vm0, %v5354_v35, 0  ;;  %v2390_v35 = vsel %vm1194_vm0, %v5346_v28, 0  ;;  %v3000_v28 = vsel %vm1194_vm0, %v5284_v31, 0  ;;  %v2997_v31 = vsel %vm1194_vm0, %v5291_v38, 0 }
 0x1f3   : > { %3022 = vmatpush.bf16.xpose.msra.mxu1 %v3012_v15  ;;  %2402 = vmatpush.bf16.xpose.msrb.mxu3 %v2396_v12  ;;  %v2378_v38 = vsel %vm1194_vm0, %v5300_v51, 0 }
 0x1f4   : > { %1292 = vmax.xlane.f32.xlu2 %v5436_v44 }
 0x1f5   : > { %2667 = vmatpush.bf16.msra.mxu0 %v2655_v24 }
 0x1f6   : > { %2048 = vmatpush.bf16.msrb.mxu2 %v2036_v58 }
 0x1f9   : > { %2668 = vmatpush.bf16.msra.mxu0 %v2653_v27 }
 0x1fa   : > { %2049 = vmatpush.bf16.msrb.mxu2 %v2034_v6  ;;  %v5443_v42 = vpop.f32.mrf.mxu3  ;;  %v3003_v6 = vsel %vm1194_vm0, %v5318_v4, 0  ;;  %v2384_v4 = vsel %vm1194_vm0, %v5323_v10, 0 }
 0x1fb   : > { %3023 = vmatpush.bf16.xpose.msra.mxu1 %v3009_v33  ;;  %2403 = vmatpush.bf16.xpose.msrb.mxu3 %v2393_v16 }
 0x1fc   : > { %1294 = vmax.xlane.f32.xlu1 %v5443_v42 }
 0x1fd   : > { %2669 = vmatpush.bf16.msra.mxu0 %v2651_v45 }
 0x1fe   : > { %2050 = vmatpush.bf16.msrb.mxu2 %v5393_v11  ;;  %v3276_v11 = vpop.permute.xlu0 %3275 }
 0x202   : > { %4082 = vmatmul.msk.bf16.gmra.mxu1 %vm1194_vm0, %v5312_v0  ;;  %2051 = vmatpush.bf16.msrb.mxu2 %v2030_v32  ;;  %v5453_v36 = vpop.f32.mrf.mxu3 }
 0x203   : > { %3024 = vmatpush.bf16.xpose.msra.mxu1 %v3006_v49  ;;  %2404 = vmatpush.bf16.xpose.msrb.mxu3 %v2390_v35 }
 0x204   : > { %1296 = vmax.xlane.f32.xlu0 %v5453_v36 }
 0x206   : > { %2052 = vmatpush.bf16.msrb.mxu2 %v5401_v20 }
 0x20a   : > { %2053 = vmatpush.bf16.msrb.mxu2 %v2026_v39  ;;  %v5461_v0 = vpop.f32.mrf.mxu3 }
 0x20b   : > { %3025 = vmatpush.bf16.xpose.msra.mxu1 %v3003_v6  ;;  %2405 = vmatpush.bf16.xpose.msrb.mxu3 %v2387_v29 }
 0x20c   : > { %1298 = vmax.xlane.f32.xlu1 %v5461_v0 }
 0x20e   : > { %2054 = vmatpush.bf16.msrb.mxu2 %v5397_v50  ;;  %v2381_v50 = vsel %vm1194_vm0, %v5342_v23, 0 }
 0x212   : > { %3285 = vmatpush.bf16.msra.mxu2 %v3276_v11  ;;  %4083 = vmatmul.msk.bf16.gmra.mxu1 %vm1194_vm0, %v5337_v21  ;;  %v5471_v18 = vpop.f32.mrf.mxu3 }
 0x213   : > { %3026 = vmatpush.bf16.xpose.msra.mxu1 %v3000_v28  ;;  %2406 = vmatpush.bf16.xpose.msrb.mxu3 %v2384_v4 }
 0x214   : > { %1300 = vmax.xlane.f32.xlu2 %v5471_v18 }
 0x216   : > { %3286 = vmatpush.bf16.msra.mxu2 %v5405_v25 }
 0x21a   : > { %3287 = vmatpush.bf16.msra.mxu2 %v5414_v53  ;;  %v5480_v21 = vpop.f32.mrf.mxu3 }
 0x21b   : > { %3027 = vmatpush.bf16.xpose.msra.mxu1 %v2997_v31  ;;  %2407 = vmatpush.bf16.xpose.msrb.mxu3 %v2381_v50 }
 0x21c   : > { %1302 = vmax.xlane.f32.xlu0 %v5480_v21 }
 0x21e   : > { %3288 = vmatpush.bf16.msra.mxu2 %v5422_v2 }
 0x222   : > { %3289 = vmatpush.bf16.msra.mxu2 %v5410_v37  ;;  %4084 = vmatmul.msk.bf16.gmra.mxu1 %vm1194_vm0, %v5350_v30  ;;  %v5489_v10 = vpop.f32.mrf.mxu3 }
 0x223   : > { %2408 = vmatpush.bf16.xpose.msrb.mxu3 %v2378_v38  ;;  %1304 = vmax.xlane.f32.xlu2 %v5489_v10 }
 0x22a   : > { %4184 = vmatmul.msk.bf16.vlgmr.msrb.gmra.mxu3 %vm1194_vm0, %v5276_v19  ;;  %v5494_v23 = vpop.f32.mrf.mxu3 }
 0x22b   : > { %1306 = vmax.xlane.f32.xlu1 %v5494_v23 }
 0x232   : > { %4085 = vmatmul.msk.bf16.gmra.mxu1 %vm1194_vm0, %v5362_v41  ;;  %v5499_v20 = vpop.f32.mrf.mxu3  ;;  %v2296_v41 = vpop.permute.xlu2 %2295 }
 0x233   : > { %1308 = vmax.xlane.f32.xlu0 %v5499_v20 }
 0x23a   : > { %4185 = vmatmul.msk.bf16.gmra.mxu3 %vm1194_vm0, %v5302_v54  ;;  %v5504_v51 = vpop.f32.mrf.mxu3 }
 0x23b   : > { %1310 = vmax.xlane.f32.xlu1 %v5504_v51 }
 0x242   : > { %4086 = vmatmul.msk.bf16.gmra.mxu1 %vm1194_vm0, %v5360_v40  ;;  %v5509_v19 = vpop.f32.mrf.mxu3 }
 0x243   : > { %1312 = vmax.xlane.f32.xlu0 %v5509_v19 }
 0x24a   : > { %4186 = vmatmul.msk.bf16.gmra.mxu3 %vm1194_vm0, %v5383_v63  ;;  %v5514_v30 = vpop.f32.mrf.mxu3 }
 0x24b   : > { %1314 = vmax.xlane.f32.xlu2 %v5514_v30 }
 0x252   : > { %4087 = vmatmul.msk.bf16.gmra.mxu1 %vm1194_vm0, %v5420_v1  ;;  %v5519_v54 = vpop.f32.mrf.mxu3 }
 0x253   : > { %1316 = vmax.xlane.f32.xlu0 %v5519_v54 }
 0x25a   : > { %4187 = vmatmul.msk.bf16.gmra.mxu3 %vm1194_vm0, %v5367_v47  ;;  %v5524_v40 = vpop.f32.mrf.mxu3 }
 0x25b   : > { %1318 = vmax.xlane.f32.xlu2 %v5524_v40 }
 0x25f   : > { %v5527_v63 = vpop.f32.mrf.mxu1 }
 0x260   : > { %1831 = vmax.xlane.f32.xlu0 %v5527_v63 }
 0x262   : > { %4288 = vmatmul.msk.bf16.vlgmr.msra.gmra.mxu1 %vm1194_vm0, %v5310_v61  ;;  %v5532_v58 = vpop.f32.mrf.mxu3 }
 0x263   : > { %1320 = vmax.xlane.f32.xlu1 %v5532_v58 }
 0x267   : > { %v1293_v25 = vpop.xlane.xlu2 %1292  ;;  %v5535_v27 = vpop.f32.mrf.mxu1 }
 0x268   : > { %v1324_v47 = vsub.f32 %v5436_v44, %v1293_v25 }
 0x26a   : > { %v1340_v32 = vmul.f32 1.442695, %v1324_v47  ;;  %4188 = vmatmul.msk.bf16.gmra.mxu3 %vm1194_vm0, %v5376_v55  ;;  %v5540_v24 = vpop.f32.mrf.mxu3 }
 0x26b   : > { %1833 = vmax.xlane.f32.xlu1 %v5535_v27  ;;  %1322 = vmax.xlane.f32.xlu0 %v5540_v24 }
 0x26c   : > { %4722 = vpow2.f32 %v1340_v32 }
 0x26f   : > { %v1295_v61 = vpop.xlane.xlu1 %1294  ;;  %v5544_v34 = vpop.f32.mrf.mxu1 }
 0x270   : > { %v1325_v37 = vsub.f32 %v5443_v42, %v1295_v61 }
 0x272   : > { %v5547_v39 = vpop.eup %4722  ;;  %v1342_v43 = vmul.f32 1.442695, %v1325_v37  ;;  %4289 = vmatmul.msk.bf16.gmra.mxu1 %vm1194_vm0, %v5294_v46 }
 0x273   : > { %1835 = vmax.xlane.f32.xlu1 %v5544_v34  ;;  %1372 = vadd.xlane.f32.xlu0 %v5547_v39 }
 0x274   : > { %4724 = vpow2.f32 %v1342_v43 }
 0x277   : > { %v1297_v55 = vpop.xlane.xlu0 %1296  ;;  %v5553_v14 = vpop.f32.mrf.mxu1 }
 0x278   : > { %v1326_v45 = vsub.f32 %v5453_v36, %v1297_v55 }
 0x27a   : > { %v5556_v53 = vpop.eup %4724  ;;  %v1344_v56 = vmul.f32 1.442695, %v1326_v45  ;;  %4189 = vmatmul.msk.bf16.gmra.mxu3 %vm1194_vm0, %v5373_v52 }
 0x27b   : > { %1374 = vadd.xlane.f32.xlu0 %v5556_v53 }
 0x27c   : > { %4726 = vpow2.f32 %v1344_v56 }
 0x27f   : > { %v5561_v46 = vpop.f32.mrf.mxu1  ;;  %v1299_v15 = vpop.xlane.xlu1 %1298 }
 0x282   : > { %v5563_v60 = vpop.eup %4726  ;;  %4290 = vmatmul.msk.bf16.gmra.mxu1 %vm1194_vm0, %v5369_v48 }
 0x283   : > { %1376 = vadd.xlane.f32.xlu0 %v5563_v60 }
 0x287   : > { %v5568_v57 = vpop.f32.mrf.mxu1 }
 0x28a   : > { %4190 = vmatmul.msk.bf16.gmra.mxu3 %vm1194_vm0, %v5379_v59  ;;  %v1301_v59 = vpop.xlane.xlu2 %1300 }
 0x28b   : > { %v1328_v9 = vsub.f32 %v5471_v18, %v1301_v59 }
 0x28d   : > { %v1348_v17 = vmul.f32 1.442695, %v1328_v9 }
 0x28f   : > { %v5572_v1 = vpop.f32.mrf.mxu1  ;;  %v1303_v26 = vpop.xlane.xlu0 %1302  ;;  %4728 = vpow2.f32 %v1348_v17 }
 0x290   : > { %v1329_v38 = vsub.f32 %v5480_v21, %v1303_v26 }
 0x292   : > { %4291 = vmatmul.msk.bf16.gmra.mxu1 %vm1194_vm0, %v5390_v8  ;;  %v1350_v25 = vmul.f32 1.442695, %v1329_v38 }
 0x295   : > { %v5609_v49 = vpop.eup %4728 }
 0x296   : > { %v1305_v16 = vpop.xlane.xlu2 %1304 }
 0x297   : > { %v5576_v52 = vpop.f32.mrf.mxu1  ;;  %v1330_v35 = vsub.f32 %v5489_v10, %v1305_v16 }
 0x299   : > { %v1352_v6 = vmul.f32 1.442695, %v1330_v35 }
 0x29a   : > { %4191 = vmatmul.msk.bf16.gmra.mxu3 %vm1194_vm0, %v2296_v41 }
 0x29f   : > { %v5581_v48 = vpop.f32.mrf.mxu1 }
 0x2a2   : > { %4292 = vmatmul.msk.bf16.gmra.mxu1 %vm1194_vm0, %v5395_v13 }
 0x2a6   : > { %v1309_v12 = vpop.xlane.xlu0 %1308 }
 0x2a7   : > { %v5583_v2 = vpop.f32.mrf.mxu1  ;;  %v1332_v21 = vsub.f32 %v5499_v20, %v1309_v12 }
 0x2a9   : > { %v1356_v37 = vmul.f32 1.442695, %v1332_v21 }
 0x2ad   : > { %v5585_v7 = vpop.f32.mrf.mxu3 }
 0x2ae   : > { %2450 = vmax.xlane.f32.xlu2 %v5585_v7 }
 0x2af   : > { %v5594_v13 = vpop.f32.mrf.mxu1 }
 0x2b2   : > { %4293 = vmatmul.msk.bf16.gmra.mxu1 %vm1194_vm0, %v5381_v62  ;;  %v1327_v62 = vsub.f32 %v5461_v0, %v1299_v15  ;;  %v1307_v0 = vpop.xlane.xlu1 %1306 }
 0x2b4   : > { %v1346_v33 = vmul.f32 1.442695, %v1327_v62 }
 0x2b5   : > { %v5590_v8 = vpop.f32.mrf.mxu3 }
 0x2b6   : > { %1837 = vmax.xlane.f32.xlu2 %v5553_v14  ;;  %2452 = vmax.xlane.f32.xlu1 %v5590_v8  ;;  %4730 = vpow2.f32 %v1346_v33  ;;  %v1313_v36 = vpop.xlane.xlu0 %1312 }
 0x2b7   : > { %v5603_v44 = vpop.f32.mrf.mxu1  ;;  %4732 = vpow2.f32 %v1352_v6  ;;  %v1334_v55 = vsub.f32 %v5509_v19, %v1313_v36 }
 0x2b8   : > { %4734 = vpow2.f32 %v1350_v25 }
 0x2b9   : > { %v1360_v59 = vmul.f32 1.442695, %v1334_v55 }
 0x2ba   : > { %v1311_v4 = vpop.xlane.xlu1 %1310 }
 0x2bb   : > { %v1333_v10 = vsub.f32 %v5504_v51, %v1311_v4 }
 0x2bc   : > { %v5616_v28 = vpop.eup %4730 }
 0x2bd   : > { %v5597_v22 = vpop.f32.mrf.mxu3  ;;  %v5624_v18 = vpop.eup %4732  ;;  %v1358_v47 = vmul.f32 1.442695, %v1333_v10 }
 0x2be   : > { %1839 = vmax.xlane.f32.xlu2 %v5561_v46  ;;  %1843 = vmax.xlane.f32.xlu1 %v5572_v1  ;;  %v5644_v43 = vpop.eup %4734  ;;  %v1315_v17 = vpop.xlane.xlu2 %1314 }
 0x2bf   : > { %2454 = vmax.xlane.f32.xlu0 %v5597_v22  ;;  %v5614_v29 = vpop.f32.mrf.mxu1  ;;  %4736 = vpow2.f32 %v1358_v47  ;;  %v1335_v19 = vsub.f32 %v5514_v30, %v1315_v17 }
 0x2c1   : > { %v1362_v33 = vmul.f32 1.442695, %v1335_v19 }
 0x2c2   : > { %4294 = vmatmul.msk.bf16.gmra.mxu1 %vm1194_vm0, %v5387_v5 }
 0x2c5   : > { %v5607_v42 = vpop.f32.mrf.mxu3 }
 0x2c6   : > { %1841 = vmax.xlane.f32.xlu2 %v5568_v57  ;;  %v1317_v11 = vpop.xlane.xlu0 %1316 }
 0x2c7   : > { %1380 = vadd.xlane.f32.xlu0 %v5609_v49  ;;  %v5626_v31 = vpop.f32.mrf.mxu1  ;;  %v1336_v20 = vsub.f32 %v5519_v54, %v1317_v11 }
 0x2c9   : > { %v1364_v15 = vmul.f32 1.442695, %v1336_v20 }
 0x2cd   : > { %v5618_v5 = vpop.f32.mrf.mxu3 }
 0x2ce   : > { %1378 = vadd.xlane.f32.xlu2 %v5616_v28  ;;  %2458 = vmax.xlane.f32.xlu1 %v5618_v5 }
 0x2cf   : > { %v5641_v61 = vpop.f32.mrf.mxu1 }
 0x2d2   : > { %4295 = vmatmul.msk.bf16.gmra.mxu1 %vm1194_vm0, %v5427_v3  ;;  %v1331_v3 = vsub.f32 %v5494_v23, %v1307_v0  ;;  %v5646_v23 = vpop.eup %4736  ;;  %v1319_v0 = vpop.xlane.xlu2 %1318 }
 0x2d3   : > { %v5634_v41 = vpop.xlane.xlu0 %1831  ;;  %v1337_v10 = vsub.f32 %v5524_v40, %v1319_v0 }
 0x2d4   : > { %v1354_v32 = vmul.f32 1.442695, %v1331_v3  ;;  %v1863_v40 = vsub.f32 %v5527_v63, %v5634_v41 }
 0x2d5   : > { %v5628_v50 = vpop.f32.mrf.mxu3  ;;  %v1366_v47 = vmul.f32 1.442695, %v1337_v10 }
 0x2d6   : > { %2456 = vmax.xlane.f32.xlu2 %v5607_v42  ;;  %1384 = vadd.xlane.f32.xlu1 %v5624_v18  ;;  %4738 = vpow2.f32 %v1354_v32  ;;  %v1321_v9 = vpop.xlane.xlu1 %1320  ;;  %v1879_v55 = vmul.f32 1.442695, %v1863_v40 }
 0x2d7   : > { %2460 = vmax.xlane.f32.xlu0 %v5628_v50  ;;  %4740 = vpow2.f32 %v1356_v37  ;;  %v5655_v26 = vpop.f32.mrf.mxu1  ;;  %v1338_v37 = vsub.f32 %v5532_v58, %v1321_v9 }
 0x2d8   : > { %4742 = vpow2.f32 %v1360_v59 }
 0x2dc   : > { %v5649_v45 = vpop.eup %4738 }
 0x2dd   : > { %v5657_v62 = vpop.eup %4740 }
 0x2de   : > { %1845 = vmax.xlane.f32.xlu2 %v5576_v52  ;;  %1849 = vmax.xlane.f32.xlu1 %v5583_v2  ;;  %v1323_v51 = vpop.xlane.xlu0 %1322  ;;  %v5663_v12 = vpop.eup %4742 }
 0x2df   : > { %1847 = vmax.xlane.f32.xlu0 %v5581_v48  ;;  %v5665_v16 = vpop.f32.mrf.mxu1  ;;  %v1834_v36 = vpop.xlane.xlu1 %1833 }
 0x2e0   : > { %v1864_v30 = vsub.f32 %v5535_v27, %v1834_v36  ;;  %v1339_v27 = vsub.f32 %v5540_v24, %v1323_v51 }
 0x2e2   : > { %v1881_v25 = vmul.f32 1.442695, %v1864_v30 }
 0x2e6   : > { %1382 = vadd.xlane.f32.xlu2 %v5644_v43  ;;  %1390 = vadd.xlane.f32.xlu1 %v5646_v23  ;;  %v1373_v56 = vpop.xlane.xlu0 %1372 }
 0x2e7   : > { %1386 = vadd.xlane.f32.xlu0 %v5649_v45  ;;  %4744 = vrcp.f32 %v1373_v56  ;;  %v5678_v21 = vpop.f32.mrf.mxu1  ;;  %v1836_v20 = vpop.xlane.xlu1 %1835 }
 0x2e8   : > { %4746 = vpow2.f32 %v1364_v15  ;;  %v1865_v24 = vsub.f32 %v5544_v34, %v1836_v20 }
 0x2ea   : > { %v1883_v63 = vmul.f32 1.442695, %v1865_v24 }
 0x2ed   : > { %v4745_v35 = vpop.eup %4744 }
 0x2ee   : > { %1388 = vadd.xlane.f32.xlu2 %v5657_v62  ;;  %1855 = vmax.xlane.f32.xlu1 %v5614_v29  ;;  %v1375_v54 = vpop.xlane.xlu0 %1374  ;;  %v5667_v6 = vpop.eup %4746  ;;  %v1420_v4 = vmul.f32 %v4745_v35, %v5547_v39  ;;  %v1368_v39 = vmul.f32 1.442695, %v1338_v37 }
 0x2ef   : > { %1851 = vmax.xlane.f32.xlu0 %v5594_v13  ;;  %4748 = vrcp.f32 %v1375_v54  ;;  %v5694_v51 = vpop.f32.mrf.mxu1 }
 0x2f0   : > { %4750 = vpow2.f32 %v1362_v33 }
 0x2f1   : > { %4752 = vpow2.f32 %v1881_v25 }
 0x2f2   : > { %4754 = vpow2.f32 %v1366_v47 }
 0x2f3   : > { %4756 = vpow2.f32 %v1368_v39 }
 0x2f5   : > { %v4749_v11 = vpop.eup %4748 }
 0x2f6   : > { %1853 = vmax.xlane.f32.xlu2 %v5603_v44  ;;  %1396 = vadd.xlane.f32.xlu1 %v5667_v6  ;;  %v1421_v38 = vmul.f32 %v4749_v11, %v5556_v53  ;;  %v5676_v32 = vpop.eup %4750  ;;  %v1370_v53 = vmul.f32 1.442695, %v1339_v27  ;;  %v1377_v11 = vpop.xlane.xlu0 %1376 }
 0x2f7   : > { %1392 = vadd.xlane.f32.xlu0 %v5663_v12  ;;  %v5687_v56 = vpop.eup %4752  ;;  %v5706_v34 = vpop.f32.mrf.mxu1 }
 0x2f8   : > { %v1436_v3 = vpack.c.bf16 %v1421_v38, %v1420_v4  ;;  %v5689_v58 = vpop.eup %4754  ;;  %4758 = vpow2.f32 %v1370_v53 }
 0x2f9   : > { %4760 = vpow2.f32 %v1879_v55  ;;  %v5697_v41 = vpop.eup %4756 }
 0x2fa   : > { %1500 = vmatmul.bf16.vlgmr.msrb.gmra.mxu0 %v1436_v3  ;;  %4762 = vpow2.f32 %v1883_v63 }
 0x2fe   : > { %1394 = vadd.xlane.f32.xlu2 %v5676_v32  ;;  %1861 = vmax.xlane.f32.xlu1 %v5655_v26  ;;  %v5699_v59 = vpop.eup %4758 }
 0x2ff   : > { %1857 = vmax.xlane.f32.xlu0 %v5626_v31  ;;  %v5701_v9 = vpop.eup %4760  ;;  %v5713_v17 = vpop.f32.mrf.mxu1 }
 0x300   : > { %v5708_v15 = vpop.eup %4762 }
 0x306   : > { %1859 = vmax.xlane.f32.xlu2 %v5641_v61  ;;  %1913 = vadd.xlane.f32.xlu1 %v5687_v56 }
 0x307   : > { %1398 = vadd.xlane.f32.xlu0 %v5689_v58  ;;  %v5719_v54 = vpop.f32.mrf.mxu1 }
 0x308   : > { %6411 = vst [vmem:[#allocation6_spill] sm:$0xff] %v5719_v54 }
 0x30e   : > { %1400 = vadd.xlane.f32.xlu2 %v5697_v41  ;;  %1402 = vadd.xlane.f32.xlu1 %v5699_v59 }
 0x30f   : > { %1911 = vadd.xlane.f32.xlu0 %v5701_v9 }
 0x316   : > { %3071 = vmax.xlane.f32.xlu2 %v5678_v21  ;;  %1915 = vadd.xlane.f32.xlu1 %v5708_v15 }
 0x317   : > { %3069 = vmax.xlane.f32.xlu0 %v5665_v16 }
 0x31e   : > { %3073 = vmax.xlane.f32.xlu1 %v5694_v51 }
 0x31f   : > { %3075 = vmax.xlane.f32.xlu0 %v5706_v34 }
 0x321   : > { %v5717_v19 = vpop.xlane.xlu2 %2450 }
 0x326   : > { %3079 = vmax.xlane.f32.xlu1 %v5719_v54 }
 0x329   : > { %v1838_v33 = vpop.xlane.xlu2 %1837  ;;  %v2453_v0 = vpop.xlane.xlu1 %2452 }
 0x32a   : > { %v1866_v35 = vsub.f32 %v5553_v14, %v1838_v33  ;;  %v5733_v14 = vpop.f32.mrf.mxu3  ;;  %v2483_v54 = vsub.f32 %v5590_v8, %v2453_v0 }
 0x32c   : > { %v1885_v36 = vmul.f32 1.442695, %v1866_v35 }
 0x32e   : > { %4764 = vpow2.f32 %v1885_v36 }
 0x331   : > { %v1840_v30 = vpop.xlane.xlu2 %1839  ;;  %v5729_v25 = vpop.xlane.xlu1 %1843 }
 0x332   : > { %v1867_v4 = vsub.f32 %v5561_v46, %v1840_v30  ;;  %v5727_v3 = vpop.xlane.xlu0 %2454  ;;  %v5741_v39 = vpop.f32.mrf.mxu3 }
 0x333   : > { %6412 = vst [vmem:[#allocation7_spill] sm:$0xff] %v5741_v39 }
 0x334   : > { %v5724_v38 = vpop.eup %4764  ;;  %v1887_v10 = vmul.f32 1.442695, %v1867_v4 }
 0x335   : > { %1917 = vadd.xlane.f32.xlu2 %v5724_v38 }
 0x336   : > { %4766 = vpow2.f32 %v1887_v10 }
 0x337   : > { %4768 = vrcp.f32 %v1377_v11  ;;  %v4536_v11 = vld [vmem:[#allocation4 + $0x38] sm:$0xff] }
 0x339   : > { %v5731_v47 = vpop.xlane.xlu2 %1841 }
 0x33a   : > { %v1381_v40 = vpop.xlane.xlu0 %1380 }
 0x33c   : > { %v5735_v37 = vpop.eup %4766 }
 0x33d   : > { %1919 = vadd.xlane.f32.xlu0 %v5735_v37  ;;  %2462 = vmax.xlane.f32.xlu2 %v5733_v14  ;;  %v4769_v53 = vpop.eup %4768 }
 0x33e   : > { %v1422_v63 = vmul.f32 %v4769_v53, %v5563_v60  ;;  %v2500_v53 = vmul.f32 1.442695, %v2483_v54 }
 0x341   : > { %v1379_v46 = vpop.xlane.xlu2 %1378  ;;  %v5739_v27 = vpop.xlane.xlu1 %2458 }
 0x342   : > { %4770 = vrcp.f32 %v1379_v46 }
 0x345   : > { %2464 = vmax.xlane.f32.xlu2 %v5741_v39 }
 0x348   : > { %v4771_v55 = vpop.eup %4770 }
 0x349   : > { %v5744_v20 = vpop.xlane.xlu2 %2456  ;;  %v1385_v24 = vpop.xlane.xlu1 %1384  ;;  %v1423_v33 = vmul.f32 %v4771_v55, %v5616_v28 }
 0x34a   : > { %v5748_v35 = vpop.xlane.xlu0 %2460 }
 0x34b   : > { %v1437_v36 = vpack.c.bf16 %v1423_v33, %v1422_v63  ;;  %v4513_v63 = vld [vmem:[#allocation4 + $0x10] sm:$0xff] }
 0x34d   : > { %1505 = vmatmul.bf16.gmra.mxu0 %v1437_v36 }
 0x351   : > { %v1846_v30 = vpop.xlane.xlu2 %1845  ;;  %v5750_v4 = vpop.xlane.xlu1 %1849  ;;  %3265 = vrot.lane.b32.xlu0 %v4536_v11, %s4988_s15 }
 0x352   : > { %v1870_v10 = vsub.f32 %v5576_v52, %v1846_v30  ;;  %v1848_v46 = vpop.xlane.xlu0 %1847 }
 0x354   : > { %v1893_v39 = vmul.f32 1.442695, %v1870_v10 }
 0x356   : > { %4772 = vpow2.f32 %v1893_v39 }
 0x357   : > { %4774 = vrcp.f32 %v1381_v40 }
 0x359   : > { %v1383_v60 = vpop.xlane.xlu2 %1382  ;;  %v1391_v28 = vpop.xlane.xlu1 %1390 }
 0x35a   : > { %4776 = vrcp.f32 %v1383_v60  ;;  %v1387_v55 = vpop.xlane.xlu0 %1386 }
 0x35b   : > { %4778 = vpow2.f32 %v2500_v53 }
 0x35c   : > { %v5755_v33 = vpop.eup %4772  ;;  %4780 = vrcp.f32 %v1387_v55 }
 0x35d   : > { %1925 = vadd.xlane.f32.xlu1 %v5755_v33  ;;  %2648 = vrot.lane.b32.xlu2 %v4513_v63, %s4987_s14  ;;  %v4775_v36 = vpop.eup %4774 }
 0x35e   : > { %v1424_v8 = vmul.f32 %v4775_v36, %v5609_v49 }
 0x360   : > { %v4777_v52 = vpop.eup %4776 }
 0x361   : > { %v5759_v11 = vpop.xlane.xlu1 %1855  ;;  %v1425_v0 = vmul.f32 %v4777_v52, %v5644_v43  ;;  %v5764_v30 = vpop.eup %4778 }
 0x362   : > { %v1852_v40 = vpop.xlane.xlu0 %1851  ;;  %v4781_v63 = vpop.eup %4780 }
 0x363   : > { %v1873_v54 = vsub.f32 %v5594_v13, %v1852_v40  ;;  %v1438_v39 = vpack.c.bf16 %v1425_v0, %v1424_v8  ;;  %v1389_v36 = vpop.xlane.xlu2 %1388  ;;  %v1427_v13 = vmul.f32 %v4781_v63, %v5649_v45  ;;  %v5778_v63 = vpop.f32.mrf.mxu1 }
 0x365   : > { %v1899_v10 = vmul.f32 1.442695, %v1873_v54  ;;  %1510 = vmatmul.bf16.gmra.mxu0 %v1438_v39  ;;  %2532 = vadd.xlane.f32.xlu1 %v5764_v30 }
 0x367   : > { %4782 = vpow2.f32 %v1899_v10 }
 0x368   : > { %4784 = vrcp.f32 %v1385_v24  ;;  %v1871_v24 = vsub.f32 %v5581_v48, %v1848_v46 }
 0x369   : > { %v5767_v53 = vpop.xlane.xlu1 %1396  ;;  %4786 = vrcp.f32 %v1389_v36 }
 0x36a   : > { %v1393_v60 = vpop.xlane.xlu0 %1392  ;;  %v1895_v39 = vmul.f32 1.442695, %v1871_v24 }
 0x36b   : > { %v1854_v10 = vpop.xlane.xlu2 %1853 }
 0x36d   : > { %v5769_v49 = vpop.eup %4782 }
 0x36e   : > { %6413 = vst [vmem:[#allocation8_spill] sm:$0xff] %v5769_v49  ;;  %v4785_v43 = vpop.eup %4784  ;;  %1931 = vadd.xlane.f32.xlu1 %v5769_v49 }
 0x36f   : > { %v1426_v52 = vmul.f32 %v4785_v43, %v5624_v18  ;;  %v4787_v48 = vpop.eup %4786 }
 0x371   : > { %v1439_v55 = vpack.c.bf16 %v1427_v13, %v1426_v52  ;;  %v5776_v40 = vpop.xlane.xlu1 %1861  ;;  %v1428_v13 = vmul.f32 %v4787_v48, %v5657_v62 }
 0x372   : > { %v1858_v8 = vpop.xlane.xlu0 %1857 }
 0x373   : > { %v1876_v0 = vsub.f32 %v5626_v31, %v1858_v8  ;;  %v2482_v31 = vsub.f32 %v5585_v7, %v5717_v19 }
 0x375   : > { %v1905_v54 = vmul.f32 1.442695, %v1876_v0  ;;  %1515 = vmatmul.bf16.gmra.mxu0 %v1439_v55  ;;  %v1395_v0 = vpop.xlane.xlu2 %1394 }
 0x377   : > { %4788 = vpow2.f32 %v1905_v54  ;;  %v1501_v49 = vpop.f32.mrf.mxu0 }
 0x378   : > { %4790 = vrcp.f32 %v1391_v28  ;;  %v1541_v45 = vpack.c.bf16 %v1501_v49, %v1501_v49  ;;  %v2498_v28 = vmul.f32 1.442695, %v2482_v31  ;;  %v1868_v49 = vsub.f32 %v5568_v57, %v5731_v47 }
 0x379   : > { %4792 = vpow2.f32 %v1895_v39  ;;  %v1914_v36 = vpop.xlane.xlu1 %1913  ;;  %v1874_v57 = vsub.f32 %v5603_v44, %v1854_v10 }
 0x37a   : > { %v1399_v18 = vpop.xlane.xlu0 %1398  ;;  %1558 = vst.msk [vmem:[#allocation5] sm:$0xf] %vm1557_vm1, %v1541_v45  ;;  %4794 = vrcp.f32 %v1914_v36  ;;  %v1889_v24 = vmul.f32 1.442695, %v1868_v49  ;;  %v5810_v49 = vpop.f32.mrf.mxu1 }
 0x37b   : > { %3081 = vmax.xlane.f32.xlu0 %v5778_v63  ;;  %4796 = vpow2.f32 %v2498_v28  ;;  %v1901_v47 = vmul.f32 1.442695, %v1874_v57 }
 0x37d   : > { %v5784_v46 = vpop.eup %4788 }
 0x37e   : > { %v4791_v43 = vpop.eup %4790  ;;  %1937 = vadd.xlane.f32.xlu1 %v5784_v46 }
 0x37f   : > { %v1503_v52 = vpop.f32.mrf.mxu0  ;;  %v1429_v19 = vmul.f32 %v4791_v43, %v5646_v23  ;;  %v5791_v8 = vpop.eup %4792  ;;  %v1869_v23 = vsub.f32 %v5572_v1, %v5729_v25 }
 0x380   : > { %v1542_v7 = vpack.c.bf16 %v1503_v52, %v1503_v52  ;;  %v4795_v62 = vpop.eup %4794  ;;  %v5804_v43 = vpop.xlane.xlu2 %1859  ;;  %v4535_v52 = vld [vmem:[#allocation4 + $0x20] sm:$0xff] }
 0x381   : > { %v1440_v54 = vpack.c.bf16 %v1429_v19, %v1428_v13  ;;  %v5799_v39 = vpop.eup %4796  ;;  %v1891_v31 = vmul.f32 1.442695, %v1869_v23  ;;  %v1960_v10 = vmul.f32 %v4795_v62, %v5687_v56  ;;  %v1403_v19 = vpop.xlane.xlu1 %1402  ;;  %v2484_v62 = vsub.f32 %v5597_v22, %v5727_v3 }
 0x382   : > { %v1912_v55 = vpop.xlane.xlu0 %1911  ;;  %1559 = vst.msk [vmem:[#allocation5 + $0x4] sm:$0xf] %vm1557_vm1, %v1542_v7  ;;  %v2485_v3 = vsub.f32 %v5607_v42, %v5744_v20  ;;  %v1878_v42 = vsub.f32 %v5655_v26, %v5776_v40 }
 0x383   : > { %1927 = vadd.xlane.f32.xlu0 %v5791_v8  ;;  %4798 = vrcp.f32 %v1912_v55 }
 0x384   : > { %4800 = vrcp.f32 %v1395_v0 }
 0x385   : > { %1520 = vmatmul.bf16.gmra.mxu0 %v1440_v54  ;;  %4802 = vpow2.f32 %v1889_v24 }
 0x386   : > { %3077 = vmax.xlane.f32.xlu2 %v5713_v17  ;;  %4804 = vrcp.f32 %v1393_v60 }
 0x387   : > { %4806 = vpow2.f32 %v1901_v47 }
 0x388   : > { %4808 = vpow2.f32 %v1891_v31  ;;  %v1401_v7 = vpop.xlane.xlu2 %1400 }
 0x389   : > { %v4799_v45 = vpop.eup %4798  ;;  %4810 = vrcp.f32 %v1399_v18  ;;  %v1875_v18 = vsub.f32 %v5614_v29, %v5759_v11  ;;  %v1916_v29 = vpop.xlane.xlu1 %1915 }
 0x38a   : > { %v1959_v44 = vmul.f32 %v4799_v45, %v5701_v9  ;;  %v4801_v48 = vpop.eup %4800  ;;  %4812 = vrcp.f32 %v5767_v53  ;;  %v3070_v45 = vpop.xlane.xlu0 %3069 }
 0x38b   : > { %2530 = vadd.xlane.f32.xlu0 %v5799_v39  ;;  %v5806_v28 = vpop.eup %4802  ;;  %v1431_v60 = vmul.f32 %v4801_v48, %v5676_v32  ;;  %v1872_v32 = vsub.f32 %v5583_v2, %v5750_v4  ;;  %v5830_v4 = vpop.f32.mrf.mxu3  ;;  %v1903_v54 = vmul.f32 1.442695, %v1875_v18 }
 0x38c   : > { %v1975_v1 = vpack.c.bf16 %v1960_v10, %v1959_v44  ;;  %v4805_v25 = vpop.eup %4804 }
 0x38d   : > { %v1430_v9 = vmul.f32 %v4805_v25, %v5663_v12  ;;  %v5813_v36 = vpop.eup %4806  ;;  %v5823_v12 = vpop.f32.mrf.mxu1  ;;  %v1897_v0 = vmul.f32 1.442695, %v1872_v32 }
 0x38e   : > { %1921 = vadd.xlane.f32.xlu2 %v5806_v28  ;;  %2055 = vmatmul.bf16.vlgmr.msrb.gmra.mxu2 %v1975_v1  ;;  %v5816_v13 = vpop.eup %4808 }
 0x38f   : > { %v1441_v56 = vpack.c.bf16 %v1431_v60, %v1430_v9  ;;  %v4811_v55 = vpop.eup %4810  ;;  %4814 = vpow2.f32 %v1897_v0  ;;  %v2504_v60 = vmul.f32 1.442695, %v2485_v3 }
 0x390   : > { %v4813_v24 = vpop.eup %4812  ;;  %v1433_v2 = vmul.f32 %v4811_v55, %v5689_v58  ;;  %v3072_v53 = vpop.xlane.xlu2 %3071  ;;  %4816 = vpow2.f32 %v1903_v54  ;;  %v2502_v58 = vmul.f32 1.442695, %v2484_v62  ;;  %v3101_v54 = vsub.f32 %v5665_v16, %v3070_v45  ;;  %v4534_v45 = vld [vmem:[#allocation4 + $0x28] sm:$0xff] }
 0x391   : > { %v1432_v57 = vmul.f32 %v4813_v24, %v5667_v6  ;;  %4818 = vrcp.f32 %v1401_v7  ;;  %v3074_v24 = vpop.xlane.xlu1 %3073 }
 0x392   : > { %4820 = vrcp.f32 %v1403_v19  ;;  %v5857_v32 = vpop.xlane.xlu0 %3075  ;;  %v3117_v62 = vmul.f32 1.442695, %v3101_v54 }
 0x393   : > { %1933 = vadd.xlane.f32.xlu0 %v5813_v36  ;;  %v1442_v23 = vpack.c.bf16 %v1433_v2, %v1432_v57  ;;  %4822 = vrcp.f32 %v1916_v29  ;;  %v5841_v31 = vpop.f32.mrf.mxu3  ;;  %v3103_v57 = vsub.f32 %v5694_v51, %v3074_v24 }
 0x395   : > { %1525 = vmatmul.bf16.gmra.mxu0 %v1441_v56  ;;  %v5836_v11 = vpop.eup %4814  ;;  %v5861_v19 = vpop.f32.mrf.mxu1  ;;  %v3121_v29 = vmul.f32 1.442695, %v3103_v57 }
 0x396   : > { %1923 = vadd.xlane.f32.xlu2 %v5816_v13  ;;  %v5839_v6 = vpop.eup %4816 }
 0x397   : > { %3263 = vrot.lane.b32.xlu1 %v4535_v52, %s4988_s15  ;;  %v4819_v44 = vpop.eup %4818 }
 0x398   : > { %v4821_v22 = vpop.eup %4820  ;;  %v1434_v1 = vmul.f32 %v4819_v44, %v5697_v41 }
 0x399   : > { %v4823_v10 = vpop.eup %4822  ;;  %v1435_v25 = vmul.f32 %v4821_v22, %v5699_v59  ;;  %v3102_v59 = vsub.f32 %v5678_v21, %v3072_v53 }
 0x39a   : > { %v1961_v56 = vmul.f32 %v4823_v10, %v5708_v15  ;;  %v1909_v15 = vmul.f32 1.442695, %v1878_v42 }
 0x39b   : > { %3085 = vmax.xlane.f32.xlu0 %v5823_v12  ;;  %v1443_v41 = vpack.c.bf16 %v1435_v25, %v1434_v1  ;;  %v5885_v16 = vpop.f32.mrf.mxu3  ;;  %v4511_v1 = vld [vmem:[#allocation4 + $0x20] sm:$0xff] }
 0x39d   : > { %v5872_v18 = vpop.f32.mrf.mxu1 }
 0x39e   : > { %3083 = vmax.xlane.f32.xlu2 %v5810_v49 }
 0x3a3   : > { %2466 = vmax.xlane.f32.xlu0 %v5830_v4  ;;  %v5898_v25 = vpop.f32.mrf.mxu3 }
 0x3a5   : > { %1530 = vmatmul.bf16.gmra.mxu0 %v1442_v23  ;;  %v4512_v23 = vld [vmem:[#allocation4 + $0x38] sm:$0xff] }
 0x3a6   : > { %1929 = vadd.xlane.f32.xlu2 %v5836_v11 }
 0x3a8   : > { %v1918_v47 = vpop.xlane.xlu2 %1917 }
 0x3a9   : > { %4824 = vrcp.f32 %v1918_v47 }
 0x3aa   : > { %4826 = vpow2.f32 %v2502_v58  ;;  %v5882_v58 = vpop.f32.mrf.mxu1 }
 0x3ab   : > { %2468 = vmax.xlane.f32.xlu0 %v5841_v31  ;;  %4828 = vpow2.f32 %v2504_v60 }
 0x3ac   : > { %4830 = vpow2.f32 %v1909_v15 }
 0x3ae   : > { %1935 = vadd.xlane.f32.xlu2 %v5839_v6 }
 0x3af   : > { %v4825_v48 = vpop.eup %4824 }
 0x3b0   : > { %v5849_v9 = vpop.xlane.xlu2 %2462  ;;  %v1962_v52 = vmul.f32 %v4825_v48, %v5724_v38  ;;  %v5853_v7 = vpop.eup %4826  ;;  %v3119_v38 = vmul.f32 1.442695, %v3102_v59  ;;  %v2487_v48 = vsub.f32 %v5628_v50, %v5748_v35 }
 0x3b1   : > { %v5865_v55 = vpop.eup %4828  ;;  %v5867_v26 = vpop.xlane.xlu0 %1919 }
 0x3b2   : > { %v1976_v20 = vpack.c.bf16 %v1962_v52, %v1961_v56  ;;  %4832 = vpow2.f32 %v3119_v38  ;;  %v5870_v40 = vpop.eup %4830  ;;  %v2508_v60 = vmul.f32 1.442695, %v2487_v48  ;;  %v5903_v56 = vpop.xlane.xlu1 %3079 }
 0x3b3   : > { %2534 = vadd.xlane.f32.xlu0 %v5853_v7  ;;  %4834 = vpow2.f32 %v3117_v62  ;;  %v5905_v52 = vpop.f32.mrf.mxu3 }
 0x3b4   : > { %2060 = vmatmul.bf16.gmra.mxu2 %v1976_v20  ;;  %4836 = vpow2.f32 %v3121_v29 }
 0x3b5   : > { %1535 = vmatmul.bf16.gmra.mxu0 %v1443_v41  ;;  %4838 = vpow2.f32 %v2508_v60  ;;  %v5914_v41 = vpop.f32.mrf.mxu1  ;;  %v2488_v60 = vsub.f32 %v5733_v14, %v5849_v9 }
 0x3b8   : > { %v5863_v0 = vpop.xlane.xlu2 %2464  ;;  %v5875_v2 = vpop.eup %4832 }
 0x3b9   : > { %v5889_v51 = vpop.eup %4834 }
 0x3ba   : > { %v5892_v22 = vpop.eup %4836 }
 0x3bb   : > { %2536 = vadd.xlane.f32.xlu0 %v5865_v55  ;;  %v5908_v50 = vpop.eup %4838  ;;  %v5917_v59 = vpop.f32.mrf.mxu3 }
 0x3c0   : > { %v2649_v21 = vpop.permute.xlu2 %2648 }
 0x3c1   : > { %1941 = vadd.xlane.f32.xlu1 %v5870_v40  ;;  %2670 = vmatpush.bf16.msra.mxu0 %v2649_v21 }
 0x3c3   : > { %v3266_v53 = vpop.permute.xlu0 %3265  ;;  %3151 = vadd.xlane.f32.xlu0 %v5875_v2 }
 0x3c4   : > { %3290 = vmatpush.bf16.msra.mxu2 %v3266_v53  ;;  %v1877_v53 = vsub.f32 %v5641_v61, %v5804_v43 }
 0x3c6   : > { %2646 = vrot.lane.b32.xlu2 %v4512_v23, %s4987_s14  ;;  %v1907_v29 = vmul.f32 1.442695, %v1877_v53 }
 0x3c9   : > { %3087 = vmax.xlane.f32.xlu1 %v5861_v19 }
 0x3ca   : > { %v1506_v47 = vpop.f32.mrf.mxu0 }
 0x3cb   : > { %v1543_v44 = vpack.c.bf16 %v1506_v47, %v1506_v47  ;;  %3091 = vmax.xlane.f32.xlu0 %v5882_v58  ;;  %v5925_v47 = vpop.f32.mrf.mxu1 }
 0x3cd   : > { %1560 = vst.msk [vmem:[#allocation5 + $0x8] sm:$0xf] %vm1557_vm1, %v1543_v44 }
 0x3ce   : > { %3261 = vrot.lane.b32.xlu2 %v4534_v45, %s4988_s15 }
 0x3d0   : > { %v5911_v20 = vpop.xlane.xlu1 %1925 }
 0x3d1   : > { %3149 = vadd.xlane.f32.xlu1 %v5889_v51 }
 0x3d2   : > { %v1508_v3 = vpop.f32.mrf.mxu0 }
 0x3d3   : > { %v1544_v10 = vpack.c.bf16 %v1508_v3, %v1508_v3  ;;  %3153 = vadd.xlane.f32.xlu0 %v5892_v22 }
 0x3d5   : > { %1561 = vst.msk [vmem:[#allocation5 + $0xc] sm:$0xf] %vm1557_vm1, %v1544_v10 }
 0x3d6   : > { %2644 = vrot.lane.b32.xlu2 %v4511_v1, %s4987_s14 }
 0x3d8   : > { %v2533_v24 = vpop.xlane.xlu1 %2532 }
 0x3d9   : > { %3089 = vmax.xlane.f32.xlu1 %v5872_v18 }
 0x3db   : > { %2470 = vmax.xlane.f32.xlu0 %v5885_v16 }
 0x3e1   : > { %2472 = vmax.xlane.f32.xlu1 %v5898_v25  ;;  %v5931_v3 = vpop.xlane.xlu1 %1931 }
 0x3e2   : > { %v1511_v35 = vpop.f32.mrf.mxu0 }
 0x3e3   : > { %v1545_v42 = vpack.c.bf16 %v1511_v35, %v1511_v35  ;;  %2540 = vadd.xlane.f32.xlu0 %v5908_v50 }
 0x3e5   : > { %1562 = vst.msk [vmem:[#allocation5 + $0x10] sm:$0xf] %vm1557_vm1, %v1545_v42  ;;  %v5941_v42 = vpop.f32.mrf.mxu1 }
 0x3e9   : > { %3093 = vmax.xlane.f32.xlu1 %v5914_v41 }
 0x3ea   : > { %v1513_v15 = vpop.f32.mrf.mxu0 }
 0x3eb   : > { %v1546_v38 = vpack.c.bf16 %v1513_v15, %v1513_v15  ;;  %2476 = vmax.xlane.f32.xlu0 %v5917_v59 }
 0x3ed   : > { %1563 = vst.msk [vmem:[#allocation5 + $0x14] sm:$0xf] %vm1557_vm1, %v1546_v38  ;;  %v2510_v38 = vmul.f32 1.442695, %v2488_v60 }
 0x3ee   : > { %v3082_v21 = vpop.xlane.xlu0 %3081 }
 0x3ef   : > { %v3107_v54 = vsub.f32 %v5778_v63, %v3082_v21 }
 0x3f1   : > { %v3129_v57 = vmul.f32 1.442695, %v3107_v54 }
 0x3f2   : > { %v1516_v23 = vpop.f32.mrf.mxu0 }
 0x3f3   : > { %4840 = vpow2.f32 %v3129_v57  ;;  %v1547_v62 = vpack.c.bf16 %v1516_v23, %v1516_v23 }
 0x3f4   : > { %4842 = vpow2.f32 %v1907_v29 }
 0x3f5   : > { %1564 = vst.msk [vmem:[#allocation5 + $0x18] sm:$0xf] %vm1557_vm1, %v1547_v62  ;;  %4844 = vrcp.f32 %v2533_v24 }
 0x3f6   : > { %v5927_v44 = vpop.xlane.xlu0 %1927 }
 0x3f9   : > { %v5929_v45 = vpop.eup %4840  ;;  %v3078_v63 = vpop.xlane.xlu2 %3077 }
 0x3fa   : > { %v3105_v10 = vsub.f32 %v5713_v17, %v3078_v63  ;;  %v1518_v61 = vpop.f32.mrf.mxu0  ;;  %3161 = vadd.xlane.f32.xlu0 %v5929_v45  ;;  %v5936_v1 = vpop.eup %4842 }
 0x3fb   : > { %v1548_v43 = vpack.c.bf16 %v1518_v61, %v1518_v61  ;;  %v5944_v17 = vpop.xlane.xlu1 %1937  ;;  %v4845_v24 = vpop.eup %4844 }
 0x3fc   : > { %v3125_v48 = vmul.f32 1.442695, %v3105_v10 }
 0x3fd   : > { %1565 = vst.msk [vmem:[#allocation5 + $0x1c] sm:$0xf] %vm1557_vm1, %v1548_v43 }
 0x3fe   : > { %4846 = vpow2.f32 %v3125_v48  ;;  %v2531_v35 = vpop.xlane.xlu0 %2530 }
 0x3ff   : > { %4848 = vrcp.f32 %v2531_v35  ;;  %1939 = vadd.xlane.f32.xlu2 %v5936_v1 }
 0x400   : > { %4850 = vrcp.f32 %v5867_v26  ;;  %v5952_v26 = vmul.f32 %v4845_v24, %v5764_v30 }
 0x401   : > { %v1922_v15 = vpop.xlane.xlu2 %1921 }
 0x402   : > { %4852 = vrcp.f32 %v1922_v15  ;;  %v1521_v21 = vpop.f32.mrf.mxu0  ;;  %3097 = vmax.xlane.f32.xlu0 %v5941_v42 }
 0x403   : > { %v1549_v54 = vpack.c.bf16 %v1521_v21, %v1521_v21  ;;  %4854 = vpow2.f32 %v2510_v38 }
 0x404   : > { %v5947_v14 = vpop.eup %4846 }
 0x405   : > { %v4849_v9 = vpop.eup %4848  ;;  %1566 = vst.msk [vmem:[#allocation5 + $0x20] sm:$0xf] %vm1557_vm1, %v1549_v54  ;;  %3157 = vadd.xlane.f32.xlu1 %v5947_v14  ;;  %v4510_v54 = vld [vmem:[#allocation4 + $0x28] sm:$0xff] }
 0x406   : > { %v4851_v53 = vpop.eup %4850  ;;  %v5955_v57 = vmul.f32 %v4849_v9, %v5799_v39  ;;  %v1934_v23 = vpop.xlane.xlu0 %1933 }
 0x407   : > { %v1963_v61 = vmul.f32 %v4851_v53, %v5735_v37 }
 0x408   : > { %v4853_v62 = vpop.eup %4852  ;;  %v2594_v29 = vpack.c.bf16 %v5952_v26, %v5955_v57 }
 0x409   : > { %v3264_v63 = vpop.permute.xlu1 %3263  ;;  %v1924_v10 = vpop.xlane.xlu2 %1923  ;;  %v1964_v43 = vmul.f32 %v4853_v62, %v5806_v28 }
 0x40a   : > { %3291 = vmatpush.bf16.msra.mxu2 %v3264_v63  ;;  %v1523_v48 = vpop.f32.mrf.mxu0  ;;  %v5961_v30 = vpop.eup %4854  ;;  %4856 = vrcp.f32 %v1924_v10 }
 0x40b   : > { %v1550_v60 = vpack.c.bf16 %v1523_v48, %v1523_v48  ;;  %v1977_v35 = vpack.c.bf16 %v1964_v43, %v1963_v61  ;;  %4858 = vrcp.f32 %v5911_v20 }
 0x40d   : > { %1567 = vst.msk [vmem:[#allocation5 + $0x24] sm:$0xf] %vm1557_vm1, %v1550_v60  ;;  %2065 = vmatmul.bf16.gmra.mxu2 %v1977_v35  ;;  %2542 = vadd.xlane.f32.xlu1 %v5961_v30 }
 0x40e   : > { %v5965_v39 = vpop.xlane.xlu0 %3085 }
 0x410   : > { %v4857_v21 = vpop.eup %4856 }
 0x411   : > { %v3084_v15 = vpop.xlane.xlu2 %3083  ;;  %v4859_v9 = vpop.eup %4858  ;;  %v1965_v62 = vmul.f32 %v4857_v21, %v5816_v13 }
 0x412   : > { %v3108_v37 = vsub.f32 %v5810_v49, %v3084_v15  ;;  %v1526_v28 = vpop.f32.mrf.mxu0  ;;  %v1966_v20 = vmul.f32 %v4859_v9, %v5755_v33 }
 0x413   : > { %v1551_v38 = vpack.c.bf16 %v1526_v28, %v1526_v28 }
 0x414   : > { %v3131_v24 = vmul.f32 1.442695, %v3108_v37  ;;  %v1978_v61 = vpack.c.bf16 %v1966_v20, %v1965_v62  ;;  %v5980_v37 = vpop.f32.mrf.mxu1  ;;  %v5987_v20 = vpop.f32.mrf.mxu3 }
 0x415   : > { %1568 = vst.msk [vmem:[#allocation5 + $0x28] sm:$0xf] %vm1557_vm1, %v1551_v38 }
 0x416   : > { %4860 = vpow2.f32 %v3131_v24  ;;  %v5970_v53 = vpop.xlane.xlu0 %2466 }
 0x417   : > { %2642 = vrot.lane.b32.xlu2 %v4510_v54, %s4987_s14 }
 0x419   : > { %v1930_v63 = vpop.xlane.xlu2 %1929 }
 0x41a   : > { %v1528_v10 = vpop.f32.mrf.mxu0  ;;  %4862 = vrcp.f32 %v1930_v63 }
 0x41b   : > { %v1552_v49 = vpack.c.bf16 %v1528_v10, %v1528_v10  ;;  %4864 = vrcp.f32 %v5927_v44 }
 0x41c   : > { %v5975_v43 = vpop.eup %4860  ;;  %4866 = vrcp.f32 %v1934_v23 }
 0x41d   : > { %1569 = vst.msk [vmem:[#allocation5 + $0x2c] sm:$0xf] %vm1557_vm1, %v1552_v49  ;;  %2070 = vmatmul.bf16.gmra.mxu2 %v1978_v61  ;;  %3163 = vadd.xlane.f32.xlu1 %v5975_v43 }
 0x41e   : > { %v2469_v48 = vpop.xlane.xlu0 %2468 }
 0x41f   : > { %v2491_v28 = vsub.f32 %v5841_v31, %v2469_v48 }
 0x420   : > { %v4863_v15 = vpop.eup %4862 }
 0x421   : > { %v1936_v60 = vpop.xlane.xlu2 %1935  ;;  %v4865_v33 = vpop.eup %4864  ;;  %v1968_v21 = vmul.f32 %v4863_v15, %v5836_v11  ;;  %v2516_v44 = vmul.f32 1.442695, %v2491_v28  ;;  %v2486_v28 = vsub.f32 %v5618_v5, %v5739_v27 }
 0x422   : > { %v1531_v35 = vpop.f32.mrf.mxu0  ;;  %v1967_v54 = vmul.f32 %v4865_v33, %v5791_v8  ;;  %v3104_v8 = vsub.f32 %v5706_v34, %v5857_v32  ;;  %v4867_v10 = vpop.eup %4866 }
 0x423   : > { %v1553_v13 = vpack.c.bf16 %v1531_v35, %v1531_v35 }
 0x424   : > { %v1979_v63 = vpack.c.bf16 %v1968_v21, %v1967_v54  ;;  %v3123_v15 = vmul.f32 1.442695, %v3104_v8  ;;  %v6414_v54 = vld [vmem:[#allocation8_spill] sm:$0xff]  ;;  %v6415_v8 = vld [vmem:[#allocation6_spill] sm:$0xff] }
 0x425   : > { %1570 = vst.msk [vmem:[#allocation5 + $0x30] sm:$0xf] %vm1557_vm1, %v1553_v13  ;;  %3099 = vmax.xlane.f32.xlu1 %v5980_v37 }
 0x426   : > { %v2535_v38 = vpop.xlane.xlu0 %2534 }
 0x427   : > { %4868 = vrcp.f32 %v2535_v38  ;;  %v1970_v38 = vmul.f32 %v4867_v10, %v5813_v36  ;;  %v2490_v10 = vsub.f32 %v5830_v4, %v5970_v53 }
 0x428   : > { %4870 = vpow2.f32 %v2516_v44 }
 0x429   : > { %v2647_v24 = vpop.permute.xlu2 %2646 }
 0x42a   : > { %v1533_v9 = vpop.f32.mrf.mxu0  ;;  %2671 = vmatpush.bf16.msra.mxu0 %v2647_v24 }
 0x42b   : > { %v1554_v62 = vpack.c.bf16 %v1533_v9, %v1533_v9 }
 0x42d   : > { %1571 = vst.msk [vmem:[#allocation5 + $0x34] sm:$0xf] %vm1557_vm1, %v1554_v62  ;;  %2075 = vmatmul.bf16.gmra.mxu2 %v1979_v63  ;;  %2478 = vmax.xlane.f32.xlu1 %v5987_v20  ;;  %v4869_v61 = vpop.eup %4868  ;;  %v2506_v62 = vmul.f32 1.442695, %v2486_v28 }
 0x42e   : > { %v2537_v31 = vpop.xlane.xlu0 %2536  ;;  %v5994_v48 = vpop.eup %4870  ;;  %v6003_v34 = vmul.f32 %v4869_v61, %v5853_v7 }
 0x42f   : > { %4872 = vrcp.f32 %v2537_v31 }
 0x430   : > { %4874 = vrcp.f32 %v5931_v3 }
 0x431   : > { %v3262_v11 = vpop.permute.xlu2 %3261  ;;  %4876 = vpow2.f32 %v3123_v15 }
 0x432   : > { %v1536_v49 = vpop.f32.mrf.mxu0  ;;  %3292 = vmatpush.bf16.msra.mxu2 %v3262_v11  ;;  %4878 = vrcp.f32 %v1936_v60  ;;  %v3106_v11 = vsub.f32 %v6415_v8, %v5903_v56 }
 0x433   : > { %v1555_v23 = vpack.c.bf16 %v1536_v49, %v1536_v49  ;;  %4880 = vpow2.f32 %v2506_v62 }
 0x434   : > { %v5996_v35 = vpop.xlane.xlu1 %1941  ;;  %4882 = vrcp.f32 %v5944_v17 }
 0x435   : > { %v4873_v13 = vpop.eup %4872  ;;  %1572 = vst.msk [vmem:[#allocation5 + $0x38] sm:$0xf] %vm1557_vm1, %v1555_v23  ;;  %2548 = vadd.xlane.f32.xlu1 %v5994_v48  ;;  %v2514_v23 = vmul.f32 1.442695, %v2490_v10 }
 0x436   : > { %v4875_v3 = vpop.eup %4874  ;;  %v6000_v33 = vpop.xlane.xlu0 %3151  ;;  %v6006_v32 = vmul.f32 %v4873_v13, %v5865_v55 }
 0x437   : > { %v1969_v44 = vmul.f32 %v4875_v3, %v6414_v54  ;;  %v6016_v27 = vpop.eup %4876 }
 0x438   : > { %v2595_v21 = vpack.c.bf16 %v6006_v32, %v6003_v34  ;;  %v4879_v49 = vpop.eup %4878 }
 0x439   : > { %v2645_v24 = vpop.permute.xlu2 %2644  ;;  %v1980_v63 = vpack.c.bf16 %v1970_v38, %v1969_v44  ;;  %v6026_v60 = vpop.eup %4880  ;;  %v1971_v56 = vmul.f32 %v4879_v49, %v5839_v6 }
 0x43a   : > { %v1538_v9 = vpop.f32.mrf.mxu0  ;;  %2672 = vmatpush.bf16.msra.mxu0 %v2645_v24  ;;  %v4883_v13 = vpop.eup %4882 }
 0x43b   : > { %v1556_v7 = vpack.c.bf16 %v1538_v9, %v1538_v9  ;;  %v1972_v17 = vmul.f32 %v4883_v13, %v5784_v46 }
 0x43c   : > { %v3088_v31 = vpop.xlane.xlu1 %3087 }
 0x43d   : > { %1573 = vst.msk [vmem:[#allocation5 + $0x3c] sm:$0xf] %vm1557_vm1, %v1556_v7  ;;  %v3110_v55 = vsub.f32 %v5861_v19, %v3088_v31  ;;  %2080 = vmatmul.bf16.gmra.mxu2 %v1980_v63  ;;  %v3127_v19 = vmul.f32 1.442695, %v3106_v11  ;;  %v1981_v53 = vpack.c.bf16 %v1972_v17, %v1971_v56  ;;  %v6416_v7 = vld [vmem:[#allocation7_spill] sm:$0xff]  ;;  %v3109_v11 = vsub.f32 %v5823_v12, %v5965_v39 }
 0x43e   : > { %v3092_v5 = vpop.xlane.xlu0 %3091  ;;  %v2489_v63 = vsub.f32 %v6416_v7, %v5863_v0 }
 0x43f   : > { %v3135_v36 = vmul.f32 1.442695, %v3110_v55  ;;  %v3112_v4 = vsub.f32 %v5882_v58, %v3092_v5  ;;  %v3133_v10 = vmul.f32 1.442695, %v3109_v11 }
 0x440   : > { %3155 = vadd.xlane.f32.xlu2 %v6016_v27  ;;  %v2512_v31 = vmul.f32 1.442695, %v2489_v63 }
 0x441   : > { %4884 = vpow2.f32 %v3135_v36  ;;  %v3139_v38 = vmul.f32 1.442695, %v3112_v4  ;;  %v6074_v4 = vpop.f32.mrf.mxu3 }
 0x442   : > { %4886 = vpow2.f32 %v3127_v19 }
 0x443   : > { %4888 = vpow2.f32 %v2514_v23 }
 0x444   : > { %v6024_v61 = vpop.xlane.xlu1 %3149  ;;  %4890 = vpow2.f32 %v3139_v38 }
 0x446   : > { %v6028_v15 = vpop.xlane.xlu0 %3153 }
 0x447   : > { %v6030_v3 = vpop.eup %4884 }
 0x448   : > { %3167 = vadd.xlane.f32.xlu0 %v6030_v3  ;;  %2538 = vadd.xlane.f32.xlu2 %v6026_v60  ;;  %v6037_v24 = vpop.eup %4886 }
 0x449   : > { %v6039_v44 = vpop.eup %4888 }
 0x44a   : > { %v6046_v62 = vpop.eup %4890 }
 0x44c   : > { %v3090_v28 = vpop.xlane.xlu1 %3089 }
 0x44d   : > { %2085 = vmatmul.bf16.gmra.mxu2 %v1981_v53 }
 0x44e   : > { %v2471_v54 = vpop.xlane.xlu0 %2470 }
 0x44f   : > { %v2492_v6 = vsub.f32 %v5885_v16, %v2471_v54 }
 0x450   : > { %2546 = vadd.xlane.f32.xlu0 %v6039_v44  ;;  %3159 = vadd.xlane.f32.xlu2 %v6037_v24 }
 0x451   : > { %v2518_v9 = vmul.f32 1.442695, %v2492_v6 }
 0x453   : > { %4892 = vpow2.f32 %v2518_v9 }
 0x454   : > { %v2473_v58 = vpop.xlane.xlu1 %2472  ;;  %4894 = vpow2.f32 %v2512_v31 }
 0x455   : > { %v2493_v53 = vsub.f32 %v5898_v25, %v2473_v58 }
 0x456   : > { %v6044_v46 = vpop.xlane.xlu0 %2540 }
 0x458   : > { %3171 = vadd.xlane.f32.xlu0 %v6046_v62  ;;  %3095 = vmax.xlane.f32.xlu2 %v5925_v47 }
 0x459   : > { %v6052_v16 = vpop.eup %4892 }
 0x45a   : > { %2550 = vadd.xlane.f32.xlu1 %v6052_v16  ;;  %v6060_v19 = vpop.eup %4894 }
 0x45c   : > { %v3094_v55 = vpop.xlane.xlu1 %3093 }
 0x45d   : > { %v3113_v5 = vsub.f32 %v5914_v41, %v3094_v55 }
 0x45e   : > { %v2477_v36 = vpop.xlane.xlu0 %2476 }
 0x45f   : > { %v3141_v8 = vmul.f32 1.442695, %v3113_v5  ;;  %v2495_v0 = vsub.f32 %v5917_v59, %v2477_v36  ;;  %v3111_v59 = vsub.f32 %v5872_v18, %v3090_v28  ;;  %v2520_v18 = vmul.f32 1.442695, %v2493_v53 }
 0x460   : > { %2474 = vmax.xlane.f32.xlu2 %v5905_v52 }
 0x461   : > { %4896 = vpow2.f32 %v3141_v8  ;;  %v2524_v49 = vmul.f32 1.442695, %v2495_v0  ;;  %v3137_v13 = vmul.f32 1.442695, %v3111_v59 }
 0x462   : > { %4898 = vpow2.f32 %v3133_v10 }
 0x463   : > { %4900 = vpow2.f32 %v2524_v49 }
 0x464   : > { %4902 = vrcp.f32 %v5996_v35 }
 0x467   : > { %v6062_v23 = vpop.eup %4896 }
 0x468   : > { %3173 = vadd.xlane.f32.xlu0 %v6062_v23  ;;  %2544 = vadd.xlane.f32.xlu2 %v6060_v19  ;;  %v6066_v41 = vpop.eup %4898 }
 0x469   : > { %v6068_v12 = vpop.eup %4900 }
 0x46a   : > { %v4903_v56 = vpop.eup %4902 }
 0x46b   : > { %v1974_v6 = vmul.f32 %v4903_v56, %v5870_v40 }
 0x46d   : > { %v3162_v59 = vpop.xlane.xlu0 %3161 }
 0x470   : > { %2556 = vadd.xlane.f32.xlu0 %v6068_v12  ;;  %3165 = vadd.xlane.f32.xlu2 %v6066_v41 }
 0x472   : > { %v1940_v39 = vpop.xlane.xlu2 %1939 }
 0x473   : > { %4904 = vrcp.f32 %v1940_v39 }
 0x474   : > { %4906 = vpow2.f32 %v3137_v13 }
 0x475   : > { %4908 = vrcp.f32 %v6024_v61 }
 0x476   : > { %4910 = vrcp.f32 %v6000_v33  ;;  %v6098_v33 = vpop.f32.mrf.mxu2 }
 0x477   : > { %4912 = vpow2.f32 %v2520_v18 }
 0x478   : > { %2480 = vmax.xlane.f32.xlu2 %v6074_v4  ;;  %v3158_v28 = vpop.xlane.xlu1 %3157 }
 0x479   : > { %v4905_v17 = vpop.eup %4904 }
 0x47a   : > { %v2643_v38 = vpop.permute.xlu2 %2642  ;;  %v1973_v54 = vmul.f32 %v4905_v17, %v5936_v1  ;;  %v6083_v9 = vpop.eup %4906 }
 0x47b   : > { %2673 = vmatpush.bf16.msra.mxu0 %v2643_v38  ;;  %v4909_v25 = vpop.eup %4908 }
 0x47c   : > { %v1982_v35 = vpack.c.bf16 %v1974_v6, %v1973_v54  ;;  %v4911_v40 = vpop.eup %4910  ;;  %v3197_v58 = vmul.f32 %v4909_v25, %v5889_v51  ;;  %v3098_v54 = vpop.xlane.xlu0 %3097 }
 0x47d   : > { %v6088_v1 = vpop.eup %4912  ;;  %v3198_v26 = vmul.f32 %v4911_v40, %v5875_v2 }
 0x47e   : > { %2090 = vmatmul.bf16.gmra.mxu2 %v1982_v35  ;;  %2674 = vmatmul.bf16.vlgmr.msra.gmra.mxu0 %v2594_v29  ;;  %v6102_v63 = vpop.f32.mrf.mxu2 }
 0x47f   : > { %v3213_v57 = vpack.c.bf16 %v3198_v26, %v3197_v58 }
 0x480   : > { %3169 = vadd.xlane.f32.xlu2 %v6083_v9  ;;  %v6091_v7 = vpop.xlane.xlu1 %2542 }
 0x486   : > { %v6105_v5 = vpop.f32.mrf.mxu2 }
 0x488   : > { %2552 = vadd.xlane.f32.xlu2 %v6088_v1 }
 0x48e   : > { %2679 = vmatmul.bf16.gmra.mxu0 %v2595_v21  ;;  %3293 = vmatmul.bf16.vlgmr.msra.gmra.mxu2 %v3213_v57  ;;  %v2063_v34 = vpop.f32.mrf.mxu2 }
 0x48f   : > { %v2099_v49 = vpack.c.bf16 %v2063_v34, %v2063_v34 }
 0x490   : > { %v3164_v29 = vpop.xlane.xlu1 %3163 }
 0x496   : > { %v6111_v8 = vpop.f32.mrf.mxu2 }
 0x498   : > { %v6100_v61 = vpop.xlane.xlu1 %3099 }
 0x49e   : > { %v6117_v56 = vpop.f32.mrf.mxu2 }
 0x4a0   : > { %v2479_v51 = vpop.xlane.xlu1 %2478 }
 0x4a1   : > { %v2496_v31 = vsub.f32 %v5987_v20, %v2479_v51 }
 0x4a3   : > { %v2526_v55 = vmul.f32 1.442695, %v2496_v31 }
 0x4a5   : > { %4914 = vpow2.f32 %v2526_v55 }
 0x4a6   : > { %4916 = vrcp.f32 %v6028_v15 }
 0x4ab   : > { %v6107_v2 = vpop.eup %4914 }
 0x4ac   : > { %2558 = vadd.xlane.f32.xlu0 %v6107_v2  ;;  %v4917_v21 = vpop.eup %4916 }
 0x4ad   : > { %v3199_v11 = vmul.f32 %v4917_v21, %v5892_v22 }
 0x4b3   : > { %v3156_v32 = vpop.xlane.xlu2 %3155 }
 0x4b4   : > { %4918 = vrcp.f32 %v3156_v32 }
 0x4b5   : > { %4920 = vrcp.f32 %v6044_v46 }
 0x4ba   : > { %v4919_v36 = vpop.eup %4918 }
 0x4bb   : > { %v2539_v20 = vpop.xlane.xlu2 %2538  ;;  %v3200_v0 = vmul.f32 %v4919_v36, %v6016_v27  ;;  %v4921_v15 = vpop.eup %4920 }
 0x4bc   : > { %4922 = vrcp.f32 %v2539_v20  ;;  %v2583_v17 = vmul.f32 %v4921_v15, %v5908_v50  ;;  %v3168_v31 = vpop.xlane.xlu0 %3167 }
 0x4bd   : > { %v3214_v10 = vpack.c.bf16 %v3200_v0, %v3199_v11  ;;  %4924 = vrcp.f32 %v3158_v28  ;;  %v6124_v28 = vpop.f32.mrf.mxu2 }
 0x4bf   : > { %3298 = vmatmul.bf16.gmra.mxu2 %v3214_v10 }
 0x4c0   : > { %2134 = vrot.lane.b32.xlu0 %v2099_v49, %s4988_s15  ;;  %v2549_v49 = vpop.xlane.xlu1 %2548 }
 0x4c2   : > { %v4923_v39 = vpop.eup %4922 }
 0x4c3   : > { %v3160_v13 = vpop.xlane.xlu2 %3159  ;;  %v2582_v46 = vmul.f32 %v4923_v39, %v6026_v60  ;;  %v4925_v27 = vpop.eup %4924  ;;  %v3115_v60 = vsub.f32 %v5941_v42, %v3098_v54 }
 0x4c4   : > { %4926 = vrcp.f32 %v3160_v13  ;;  %v3201_v35 = vmul.f32 %v4925_v27, %v5947_v14  ;;  %v2547_v11 = vpop.xlane.xlu0 %2546 }
 0x4c5   : > { %v2596_v22 = vpack.c.bf16 %v2583_v17, %v2582_v46  ;;  %v3145_v50 = vmul.f32 1.442695, %v3115_v60  ;;  %v6133_v51 = vpop.f32.mrf.mxu2 }
 0x4c7   : > { %2684 = vmatmul.bf16.gmra.mxu0 %v2596_v22 }
 0x4ca   : > { %v4927_v53 = vpop.eup %4926 }
 0x4cb   : > { %v3096_v38 = vpop.xlane.xlu2 %3095  ;;  %v3202_v18 = vmul.f32 %v4927_v53, %v6037_v24  ;;  %v3116_v24 = vsub.f32 %v5980_v37, %v6100_v61 }
 0x4cc   : > { %v3114_v6 = vsub.f32 %v5925_v47, %v3096_v38  ;;  %v3172_v53 = vpop.xlane.xlu0 %3171 }
 0x4cd   : > { %v3215_v40 = vpack.c.bf16 %v3202_v18, %v3201_v35  ;;  %v3147_v55 = vmul.f32 1.442695, %v3116_v24  ;;  %v6144_v37 = vpop.f32.mrf.mxu2 }
 0x4ce   : > { %v3143_v25 = vmul.f32 1.442695, %v3114_v6 }
 0x4cf   : > { %3303 = vmatmul.bf16.gmra.mxu2 %v3215_v40 }
 0x4d0   : > { %4928 = vpow2.f32 %v3143_v25 }
 0x4d1   : > { %4930 = vrcp.f32 %v3164_v29 }
 0x4d2   : > { %4932 = vrcp.f32 %v3162_v59 }
 0x4d3   : > { %v2475_v58 = vpop.xlane.xlu2 %2474  ;;  %4934 = vpow2.f32 %v3145_v50 }
 0x4d4   : > { %v2494_v26 = vsub.f32 %v5905_v52, %v2475_v58 }
 0x4d5   : > { %v6151_v13 = vpop.f32.mrf.mxu2 }
 0x4d6   : > { %v6128_v57 = vpop.eup %4928  ;;  %v2522_v47 = vmul.f32 1.442695, %v2494_v26 }
 0x4d7   : > { %v4931_v14 = vpop.eup %4930  ;;  %3175 = vadd.xlane.f32.xlu1 %v6128_v57 }
 0x4d8   : > { %4936 = vpow2.f32 %v2522_v47  ;;  %v4933_v42 = vpop.eup %4932  ;;  %v3204_v29 = vmul.f32 %v4931_v14, %v5975_v43 }
 0x4d9   : > { %4938 = vrcp.f32 %v6091_v7  ;;  %v3203_v34 = vmul.f32 %v4933_v42, %v5929_v45  ;;  %v6138_v32 = vpop.eup %4934 }
 0x4db   : > { %v2545_v52 = vpop.xlane.xlu2 %2544  ;;  %v3216_v36 = vpack.c.bf16 %v3204_v29, %v3203_v34 }
 0x4dc   : > { %4940 = vrcp.f32 %v2545_v52 }
 0x4dd   : > { %4942 = vpow2.f32 %v3147_v55 }
 0x4de   : > { %v6140_v21 = vpop.eup %4936  ;;  %4944 = vrcp.f32 %v3168_v31 }
 0x4df   : > { %3177 = vadd.xlane.f32.xlu1 %v6138_v32  ;;  %2554 = vadd.xlane.f32.xlu2 %v6140_v21  ;;  %v4939_v43 = vpop.eup %4938 }
 0x4e0   : > { %3308 = vmatmul.bf16.gmra.mxu2 %v3216_v36  ;;  %v2584_v45 = vmul.f32 %v4939_v43, %v5961_v30 }
 0x4e2   : > { %v4941_v7 = vpop.eup %4940 }
 0x4e3   : > { %v3166_v61 = vpop.xlane.xlu2 %3165  ;;  %v2585_v20 = vmul.f32 %v4941_v7, %v6060_v19  ;;  %v6148_v0 = vpop.eup %4942  ;;  %v2102_v7 = vpack.c.bf16 %v6124_v28, %v6124_v28 }
 0x4e4   : > { %4946 = vrcp.f32 %v3166_v61  ;;  %v4945_v15 = vpop.eup %4944 }
 0x4e5   : > { %v2597_v10 = vpack.c.bf16 %v2585_v20, %v2584_v45  ;;  %4948 = vrcp.f32 %v2547_v11  ;;  %v3206_v46 = vmul.f32 %v4945_v15, %v6030_v3  ;;  %v2551_v3 = vpop.xlane.xlu1 %2550 }
 0x4e6   : > { %4950 = vrcp.f32 %v2549_v49 }
 0x4e7   : > { %3179 = vadd.xlane.f32.xlu2 %v6148_v0  ;;  %2689 = vmatmul.bf16.gmra.mxu0 %v2597_v10 }
 0x4ea   : > { %v4947_v59 = vpop.eup %4946 }
 0x4eb   : > { %v2481_v39 = vpop.xlane.xlu2 %2480  ;;  %v3205_v19 = vmul.f32 %v4947_v59, %v6066_v41  ;;  %v4949_v27 = vpop.eup %4948 }
 0x4ec   : > { %v2497_v30 = vsub.f32 %v6074_v4, %v2481_v39  ;;  %v4951_v38 = vpop.eup %4950  ;;  %v2586_v54 = vmul.f32 %v4949_v27, %v6039_v44  ;;  %v6160_v4 = vpop.f32.mrf.mxu2 }
 0x4ed   : > { %v3217_v22 = vpack.c.bf16 %v3206_v46, %v3205_v19  ;;  %v2587_v35 = vmul.f32 %v4951_v38, %v5994_v48  ;;  %v2098_v48 = vpack.c.bf16 %v6105_v5, %v6105_v5  ;;  %v2103_v19 = vpack.c.bf16 %v6133_v51, %v6133_v51 }
 0x4ee   : > { %v2528_v17 = vmul.f32 1.442695, %v2497_v30 }
 0x4ef   : > { %v2598_v41 = vpack.c.bf16 %v2587_v35, %v2586_v54 }
 0x4f0   : > { %4952 = vpow2.f32 %v2528_v17  ;;  %3313 = vmatmul.bf16.gmra.mxu2 %v3217_v22 }
 0x4f1   : > { %4954 = vrcp.f32 %v3172_v53 }
 0x4f3   : > { %v3170_v6 = vpop.xlane.xlu2 %3169 }
 0x4f4   : > { %4956 = vrcp.f32 %v3170_v6  ;;  %v6170_v14 = vpop.f32.mrf.mxu2 }
 0x4f5   : > { %4958 = vrcp.f32 %v2551_v3 }
 0x4f6   : > { %v6158_v18 = vpop.eup %4952 }
 0x4f7   : > { %2560 = vadd.xlane.f32.xlu1 %v6158_v18  ;;  %v4955_v25 = vpop.eup %4954  ;;  %2694 = vmatmul.bf16.gmra.mxu0 %v2598_v41 }
 0x4f8   : > { %v3208_v58 = vmul.f32 %v4955_v25, %v6046_v62  ;;  %v2101_v62 = vpack.c.bf16 %v6117_v56, %v6117_v56 }
 0x4fa   : > { %v4957_v40 = vpop.eup %4956 }
 0x4fb   : > { %v6163_v60 = vpop.f32.mrf.mxu0  ;;  %v2553_v50 = vpop.xlane.xlu2 %2552  ;;  %v3207_v44 = vmul.f32 %v4957_v40, %v6083_v9 }
 0x4fc   : > { %4960 = vrcp.f32 %v2553_v50  ;;  %v4959_v47 = vpop.eup %4958  ;;  %v6179_v5 = vpop.f32.mrf.mxu2 }
 0x4fd   : > { %v3218_v26 = vpack.c.bf16 %v3208_v58, %v3207_v44  ;;  %v2588_v29 = vmul.f32 %v4959_v47, %v6052_v16  ;;  %v2100_v16 = vpack.c.bf16 %v6111_v8, %v6111_v8 }
 0x4ff   : > { %2132 = vrot.lane.b32.xlu2 %v2098_v48, %s4988_s15 }
 0x500   : > { %3318 = vmatmul.bf16.gmra.mxu2 %v3218_v26 }
 0x502   : > { %v4961_v24 = vpop.eup %4960 }
 0x503   : > { %v6172_v42 = vpop.f32.mrf.mxu0  ;;  %v2589_v9 = vmul.f32 %v4961_v24, %v6088_v1  ;;  %v3174_v1 = vpop.xlane.xlu0 %3173 }
 0x504   : > { %v6182_v36 = vpop.f32.mrf.mxu2  ;;  %4962 = vrcp.f32 %v3174_v1 }
 0x505   : > { %v2599_v31 = vpack.c.bf16 %v2589_v9, %v2588_v29 }
 0x507   : > { %2138 = vrot.lane.b32.xlu2 %v2101_v62, %s4988_s15  ;;  %2699 = vmatmul.bf16.gmra.mxu0 %v2599_v31 }
 0x50a   : > { %v4963_v27 = vpop.eup %4962 }
 0x50b   : > { %v2680_v52 = vpop.f32.mrf.mxu0  ;;  %v2557_v61 = vpop.xlane.xlu0 %2556  ;;  %v3209_v54 = vmul.f32 %v4963_v27, %v6062_v23  ;;  %v2106_v27 = vpack.c.bf16 %v6160_v4, %v6160_v4 }
 0x50c   : > { %v2717_v55 = vpack.c.bf16 %v2680_v52, %v2680_v52  ;;  %v6188_v56 = vpop.f32.mrf.mxu2 }
 0x510   : > { %2751 = vrot.lane.b32.xlu1 %v2717_v55, %s4987_s14 }
 0x513   : > { %v2682_v34 = vpop.f32.mrf.mxu0 }
 0x514   : > { %v2718_v43 = vpack.c.bf16 %v2682_v34, %v2682_v34  ;;  %v6193_v45 = vpop.f32.mrf.mxu2 }
 0x515   : > { %v2111_v4 = vpack.c.bf16 %v6193_v45, %v6193_v45  ;;  %v2108_v45 = vpack.c.bf16 %v6179_v5, %v6179_v5  ;;  %v4552_v5 = vld [vmem:[%s6405_s9 + $0x10] sm:$0xff] }
 0x516   : > { %2753 = vrot.lane.b32.xlu0 %v2718_v43, %s4987_s14 }
 0x518   : > { %2136 = vrot.lane.b32.xlu1 %v2100_v16, %s4988_s15 }
 0x51c   : > { %v6195_v11 = vpop.f32.mrf.mxu2 }
 0x51f   : > { %v2559_v20 = vpop.xlane.xlu0 %2558 }
 0x520   : > { %2140 = vrot.lane.b32.xlu1 %v2102_v7, %s4988_s15 }
 0x524   : > { %v6198_v10 = vpop.f32.mrf.mxu2 }
 0x532   : > { %v2135_v8 = vpop.permute.xlu0 %2134 }
 0x533   : > { %2180 = vst.msk [vmem:[#allocation5 + $0xc] sm:$0xf] %vm2176_vm2, %v2135_v8 }
 0x542   : > { %v3299_v49 = vpop.f32.mrf.mxu2 }
 0x543   : > { %v3336_v15 = vpack.c.bf16 %v3299_v49, %v3299_v49 }
 0x544   : > { %v2685_v59 = vpop.f32.mrf.mxu0 }
 0x545   : > { %3370 = vrot.lane.b32.xlu2 %v3336_v15, %s4986_s13  ;;  %v2719_v28 = vpack.c.bf16 %v2685_v59, %v2685_v59 }
 0x547   : > { %2755 = vrot.lane.b32.xlu0 %v2719_v28, %s4987_s14 }
 0x54a   : > { %v3301_v39 = vpop.f32.mrf.mxu2  ;;  %v3176_v30 = vpop.xlane.xlu1 %3175 }
 0x54b   : > { %4964 = vrcp.f32 %v3176_v30  ;;  %v3337_v17 = vpack.c.bf16 %v3301_v39, %v3301_v39 }
 0x54c   : > { %v2687_v46 = vpop.f32.mrf.mxu0  ;;  %4966 = vrcp.f32 %v2557_v61 }
 0x54d   : > { %2142 = vrot.lane.b32.xlu2 %v2103_v19, %s4988_s15  ;;  %v2720_v22 = vpack.c.bf16 %v2687_v46, %v2687_v46 }
 0x54f   : > { %3372 = vrot.lane.b32.xlu0 %v3337_v17, %s4986_s13  ;;  %2757 = vrot.lane.b32.xlu1 %v2720_v22, %s4987_s14 }
 0x551   : > { %v4965_v53 = vpop.eup %4964 }
 0x552   : > { %v2555_v38 = vpop.xlane.xlu2 %2554  ;;  %v3210_v6 = vmul.f32 %v4965_v53, %v6128_v57  ;;  %v3304_v35 = vpop.f32.mrf.mxu2  ;;  %v2105_v57 = vpack.c.bf16 %v6151_v13, %v6151_v13 }
 0x553   : > { %v3338_v51 = vpack.c.bf16 %v3304_v35, %v3304_v35  ;;  %4968 = vrcp.f32 %v2555_v38  ;;  %v3178_v3 = vpop.xlane.xlu1 %3177  ;;  %v4967_v25 = vpop.eup %4966  ;;  %v4557_v38 = vld [vmem:[%s6405_s9 + $0x38] sm:$0xff] }
 0x554   : > { %v3219_v41 = vpack.c.bf16 %v3210_v6, %v3209_v54  ;;  %4970 = vrcp.f32 %v3178_v3  ;;  %v2591_v23 = vmul.f32 %v4967_v25, %v6068_v12  ;;  %4699 = vmatpush.bf16.msra.mxu3 %v4557_v38  ;;  %3563 = vmatpush.bf16.msrb.mxu0 %v4557_v38  ;;  %v4555_v25 = vld [vmem:[%s6405_s9 + $0x28] sm:$0xff] }
 0x555   : > { %3374 = vrot.lane.b32.xlu2 %v3338_v51, %s4986_s13 }
 0x556   : > { %3323 = vmatmul.bf16.gmra.mxu2 %v3219_v41  ;;  %v4556_v41 = vld [vmem:[%s6405_s9 + $0x30] sm:$0xff] }
 0x558   : > { %4700 = vmatpush.bf16.msra.mxu3 %v4556_v41  ;;  %3564 = vmatpush.bf16.msrb.mxu0 %v4556_v41  ;;  %v2716_v41 = vpack.c.bf16 %v6172_v42, %v6172_v42  ;;  %v6339_v42 = vld [vmem:[%s6406_s10] ss:$0 sm:$0xff] }
 0x559   : > { %v4969_v40 = vpop.eup %4968 }
 0x55a   : > { %v3180_v50 = vpop.xlane.xlu2 %3179  ;;  %v3306_v44 = vpop.f32.mrf.mxu2  ;;  %v2590_v58 = vmul.f32 %v4969_v40, %v6140_v21  ;;  %v4554_v40 = vld [vmem:[%s6405_s9 + $0x20] sm:$0xff] }
 0x55b   : > { %4972 = vrcp.f32 %v3180_v50  ;;  %v4971_v26 = vpop.eup %4970  ;;  %v3339_v43 = vpack.c.bf16 %v3306_v44, %v3306_v44  ;;  %v4553_v50 = vld [vmem:[%s6405_s9 + $0x18] sm:$0xff] }
 0x55c   : > { %v2600_v48 = vpack.c.bf16 %v2591_v23, %v2590_v58  ;;  %v3211_v29 = vmul.f32 %v4971_v26, %v6138_v32  ;;  %4974 = vrcp.f32 %v2559_v20  ;;  %v2107_v32 = vpack.c.bf16 %v6170_v14, %v6170_v14  ;;  %4701 = vmatpush.bf16.msra.mxu3 %v4555_v25  ;;  %3565 = vmatpush.bf16.msrb.mxu0 %v4555_v25  ;;  %v4551_v58 = vld [vmem:[%s6405_s9 + $0x8] sm:$0xff] }
 0x55d   : > { %2146 = vrot.lane.b32.xlu2 %v2105_v57, %s4988_s15  ;;  %v2104_v14 = vpack.c.bf16 %v6144_v37, %v6144_v37  ;;  %v4550_v57 = vld [vmem:[%s6405_s9] sm:$0xff] }
 0x55e   : > { %2704 = vmatmul.bf16.gmra.mxu0 %v2600_v48 }
 0x560   : > { %4702 = vmatpush.bf16.msra.mxu3 %v4554_v40  ;;  %3566 = vmatpush.bf16.msrb.mxu0 %v4554_v40 }
 0x561   : > { %v4973_v47 = vpop.eup %4972 }
 0x562   : > { %v2133_v24 = vpop.permute.xlu2 %2132  ;;  %v3212_v9 = vmul.f32 %v4973_v47, %v6148_v0  ;;  %v4975_v1 = vpop.eup %4974 }
 0x563   : > { %v3309_v62 = vpop.f32.mrf.mxu2  ;;  %2179 = vst.msk [vmem:[#allocation5 + $0x8] sm:$0xf] %vm2176_vm2, %v2133_v24  ;;  %v2592_v61 = vmul.f32 %v4975_v1, %v6107_v2  ;;  %v2109_v2 = vpack.c.bf16 %v6182_v36, %v6182_v36  ;;  %v2097_v1 = vpack.c.bf16 %v6102_v63, %v6102_v63 }
 0x564   : > { %v3340_v21 = vpack.c.bf16 %v3309_v62, %v3309_v62  ;;  %v3220_v31 = vpack.c.bf16 %v3212_v9, %v3211_v29  ;;  %v2690_v12 = vpop.f32.mrf.mxu0  ;;  %4703 = vmatpush.bf16.msra.mxu3 %v4553_v50  ;;  %3567 = vmatpush.bf16.msrb.mxu0 %v4553_v50 }
 0x565   : > { %v2721_v52 = vpack.c.bf16 %v2690_v12, %v2690_v12 }
 0x566   : > { %3378 = vrot.lane.b32.xlu2 %v3340_v21, %s4986_s13  ;;  %3328 = vmatmul.bf16.gmra.mxu2 %v3220_v31 }
 0x567   : > { %2759 = vrot.lane.b32.xlu0 %v2721_v52, %s4987_s14 }
 0x568   : > { %4704 = vmatpush.bf16.msra.mxu3 %v4552_v5  ;;  %3568 = vmatpush.bf16.msrb.mxu0 %v4552_v5 }
 0x56a   : > { %v2561_v13 = vpop.xlane.xlu1 %2560  ;;  %v2139_v55 = vpop.permute.xlu2 %2138 }
 0x56b   : > { %v3311_v34 = vpop.f32.mrf.mxu2  ;;  %4976 = vrcp.f32 %v2561_v13  ;;  %2182 = vst.msk [vmem:[#allocation5 + $0x14] sm:$0xf] %vm2176_vm2, %v2139_v55 }
 0x56c   : > { %v2692_v0 = vpop.f32.mrf.mxu0  ;;  %v3341_v30 = vpack.c.bf16 %v3311_v34, %v3311_v34  ;;  %4705 = vmatpush.bf16.msra.mxu3 %v4551_v58  ;;  %3569 = vmatpush.bf16.msrb.mxu0 %v4551_v58 }
 0x56d   : > { %v2722_v16 = vpack.c.bf16 %v2692_v0, %v2692_v0 }
 0x56e   : > { %2150 = vrot.lane.b32.xlu2 %v2107_v32, %s4988_s15 }
 0x56f   : > { %3376 = vrot.lane.b32.xlu0 %v3339_v43, %s4986_s13  ;;  %2761 = vrot.lane.b32.xlu1 %v2722_v16, %s4987_s14 }
 0x570   : > { %4706 = vmatpush.bf16.msra.mxu3 %v4550_v57  ;;  %3570 = vmatpush.bf16.msrb.mxu0 %v4550_v57 }
 0x571   : > { %v4977_v7 = vpop.eup %4976 }
 0x572   : > { %v2593_v20 = vmul.f32 %v4977_v7, %v6158_v18 }
 0x573   : > { %v3314_v8 = vpop.f32.mrf.mxu2 }
 0x574   : > { %v3342_v49 = vpack.c.bf16 %v3314_v8, %v3314_v8  ;;  %v2601_v15 = vpack.c.bf16 %v2593_v20, %v2592_v61  ;;  %v2695_v59 = vpop.f32.mrf.mxu0 }
 0x575   : > { %v2723_v28 = vpack.c.bf16 %v2695_v59, %v2695_v59 }
 0x576   : > { %3382 = vrot.lane.b32.xlu2 %v3342_v49, %s4986_s13  ;;  %2709 = vmatmul.bf16.gmra.mxu0 %v2601_v15 }
 0x577   : > { %2763 = vrot.lane.b32.xlu0 %v2723_v28, %s4987_s14  ;;  %2144 = vrot.lane.b32.xlu1 %v2104_v14, %s4988_s15 }
 0x57b   : > { %v3316_v39 = vpop.f32.mrf.mxu2 }
 0x57c   : > { %v2697_v18 = vpop.f32.mrf.mxu0  ;;  %v3343_v35 = vpack.c.bf16 %v3316_v39, %v3316_v39 }
 0x57d   : > { %v2724_v19 = vpack.c.bf16 %v2697_v18, %v2697_v18  ;;  %v3334_v18 = vpack.c.bf16 %v6195_v11, %v6195_v11 }
 0x57e   : > { %2154 = vrot.lane.b32.xlu2 %v2109_v2, %s4988_s15  ;;  %v2110_v2 = vpack.c.bf16 %v6188_v56, %v6188_v56 }
 0x57f   : > { %3380 = vrot.lane.b32.xlu0 %v3341_v30, %s4986_s13  ;;  %2765 = vrot.lane.b32.xlu1 %v2724_v19, %s4987_s14 }
 0x582   : > { %v2752_v37 = vpop.permute.xlu1 %2751 }
 0x583   : > { %2798 = vst.msk [vmem:[#allocation5 + $0x8] sm:$0xf] %vm2795_vm3, %v2752_v37  ;;  %v3319_v46 = vpop.f32.mrf.mxu2 }
 0x584   : > { %v3344_v17 = vpack.c.bf16 %v3319_v46, %v3319_v46  ;;  %v2700_v22 = vpop.f32.mrf.mxu0 }
 0x585   : > { %v2725_v36 = vpack.c.bf16 %v2700_v22, %v2700_v22 }
 0x586   : > { %3386 = vrot.lane.b32.xlu2 %v3344_v17, %s4986_s13 }
 0x587   : > { %2148 = vrot.lane.b32.xlu1 %v2106_v27, %s4988_s15  ;;  %2767 = vrot.lane.b32.xlu0 %v2725_v36, %s4987_s14 }
 0x588   : > { %v2754_v53 = vpop.permute.xlu0 %2753 }
 0x589   : > { %2799 = vst.msk [vmem:[#allocation5 + $0xc] sm:$0xf] %vm2795_vm3, %v2754_v53 }
 0x58a   : > { %v2137_v54 = vpop.permute.xlu1 %2136 }
 0x58b   : > { %2181 = vst.msk [vmem:[#allocation5 + $0x10] sm:$0xf] %vm2176_vm2, %v2137_v54  ;;  %v3321_v12 = vpop.f32.mrf.mxu2  ;;  %v2096_v54 = vpack.c.bf16 %v6098_v33, %v6098_v33  ;;  %v3335_v33 = vpack.c.bf16 %v6198_v10, %v6198_v10 }
 0x58c   : > { %v2702_v6 = vpop.f32.mrf.mxu0  ;;  %v3345_v8 = vpack.c.bf16 %v3321_v12, %v3321_v12 }
 0x58d   : > { %v2726_v51 = vpack.c.bf16 %v2702_v6, %v2702_v6 }
 0x58e   : > { %2158 = vrot.lane.b32.xlu2 %v2111_v4, %s4988_s15  ;;  %v2715_v4 = vpack.c.bf16 %v6163_v60, %v6163_v60 }
 0x58f   : > { %3384 = vrot.lane.b32.xlu0 %v3343_v35, %s4986_s13  ;;  %2769 = vrot.lane.b32.xlu1 %v2726_v51, %s4987_s14 }
 0x592   : > { %v2141_v3 = vpop.permute.xlu1 %2140 }
 0x593   : > { %2183 = vst.msk [vmem:[#allocation5 + $0x18] sm:$0xf] %vm2176_vm2, %v2141_v3 }
 0x597   : > { %2152 = vrot.lane.b32.xlu1 %v2108_v45, %s4988_s15 }
 0x59f   : > { %v3371_v44 = vpop.permute.xlu2 %3370 }
 0x5a0   : > { %3417 = vst.msk [vmem:[#allocation5 + $0x8] sm:$0xf] %vm3414_vm4, %v3371_v44 }
 0x5a7   : > { %v2143_v23 = vpop.permute.xlu2 %2142 }
 0x5a8   : > { %2184 = vst.msk [vmem:[#allocation5 + $0x1c] sm:$0xf] %vm2176_vm2, %v2143_v23 }
 0x5af   : > { %v3375_v48 = vpop.permute.xlu2 %3374 }
 0x5b7   : > { %v2147_v26 = vpop.permute.xlu2 %2146 }
 0x5b8   : > { %2186 = vst.msk [vmem:[#allocation5 + $0x24] sm:$0xf] %vm2176_vm2, %v2147_v26 }
 0x5b9   : > { %v2756_v47 = vpop.permute.xlu0 %2755 }
 0x5ba   : > { %2800 = vst.msk [vmem:[#allocation5 + $0x10] sm:$0xf] %vm2795_vm3, %v2756_v47 }
 0x5bb   : > { %3419 = vst.msk [vmem:[#allocation5 + $0x10] sm:$0xf] %vm3414_vm4, %v3375_v48 }
 0x5c0   : > { %v3379_v24 = vpop.permute.xlu2 %3378 }
 0x5c1   : > { %v3373_v29 = vpop.permute.xlu0 %3372  ;;  %v2758_v9 = vpop.permute.xlu1 %2757 }
 0x5c2   : > { %3418 = vst.msk [vmem:[#allocation5 + $0xc] sm:$0xf] %vm3414_vm4, %v3373_v29 }
 0x5c3   : > { %2801 = vst.msk [vmem:[#allocation5 + $0x14] sm:$0xf] %vm2795_vm3, %v2758_v9 }
 0x5c8   : > { %v2151_v62 = vpop.permute.xlu2 %2150 }
 0x5c9   : > { %2188 = vst.msk [vmem:[#allocation5 + $0x2c] sm:$0xf] %vm2176_vm2, %v2151_v62  ;;  %v4543_v21 = vld [vmem:[#allocation5 + $0x8] sm:$0xff] }
 0x5ca   : > { %3576 = vmatmul.bf16.vlgmr.msra.gmra.mxu3 %v4543_v21 }
 0x5d0   : > { %v3383_v31 = vpop.permute.xlu2 %3382 }
 0x5d8   : > { %v2155_v52 = vpop.permute.xlu2 %2154 }
 0x5d9   : > { %2190 = vst.msk [vmem:[#allocation5 + $0x34] sm:$0xf] %vm2176_vm2, %v2155_v52  ;;  %v3324_v13 = vpop.f32.mrf.mxu2  ;;  %v2760_v55 = vpop.permute.xlu0 %2759 }
 0x5da   : > { %v3346_v34 = vpack.c.bf16 %v3324_v13, %v3324_v13  ;;  %2802 = vst.msk [vmem:[#allocation5 + $0x18] sm:$0xf] %vm2795_vm3, %v2760_v55 }
 0x5db   : > { %3421 = vst.msk [vmem:[#allocation5 + $0x18] sm:$0xf] %vm3414_vm4, %v3379_v24  ;;  %v2705_v32 = vpop.f32.mrf.mxu0 }
 0x5dc   : > { %3390 = vrot.lane.b32.xlu2 %v3346_v34, %s4986_s13  ;;  %v2727_v0 = vpack.c.bf16 %v2705_v32, %v2705_v32 }
 0x5de   : > { %2771 = vrot.lane.b32.xlu0 %v2727_v0, %s4987_s14 }
 0x5e0   : > { %v3387_v43 = vpop.permute.xlu2 %3386 }
 0x5e1   : > { %v3326_v16 = vpop.f32.mrf.mxu2  ;;  %v3377_v7 = vpop.permute.xlu0 %3376 }
 0x5e2   : > { %v2762_v61 = vpop.permute.xlu1 %2761  ;;  %3420 = vst.msk [vmem:[#allocation5 + $0x14] sm:$0xf] %vm3414_vm4, %v3377_v7  ;;  %v3347_v36 = vpack.c.bf16 %v3326_v16, %v3326_v16 }
 0x5e3   : > { %2803 = vst.msk [vmem:[#allocation5 + $0x1c] sm:$0xf] %vm2795_vm3, %v2762_v61  ;;  %v2707_v20 = vpop.f32.mrf.mxu0 }
 0x5e4   : > { %2130 = vrot.lane.b32.xlu2 %v2097_v1, %s4988_s15  ;;  %v2728_v49 = vpack.c.bf16 %v2707_v20, %v2707_v20 }
 0x5e6   : > { %3388 = vrot.lane.b32.xlu0 %v3345_v8, %s4986_s13  ;;  %2773 = vrot.lane.b32.xlu1 %v2728_v49, %s4987_s14 }
 0x5e8   : > { %v2159_v15 = vpop.permute.xlu2 %2158 }
 0x5e9   : > { %2192 = vst.msk [vmem:[#allocation5 + $0x3c] sm:$0xf] %vm2176_vm2, %v2159_v15  ;;  %v3329_v59 = vpop.f32.mrf.mxu2  ;;  %v2764_v63 = vpop.permute.xlu0 %2763  ;;  %v4544_v39 = vld [vmem:[#allocation5 + $0x10] sm:$0xff] }
 0x5ea   : > { %v2145_v14 = vpop.permute.xlu1 %2144  ;;  %v3348_v28 = vpack.c.bf16 %v3329_v59, %v3329_v59  ;;  %3581 = vmatmul.bf16.gmra.mxu3 %v4544_v39 }
 0x5eb   : > { %2185 = vst.msk [vmem:[#allocation5 + $0x20] sm:$0xf] %vm2176_vm2, %v2145_v14 }
 0x5ec   : > { %2804 = vst.msk [vmem:[#allocation5 + $0x20] sm:$0xf] %vm2795_vm3, %v2764_v63  ;;  %3394 = vrot.lane.b32.xlu2 %v3348_v28, %s4986_s13 }
 0x5ed   : > { %3423 = vst.msk [vmem:[#allocation5 + $0x20] sm:$0xf] %vm3414_vm4, %v3383_v31 }
 0x5ee   : > { %2156 = vrot.lane.b32.xlu1 %v2110_v2, %s4988_s15 }
 0x5f1   : > { %v3381_v30 = vpop.permute.xlu0 %3380  ;;  %v3331_v6 = vpop.f32.mrf.mxu2 }
 0x5f2   : > { %v2766_v19 = vpop.permute.xlu1 %2765  ;;  %3422 = vst.msk [vmem:[#allocation5 + $0x1c] sm:$0xf] %vm3414_vm4, %v3381_v30  ;;  %v3349_v3 = vpack.c.bf16 %v3331_v6, %v3331_v6 }
 0x5f3   : > { %v2710_v37 = vpop.f32.mrf.mxu0  ;;  %2805 = vst.msk [vmem:[#allocation5 + $0x24] sm:$0xf] %vm2795_vm3, %v2766_v19 }
 0x5f4   : > { %v2729_v46 = vpack.c.bf16 %v2710_v37, %v2710_v37  ;;  %3366 = vrot.lane.b32.xlu2 %v3334_v18, %s4986_s13 }
 0x5f6   : > { %2775 = vrot.lane.b32.xlu0 %v2729_v46, %s4987_s14 }
 0x5f9   : > { %v2768_v17 = vpop.permute.xlu0 %2767  ;;  %v4545_v22 = vld [vmem:[#allocation5 + $0x18] sm:$0xff] }
 0x5fa   : > { %v2149_v56 = vpop.permute.xlu1 %2148  ;;  %3586 = vmatmul.bf16.gmra.mxu3 %v4545_v22 }
 0x5fb   : > { %2187 = vst.msk [vmem:[#allocation5 + $0x28] sm:$0xf] %vm2176_vm2, %v2149_v56  ;;  %v2712_v27 = vpop.f32.mrf.mxu0 }
 0x5fc   : > { %2806 = vst.msk [vmem:[#allocation5 + $0x28] sm:$0xf] %vm2795_vm3, %v2768_v17  ;;  %v2730_v11 = vpack.c.bf16 %v2712_v27, %v2712_v27 }
 0x5fd   : > { %3425 = vst.msk [vmem:[#allocation5 + $0x28] sm:$0xf] %vm3414_vm4, %v3387_v43 }
 0x5fe   : > { %3392 = vrot.lane.b32.xlu0 %v3347_v36, %s4986_s13  ;;  %2777 = vrot.lane.b32.xlu1 %v2730_v11, %s4987_s14 }
 0x601   : > { %v3385_v53 = vpop.permute.xlu0 %3384 }
 0x602   : > { %v2770_v38 = vpop.permute.xlu1 %2769  ;;  %3424 = vst.msk [vmem:[#allocation5 + $0x24] sm:$0xf] %vm3414_vm4, %v3385_v53 }
 0x603   : > { %2807 = vst.msk [vmem:[#allocation5 + $0x2c] sm:$0xf] %vm2795_vm3, %v2770_v38 }
 0x606   : > { %2747 = vrot.lane.b32.xlu0 %v2715_v4, %s4987_s14  ;;  %2128 = vrot.lane.b32.xlu1 %v2096_v54, %s4988_s15  ;;  %s4397_s15 = sshll.u32 %s6418_s18, 7 }
 0x609   : > { %v4546_v51 = vld [vmem:[#allocation5 + $0x20] sm:$0xff] }
 0x60a   : > { %v2153_v35 = vpop.permute.xlu1 %2152  ;;  %3591 = vmatmul.bf16.gmra.mxu3 %v4546_v51 }
 0x60b   : > { %2189 = vst.msk [vmem:[#allocation5 + $0x30] sm:$0xf] %vm2176_vm2, %v2153_v35 }
 0x60e   : > { %2749 = vrot.lane.b32.xlu1 %v2716_v41, %s4987_s14  ;;  %3396 = vrot.lane.b32.xlu0 %v3349_v3, %s4986_s13  ;;  %s6344_s14 = scalar_lea.vmem %s6407_s11, %s4397_s15 }
 0x616   : > { %3368 = vrot.lane.b32.xlu0 %v3335_v33, %s4986_s13 }
 0x636   : > { %v3391_v60 = vpop.permute.xlu2 %3390 }
 0x63e   : > { %v2131_v25 = vpop.permute.xlu2 %2130 }
 0x63f   : > { %2178 = vst.msk [vmem:[#allocation5 + $0x4] sm:$0xf] %vm2176_vm2, %v2131_v25 }
 0x646   : > { %v3395_v26 = vpop.permute.xlu2 %3394 }
 0x64d   : > { %v3577_v10 = vpop.f32.mrf.mxu3 }
 0x64e   : > { %v3578_v45 = vadd.f32 %v6339_v42, %v3577_v10  ;;  %v3367_v13 = vpop.permute.xlu2 %3366 }
 0x650   : > { %v2772_v40 = vpop.permute.xlu0 %2771  ;;  %3614 = vst [vmem:[%s6344_s14 + $0x10] sm:$0xff] %v3578_v45 }
 0x651   : > { %2808 = vst.msk [vmem:[#allocation5 + $0x30] sm:$0xf] %vm2795_vm3, %v2772_v40 }
 0x652   : > { %3427 = vst.msk [vmem:[#allocation5 + $0x30] sm:$0xf] %vm3414_vm4, %v3391_v60 }
 0x655   : > { %v3579_v50 = vpop.f32.mrf.mxu3 }
 0x656   : > { %v3580_v44 = vadd.f32 %v6339_v42, %v3579_v50 }
 0x658   : > { %v3389_v5 = vpop.permute.xlu0 %3388  ;;  %v2774_v58 = vpop.permute.xlu1 %2773  ;;  %3615 = vst [vmem:[%s6344_s14 + $0x18] sm:$0xff] %v3580_v44 }
 0x659   : > { %3426 = vst.msk [vmem:[#allocation5 + $0x2c] sm:$0xf] %vm3414_vm4, %v3389_v5 }
 0x65a   : > { %2809 = vst.msk [vmem:[#allocation5 + $0x34] sm:$0xf] %vm2795_vm3, %v2774_v58 }
 0x660   : > { %v2157_v23 = vpop.permute.xlu1 %2156  ;;  %v4547_v57 = vld [vmem:[#allocation5 + $0x28] sm:$0xff] }
 0x661   : > { %2191 = vst.msk [vmem:[#allocation5 + $0x38] sm:$0xf] %vm2176_vm2, %v2157_v23  ;;  %3596 = vmatmul.bf16.gmra.mxu3 %v4547_v57 }
 0x668   : > { %v2776_v48 = vpop.permute.xlu0 %2775 }
 0x669   : > { %2810 = vst.msk [vmem:[#allocation5 + $0x38] sm:$0xf] %vm2795_vm3, %v2776_v48 }
 0x66a   : > { %3429 = vst.msk [vmem:[#allocation5 + $0x38] sm:$0xf] %vm3414_vm4, %v3395_v26 }
 0x66d   : > { %v3582_v47 = vpop.f32.mrf.mxu3 }
 0x66e   : > { %v3583_v24 = vadd.f32 %v6339_v42, %v3582_v47 }
 0x670   : > { %v3393_v29 = vpop.permute.xlu0 %3392  ;;  %v2778_v9 = vpop.permute.xlu1 %2777  ;;  %3616 = vst [vmem:[%s6344_s14 + $0x20] sm:$0xff] %v3583_v24 }
 0x671   : > { %3428 = vst.msk [vmem:[#allocation5 + $0x34] sm:$0xf] %vm3414_vm4, %v3393_v29 }
 0x672   : > { %2811 = vst.msk [vmem:[#allocation5 + $0x3c] sm:$0xf] %vm2795_vm3, %v2778_v9 }
 0x675   : > { %v3584_v62 = vpop.f32.mrf.mxu3 }
 0x676   : > { %v3585_v21 = vadd.f32 %v6339_v42, %v3584_v62 }
 0x678   : > { %v2748_v31 = vpop.permute.xlu0 %2747  ;;  %v2129_v12 = vpop.permute.xlu1 %2128  ;;  %v4548_v52 = vld [vmem:[#allocation5 + $0x30] sm:$0xff]  ;;  %3617 = vst [vmem:[%s6344_s14 + $0x28] sm:$0xff] %v3585_v21 }
 0x679   : > { %2177 = vst.msk [vmem:[#allocation5] sm:$0xf] %vm2176_vm2, %v2129_v12  ;;  %3601 = vmatmul.bf16.gmra.mxu3 %v4548_v52 }
 0x67a   : > { %2796 = vst.msk [vmem:[#allocation5] sm:$0xf] %vm2795_vm3, %v2748_v31 }
 0x67b   : > { %3415 = vst.msk [vmem:[#allocation5] sm:$0xf] %vm3414_vm4, %v3367_v13 }
 0x67d   : > { %v3587_v55 = vpop.f32.mrf.mxu3 }
 0x67e   : > { %v3588_v34 = vadd.f32 %v6339_v42, %v3587_v55 }
 0x680   : > { %v2750_v32 = vpop.permute.xlu1 %2749  ;;  %v3397_v0 = vpop.permute.xlu0 %3396  ;;  %3618 = vst [vmem:[%s6344_s14 + $0x30] sm:$0xff] %v3588_v34 }
 0x681   : > { %2797 = vst.msk [vmem:[#allocation5 + $0x4] sm:$0xf] %vm2795_vm3, %v2750_v32 }
 0x682   : > { %3430 = vst.msk [vmem:[#allocation5 + $0x3c] sm:$0xf] %vm3414_vm4, %v3397_v0 }
 0x685   : > { %v3589_v43 = vpop.f32.mrf.mxu3 }
 0x686   : > { %v3590_v16 = vadd.f32 %v6339_v42, %v3589_v43 }
 0x688   : > { %v3369_v1 = vpop.permute.xlu0 %3368  ;;  %3619 = vst [vmem:[%s6344_s14 + $0x38] sm:$0xff] %v3590_v16 }
 0x689   : > { %3416 = vst.msk [vmem:[#allocation5 + $0x4] sm:$0xf] %vm3414_vm4, %v3369_v1  ;;  %v4549_v7 = vld [vmem:[#allocation5 + $0x38] sm:$0xff] }
 0x68a   : > { %3606 = vmatmul.bf16.gmra.mxu3 %v4549_v7 }
 0x68d   : > { %v3592_v61 = vpop.f32.mrf.mxu3 }
 0x68e   : > { %v3593_v20 = vadd.f32 %v6339_v42, %v3592_v61 }
 0x690   : > { %v4542_v8 = vld [vmem:[#allocation5] sm:$0xff]  ;;  %3620 = vst [vmem:[%s6344_s14 + $0x40] sm:$0xff] %v3593_v20 }
 0x691   : > { %3571 = vmatmul.bf16.vlgmr.msrb.gmra.mxu0 %v4542_v8 }
 0x695   : > { %v3594_v49 = vpop.f32.mrf.mxu3 }
 0x696   : > { %v3595_v15 = vadd.f32 %v6339_v42, %v3594_v49 }
 0x698   : > { %3621 = vst [vmem:[%s6344_s14 + $0x48] sm:$0xff] %v3595_v15 }
 0x6e4   : > { %v3597_v59 = vpop.f32.mrf.mxu3 }
 0x6e5   : > { %v3598_v63 = vadd.f32 %v6339_v42, %v3597_v59 }
 0x6e7   : > { %3622 = vst [vmem:[%s6344_s14 + $0x50] sm:$0xff] %v3598_v63 }
 0x6ec   : > { %v3599_v14 = vpop.f32.mrf.mxu3 }
 0x6ed   : > { %v3600_v28 = vadd.f32 %v6339_v42, %v3599_v14 }
 0x6ef   : > { %3623 = vst [vmem:[%s6344_s14 + $0x58] sm:$0xff] %v3600_v28 }
 0x6fc   : > { %v3602_v39 = vpop.f32.mrf.mxu3 }
 0x6fd   : > { %v3603_v2 = vadd.f32 %v6339_v42, %v3602_v39 }
 0x6ff   : > { %3624 = vst [vmem:[%s6344_s14 + $0x60] sm:$0xff] %v3603_v2 }
 0x704   : > { %v3604_v18 = vpop.f32.mrf.mxu3 }
 0x705   : > { %v3605_v30 = vadd.f32 %v6339_v42, %v3604_v18 }
 0x707   : > { %3625 = vst [vmem:[%s6344_s14 + $0x68] sm:$0xff] %v3605_v30 }
 0x70d   : > { %v3607_v19 = vpop.f32.mrf.mxu3 }
 0x70e   : > { %v3572_v37 = vpop.f32.mrf.mxu0  ;;  %v3608_v46 = vadd.f32 %v6339_v42, %v3607_v19 }
 0x70f   : > { %v3573_v56 = vadd.f32 %v6339_v42, %v3572_v37 }
 0x710   : > { %3626 = vst [vmem:[%s6344_s14 + $0x70] sm:$0xff] %v3608_v46 }
 0x711   : > { %3612 = vst [vmem:[%s6344_s14] sm:$0xff] %v3573_v56 }
 0x715   : > { %v3609_v17 = vpop.f32.mrf.mxu3 }
 0x716   : > { %v3574_v22 = vpop.f32.mrf.mxu0  ;;  %v3610_v27 = vadd.f32 %v6339_v42, %v3609_v17 }
 0x717   : > { %v3575_v36 = vadd.f32 %v6339_v42, %v3574_v22 }
 0x718   : > { %3627 = vst [vmem:[%s6344_s14 + $0x78] sm:$0xff] %v3610_v27 }
 0x719   : > { %3613 = vst [vmem:[%s6344_s14 + $0x8] sm:$0xff] %v3575_v36 }
 0x71a PF: > { %s21_s17 = sadd.s32 1, %s4984_s17  }
 0x71b   : > { %p18_p4 = scmp.ge.s32.totalorder %s21_s17, 4  }
 0x71d   :  { %20 = sbr.rel (!%p18_p4) target bundleno = 1 (0x1), region = 100 }

</bundles_post_ra>
